<compile_context>
chip_gen: v5e
topology: v5e:2x2
jax: 0.10.0
libtpu: 0.0.40
codegen_flags: <defaults>
</compile_context>

<pallas_src>
import functools

import jax
import jax.numpy as jnp
from jax.experimental import pallas as pl
from jax.experimental.pallas import tpu as pltpu

EPS = 1e-5
NEG_SLOPE = 0.01            # nn.LeakyReLU() default
_CHUNK_TARGET_LANES = 4096  # aim for ~4096-lane output chunks, <= 8 chunks


# ----------------------------------------------------------------------------
# Pallas kernel: one (batch, spatial-chunk) step of Conv2d(k=4, s=2, p=1) as two
# lane-dense MXU GEMMs + fused per-channel batch statistics of the conv output.
# ----------------------------------------------------------------------------
def _conv_stats_kernel(sk_ref, w_ref, y_ref, sum_ref, sq_ref, *, tmw, wo):
    """
    sk_ref : (1, 1, 8*Cin, (TM+1)*Wo) bf16  8-phase input slab for this chunk
    w_ref  : (2, Cout, 8*Cin)         bf16  packed weights [row-tap dr, cout, phase*Cin+cin]
    y_ref  : (1, Cout, TM*Wo)         bf16  conv output chunk (spatial on the lane axis)
    sum_ref, sq_ref : (1, Cout, 1)    f32   per-channel sum / sum-of-squares,
                                            accumulated across the chunk grid axis.
    """
    x = sk_ref[0, 0]                                               # (8*Cin, Lc) bf16
    a0 = jnp.dot(w_ref[0], x, preferred_element_type=jnp.float32)  # (Cout, Lc) f32
    a1 = jnp.dot(w_ref[1], x, preferred_element_type=jnp.float32)  # (Cout, Lc) f32
    # Row-tap combine: out[:, hr*Wo + w] = a0[:, hr*Wo + w] + a1[:, (hr+1)*Wo + w].
    # The +Wo lane shift is taken on the small f32 accumulator, not the bf16 input.
    acc = a0[:, :tmw] + a1[:, wo:wo + tmw]                         # (Cout, TM*Wo) f32
    y_ref[0] = acc.astype(y_ref.dtype)

    @pl.when(pl.program_id(1) == 0)
    def _():
        sum_ref[...] = jnp.zeros_like(sum_ref)
        sq_ref[...] = jnp.zeros_like(sq_ref)

    sum_ref[0] += jnp.sum(acc, axis=1, keepdims=True)
    sq_ref[0] += jnp.sum(acc * acc, axis=1, keepdims=True)


# ----------------------------------------------------------------------------
# Wrappers
# ----------------------------------------------------------------------------
def _pick_chunks(ho, wo):
    """Choose number of output-row chunks (>=512 lanes each, <=8 chunks)."""
    m = ho * wo
    nc = max(1, min(8, m // _CHUNK_TARGET_LANES, ho))
    while ho % nc:
        nc -= 1
    return nc, ho // nc


def conv_chunked(sk, w_packed, ho, wo, tm):
    """sk: (N, NC, 8*Cin, (tm+1)*wo) bf16 ; w_packed: (2, Cout, 8*Cin) bf16.

    Returns y (N, Cout, ho*wo) bf16 and per-(batch, channel) sum / sumsq (f32).
    """
    n, nc, k8, lc = sk.shape
    cout = w_packed.shape[1]
    m = ho * wo
    tmw = tm * wo
    kernel = functools.partial(_conv_stats_kernel, tmw=tmw, wo=wo)
    y, s, q = pl.pallas_call(
        kernel,
        grid=(n, nc),
        in_specs=[
            pl.BlockSpec((1, 1, k8, lc), lambda i, j: (i, j, 0, 0)),
            pl.BlockSpec((2, cout, k8), lambda i, j: (0, 0, 0)),
        ],
        out_specs=(
            pl.BlockSpec((1, cout, tmw), lambda i, j: (i, 0, j)),
            pl.BlockSpec((1, cout, 1), lambda i, j: (i, 0, 0)),
            pl.BlockSpec((1, cout, 1), lambda i, j: (i, 0, 0)),
        ),
        out_shape=(
            jax.ShapeDtypeStruct((n, cout, m), jnp.bfloat16),
            jax.ShapeDtypeStruct((n, cout, 1), jnp.float32),
            jax.ShapeDtypeStruct((n, cout, 1), jnp.float32),
        ),
        compiler_params=pltpu.CompilerParams(
            dimension_semantics=("parallel", "arbitrary"),
            vmem_limit_bytes=32 * 1024 * 1024,
        ),
    )(sk, w_packed)
    return y, s[:, :, 0], q[:, :, 0]


def act_phase_pack(x, scale, shift, ho, wo, nc, tm):
    """Fused (BN affine + LeakyReLU) + 8-phase repack feeding the next conv layer.

    x            : (N, C, Hin, Win) previous conv output (bf16) or the raw input (f32)
    scale, shift : (C,) f32 BN affine of the previous layer, or None for the raw input
    Returns sk   : (N, nc, 8*C, (tm+1)*wo) bf16, chunked over output rows.
    Elementwise + pad + strided slices + stack: XLA fuses this into the sk producer,
    so the post-activation tensor never makes a separate HBM round trip.
    """
    n, c = x.shape[0], x.shape[1]
    if scale is None:
        a = x.astype(jnp.float32)
    else:
        t = x.astype(jnp.float32) * scale[None, :, None, None] + shift[None, :, None, None]
        a = jnp.where(t >= 0.0, t, NEG_SLOPE * t)
    a = a.astype(jnp.bfloat16)
    ap = jnp.pad(a, ((0, 0), (0, 0), (1, 1), (1, 1)))      # conv zero padding (exact)
    slabs = []
    for rp in (0, 1):
        for cp in (0, 1):
            for dc in (0, 1):
                slabs.append(ap[:, :, rp::2, cp + 2 * dc::2][:, :, :ho + 1, :wo])
    p = jnp.stack(slabs, axis=1).reshape(n, 8 * c, ho + 1, wo)
    if nc == 1:
        return p.reshape(n, 1, 8 * c, (ho + 1) * wo)
    chunks = [p[:, :, j * tm:j * tm + tm + 1, :].reshape(n, 8 * c, (tm + 1) * wo)
              for j in range(nc)]
    return jnp.stack(chunks, axis=1)


# ----------------------------------------------------------------------------
# The module
# ----------------------------------------------------------------------------
def init_params(key, input_channels, channels, latent_size):
    keys = jax.random.split(key, 17)
    p = {}
    chans = [input_channels, channels, 2 * channels, 4 * channels,
             8 * channels, 8 * channels]
    for i in range(5):
        cin, cout = chans[i], chans[i + 1]
        w = jax.random.normal(keys[i], (cout, cin, 4, 4), jnp.float32) / jnp.sqrt(cin * 16.0)
        # Pack (Cout, Cin, 4, 4) -> (dr, Cout, phase*Cin+cin), phase = 4*rp + 2*cp + dc,
        # kh = 2*dr + rp, kw = 2*dc + cp.  Conv bias omitted on purpose: train-mode
        # BatchNorm cancels it exactly.
        wp = (w.reshape(cout, cin, 2, 2, 2, 2)
               .transpose(2, 0, 3, 5, 4, 1)
               .reshape(2, cout, 8 * cin))
        p[f"wp{i+1}"] = wp.astype(jnp.bfloat16)
        p[f"gamma{i+1}"] = 1.0 + 0.1 * jax.random.normal(keys[5 + i], (cout,), jnp.float32)
        p[f"beta{i+1}"] = 0.1 * jax.random.normal(keys[10 + i], (cout,), jnp.float32)

    fc_in = channels * 8 * 8 * 8
    p["fc1_w"] = jax.random.normal(keys[15], (latent_size, fc_in), jnp.float32) / jnp.sqrt(fc_in)
    p["fc2_w"] = jax.random.normal(keys[16], (latent_size, fc_in), jnp.float32) / jnp.sqrt(fc_in)
    p["fc1_b"] = 0.01 * jnp.arange(latent_size, dtype=jnp.float32)
    p["fc2_b"] = -0.01 * jnp.arange(latent_size, dtype=jnp.float32)
    return p


def forward(params, x):
    n = x.shape[0]
    h, w = x.shape[2], x.shape[3]
    y = x                                   # raw input: no preceding BN / activation
    scale = shift = None
    for i in range(1, 6):
        ho, wo = h // 2, w // 2
        nc, tm = _pick_chunks(ho, wo)
        sk = act_phase_pack(y, scale, shift, ho, wo, nc, tm)
        wp = params[f"wp{i}"]
        cout = wp.shape[1]
        yf, s, q = conv_chunked(sk, wp, ho, wo, tm)
        # Train-mode BatchNorm batch statistics (tiny, XLA).
        cnt = float(n * ho * wo)
        mean = jnp.sum(s, axis=0) / cnt
        var = jnp.maximum(jnp.sum(q, axis=0) / cnt - mean * mean, 0.0)
        scale = params[f"gamma{i}"] / jnp.sqrt(var + EPS)
        shift = params[f"beta{i}"] - mean * scale
        y = yf.reshape(n, cout, ho, wo)     # free reshape, stays NCHW / spatial-minor
        h, w = ho, wo

    # Final BN affine + LeakyReLU (tiny) and the two Linear heads, in plain XLA.
    t = y.astype(jnp.float32) * scale[None, :, None, None] + shift[None, :, None, None]
    feat = jnp.where(t >= 0.0, t, NEG_SLOPE * t).reshape(n, -1)   # NCHW flatten order
    mu = feat @ params["fc1_w"].T + params["fc1_b"]
    logvar = feat @ params["fc2_w"].T + params["fc2_b"]
    # TODO(synk): torch.distributions Independent(Normal(mu, exp(logvar)), 1) has no
    # JAX-array equivalent object; we return its parameters (mu, scale=exp(logvar)).
    dist = (mu, jnp.exp(logvar))
    return mu, logvar, dist


if __name__ == "__main__":
    batch, input_channels, channels, latent_size = 2, 3, 4, 8
    H = W = 256  # five stride-2 convs -> 8x8, as required by fc1 (channels*8*8*8)

    key = jax.random.PRNGKey(0)
    k_param, k_x = jax.random.split(key)
    params = init_params(k_param, input_channels, channels, latent_size)
    x = jax.random.normal(k_x, (batch, input_channels, H, W), jnp.float32)

    fwd = jax.jit(forward)
    mu, logvar, dist = fwd(params, x)
    jax.block_until_ready((mu, logvar, dist))

    assert mu.shape == (batch, latent_size)
    assert logvar.shape == (batch, latent_size)
    assert bool(jnp.all(jnp.isfinite(mu))) and bool(jnp.all(jnp.isfinite(logvar)))
    print("KERNEL_OK")
</pallas_src>

<mosaic_0001>
module attributes {stable_mosaic.version = 11 : i64} {
  func.func @_conv_stats_kernel(%arg0: i32, %arg1: i32, %arg2: memref<1x1x24x4224xbf16, #tpu.memory_space<vmem>>, %arg3: memref<2x4x24xbf16, #tpu.memory_space<vmem>>, %arg4: memref<1x4x4096xbf16, #tpu.memory_space<vmem>>, %arg5: memref<1x4x1xf32, #tpu.memory_space<vmem>>, %arg6: memref<1x4x1xf32, #tpu.memory_space<vmem>>) attributes {dimension_semantics = [#tpu.dimension_semantics<parallel>, #tpu.dimension_semantics<arbitrary>], iteration_bounds = array<i64: 2, 4>, scalar_prefetch = 0 : i64, scratch_operands = 0 : i64, tpu.core_type = #tpu.core_type<tc>, window_params = [{transform_indices = @transform_0, window_bounds = array<i64: 1, 1, 24, 4224>}, {pipeline_mode = #tpu.pipeline_mode<synchronous>, transform_indices = @transform_1, window_bounds = array<i64: 2, 4, 24>}, {transform_indices = @transform_2, window_bounds = array<i64: 1, 4, 4096>}, {transform_indices = @transform_3, window_bounds = array<i64: 1, 4, 1>}, {transform_indices = @transform_4, window_bounds = array<i64: 1, 4, 1>}]} {
    %c0 = arith.constant 0 : index
    %c0_0 = arith.constant 0 : index
    %c0_1 = arith.constant 0 : index
    %c0_2 = arith.constant 0 : index
    %0 = vector.load %arg2[%c0, %c0_0, %c0_1, %c0_2] : memref<1x1x24x4224xbf16, #tpu.memory_space<vmem>>, vector<1x1x24x4224xbf16>
    %1 = vector.shape_cast %0 : vector<1x1x24x4224xbf16> to vector<24x4224xbf16>
    %c0_3 = arith.constant 0 : index
    %c0_4 = arith.constant 0 : index
    %c0_5 = arith.constant 0 : index
    %2 = vector.load %arg3[%c0_3, %c0_4, %c0_5] : memref<2x4x24xbf16, #tpu.memory_space<vmem>>, vector<1x4x24xbf16>
    %3 = vector.shape_cast %2 : vector<1x4x24xbf16> to vector<4x24xbf16>
    %cst = arith.constant dense<0.000000e+00> : vector<4x4224xf32>
    %4 = tpu.matmul %3, %1, %cst {dimension_numbers = #tpu.dot_dimension_numbers<[1], [0], [0], [1], [0, 0, 1, 1], [], []>} : vector<4x24xbf16>, vector<24x4224xbf16>, vector<4x4224xf32> -> vector<4x4224xf32>
    %c1 = arith.constant 1 : index
    %c0_6 = arith.constant 0 : index
    %c0_7 = arith.constant 0 : index
    %5 = vector.load %arg3[%c1, %c0_6, %c0_7] : memref<2x4x24xbf16, #tpu.memory_space<vmem>>, vector<1x4x24xbf16>
    %6 = vector.shape_cast %5 : vector<1x4x24xbf16> to vector<4x24xbf16>
    %cst_8 = arith.constant dense<0.000000e+00> : vector<4x4224xf32>
    %7 = tpu.matmul %6, %1, %cst_8 {dimension_numbers = #tpu.dot_dimension_numbers<[1], [0], [0], [1], [0, 0, 1, 1], [], []>} : vector<4x24xbf16>, vector<24x4224xbf16>, vector<4x4224xf32> -> vector<4x4224xf32>
    %8 = vector.extract_strided_slice %4 {offsets = [0, 0], sizes = [4, 4096], strides = [1, 1]} : vector<4x4224xf32> to vector<4x4096xf32>
    %9 = vector.extract_strided_slice %7 {offsets = [0, 128], sizes = [4, 4096], strides = [1, 1]} : vector<4x4224xf32> to vector<4x4096xf32>
    %10 = arith.addf %8, %9 : vector<4x4096xf32>
    %11 = arith.truncf %10 : vector<4x4096xf32> to vector<4x4096xbf16>
    %c0_9 = arith.constant 0 : index
    %c0_10 = arith.constant 0 : index
    %c0_11 = arith.constant 0 : index
    %12 = vector.load %arg4[%c0_9, %c0_10, %c0_11] : memref<1x4x4096xbf16, #tpu.memory_space<vmem>>, vector<1x4x4096xbf16>
    %13 = vector.shape_cast %12 : vector<1x4x4096xbf16> to vector<4x4096xbf16>
    %14 = vector.shape_cast %11 : vector<4x4096xbf16> to vector<1x4x4096xbf16>
    tpu.vector_store %arg4[%c0_9, %c0_10, %c0_11], %14 {strides = array<i32>} : memref<1x4x4096xbf16, #tpu.memory_space<vmem>>, vector<1x4x4096xbf16>,
    %c0_i32 = arith.constant 0 : i32
    %15 = arith.cmpi eq, %arg1, %c0_i32 : i32
    %16 = arith.extui %15 : i1 to i32
    %c0_i32_12 = arith.constant 0 : i32
    %17 = arith.cmpi ne, %16, %c0_i32_12 : i32
    scf.if %17 {
      %cst_27 = arith.constant 0.000000e+00 : f32
      %35 = vector.broadcast %cst_27 : f32 to vector<1x4x1xf32>
      %c0_28 = arith.constant 0 : index
      %c0_29 = arith.constant 0 : index
      %c0_30 = arith.constant 0 : index
      %36 = vector.load %arg5[%c0_28, %c0_29, %c0_30] : memref<1x4x1xf32, #tpu.memory_space<vmem>>, vector<1x4x1xf32>
      tpu.vector_store %arg5[%c0_28, %c0_29, %c0_30], %35 {strides = array<i32>} : memref<1x4x1xf32, #tpu.memory_space<vmem>>, vector<1x4x1xf32>,
      %cst_31 = arith.constant 0.000000e+00 : f32
      %37 = vector.broadcast %cst_31 : f32 to vector<1x4x1xf32>
      %c0_32 = arith.constant 0 : index
      %c0_33 = arith.constant 0 : index
      %c0_34 = arith.constant 0 : index
      %38 = vector.load %arg6[%c0_32, %c0_33, %c0_34] : memref<1x4x1xf32, #tpu.memory_space<vmem>>, vector<1x4x1xf32>
      tpu.vector_store %arg6[%c0_32, %c0_33, %c0_34], %37 {strides = array<i32>} : memref<1x4x1xf32, #tpu.memory_space<vmem>>, vector<1x4x1xf32>,
    } else {
    }
    %c0_13 = arith.constant 0 : index
    %c0_14 = arith.constant 0 : index
    %c0_15 = arith.constant 0 : index
    %18 = vector.load %arg5[%c0_13, %c0_14, %c0_15] : memref<1x4x1xf32, #tpu.memory_space<vmem>>, vector<1x4x1xf32>
    %19 = vector.shape_cast %18 : vector<1x4x1xf32> to vector<4x1xf32>
    %cst_16 = arith.constant dense<0.000000e+00> : vector<4xf32>
    %20 = vector.multi_reduction <add>, %10, %cst_16 [1] : vector<4x4096xf32> to vector<4xf32>
    %21 = vector.shape_cast %20 : vector<4xf32> to vector<4x1xf32>
    %22 = arith.addf %19, %21 : vector<4x1xf32>
    %c0_17 = arith.constant 0 : index
    %c0_18 = arith.constant 0 : index
    %c0_19 = arith.constant 0 : index
    %23 = vector.load %arg5[%c0_17, %c0_18, %c0_19] : memref<1x4x1xf32, #tpu.memory_space<vmem>>, vector<1x4x1xf32>
    %24 = vector.shape_cast %23 : vector<1x4x1xf32> to vector<4x1xf32>
    %25 = vector.shape_cast %22 : vector<4x1xf32> to vector<1x4x1xf32>
    tpu.vector_store %arg5[%c0_17, %c0_18, %c0_19], %25 {strides = array<i32>} : memref<1x4x1xf32, #tpu.memory_space<vmem>>, vector<1x4x1xf32>,
    %c0_20 = arith.constant 0 : index
    %c0_21 = arith.constant 0 : index
    %c0_22 = arith.constant 0 : index
    %26 = vector.load %arg6[%c0_20, %c0_21, %c0_22] : memref<1x4x1xf32, #tpu.memory_space<vmem>>, vector<1x4x1xf32>
    %27 = vector.shape_cast %26 : vector<1x4x1xf32> to vector<4x1xf32>
    %28 = arith.mulf %10, %10 : vector<4x4096xf32>
    %cst_23 = arith.constant dense<0.000000e+00> : vector<4xf32>
    %29 = vector.multi_reduction <add>, %28, %cst_23 [1] : vector<4x4096xf32> to vector<4xf32>
    %30 = vector.shape_cast %29 : vector<4xf32> to vector<4x1xf32>
    %31 = arith.addf %27, %30 : vector<4x1xf32>
    %c0_24 = arith.constant 0 : index
    %c0_25 = arith.constant 0 : index
    %c0_26 = arith.constant 0 : index
    %32 = vector.load %arg6[%c0_24, %c0_25, %c0_26] : memref<1x4x1xf32, #tpu.memory_space<vmem>>, vector<1x4x1xf32>
    %33 = vector.shape_cast %32 : vector<1x4x1xf32> to vector<4x1xf32>
    %34 = vector.shape_cast %31 : vector<4x1xf32> to vector<1x4x1xf32>
    tpu.vector_store %arg6[%c0_24, %c0_25, %c0_26], %34 {strides = array<i32>} : memref<1x4x1xf32, #tpu.memory_space<vmem>>, vector<1x4x1xf32>,
    return
  }
  func.func @transform_0(%arg0: i32, %arg1: i32) -> (i32, i32, i32, i32) {
    %c0_i32 = arith.constant 0 : i32
    %c0_i32_0 = arith.constant 0 : i32
    %c0_i32_1 = arith.constant 0 : i32
    return %arg0, %arg1, %c0_i32, %c0_i32_0 : i32, i32, i32, i32
  }
  func.func @transform_1(%arg0: i32, %arg1: i32) -> (i32, i32, i32) {
    %c0_i32 = arith.constant 0 : i32
    %c0_i32_0 = arith.constant 0 : i32
    %c0_i32_1 = arith.constant 0 : i32
    %c0_i32_2 = arith.constant 0 : i32
    return %c0_i32, %c0_i32_0, %c0_i32_1 : i32, i32, i32
  }
  func.func @transform_2(%arg0: i32, %arg1: i32) -> (i32, i32, i32) {
    %c0_i32 = arith.constant 0 : i32
    %c0_i32_0 = arith.constant 0 : i32
    return %arg0, %c0_i32, %arg1 : i32, i32, i32
  }
  func.func @transform_3(%arg0: i32, %arg1: i32) -> (i32, i32, i32) {
    %c0_i32 = arith.constant 0 : i32
    %c0_i32_0 = arith.constant 0 : i32
    %c0_i32_1 = arith.constant 0 : i32
    return %arg0, %c0_i32, %c0_i32_0 : i32, i32, i32
  }
  func.func @transform_4(%arg0: i32, %arg1: i32) -> (i32, i32, i32) {
    %c0_i32 = arith.constant 0 : i32
    %c0_i32_0 = arith.constant 0 : i32
    %c0_i32_1 = arith.constant 0 : i32
    return %arg0, %c0_i32, %c0_i32_0 : i32, i32, i32
  }
}

module attributes {stable_mosaic.version = 11 : i64} {
  func.func @_conv_stats_kernel(%arg0: i32, %arg1: i32, %arg2: memref<1x1x32x4160xbf16, #tpu.memory_space<vmem>>, %arg3: memref<2x8x32xbf16, #tpu.memory_space<vmem>>, %arg4: memref<1x8x4096xbf16, #tpu.memory_space<vmem>>, %arg5: memref<1x8x1xf32, #tpu.memory_space<vmem>>, %arg6: memref<1x8x1xf32, #tpu.memory_space<vmem>>) attributes {dimension_semantics = [#tpu.dimension_semantics<parallel>, #tpu.dimension_semantics<arbitrary>], iteration_bounds = array<i64: 2, 1>, scalar_prefetch = 0 : i64, scratch_operands = 0 : i64, tpu.core_type = #tpu.core_type<tc>, window_params = [{transform_indices = @transform_0, window_bounds = array<i64: 1, 1, 32, 4160>}, {pipeline_mode = #tpu.pipeline_mode<synchronous>, transform_indices = @transform_1, window_bounds = array<i64: 2, 8, 32>}, {transform_indices = @transform_2, window_bounds = array<i64: 1, 8, 4096>}, {transform_indices = @transform_3, window_bounds = array<i64: 1, 8, 1>}, {transform_indices = @transform_4, window_bounds = array<i64: 1, 8, 1>}]} {
    %c0 = arith.constant 0 : index
    %c0_0 = arith.constant 0 : index
    %c0_1 = arith.constant 0 : index
    %c0_2 = arith.constant 0 : index
    %0 = vector.load %arg2[%c0, %c0_0, %c0_1, %c0_2] : memref<1x1x32x4160xbf16, #tpu.memory_space<vmem>>, vector<1x1x32x4160xbf16>
    %1 = vector.shape_cast %0 : vector<1x1x32x4160xbf16> to vector<32x4160xbf16>
    %c0_3 = arith.constant 0 : index
    %c0_4 = arith.constant 0 : index
    %c0_5 = arith.constant 0 : index
    %2 = vector.load %arg3[%c0_3, %c0_4, %c0_5] : memref<2x8x32xbf16, #tpu.memory_space<vmem>>, vector<1x8x32xbf16>
    %3 = vector.shape_cast %2 : vector<1x8x32xbf16> to vector<8x32xbf16>
    %cst = arith.constant dense<0.000000e+00> : vector<8x4160xf32>
    %4 = tpu.matmul %3, %1, %cst {dimension_numbers = #tpu.dot_dimension_numbers<[1], [0], [0], [1], [0, 0, 1, 1], [], []>} : vector<8x32xbf16>, vector<32x4160xbf16>, vector<8x4160xf32> -> vector<8x4160xf32>
    %c1 = arith.constant 1 : index
    %c0_6 = arith.constant 0 : index
    %c0_7 = arith.constant 0 : index
    %5 = vector.load %arg3[%c1, %c0_6, %c0_7] : memref<2x8x32xbf16, #tpu.memory_space<vmem>>, vector<1x8x32xbf16>
    %6 = vector.shape_cast %5 : vector<1x8x32xbf16> to vector<8x32xbf16>
    %cst_8 = arith.constant dense<0.000000e+00> : vector<8x4160xf32>
    %7 = tpu.matmul %6, %1, %cst_8 {dimension_numbers = #tpu.dot_dimension_numbers<[1], [0], [0], [1], [0, 0, 1, 1], [], []>} : vector<8x32xbf16>, vector<32x4160xbf16>, vector<8x4160xf32> -> vector<8x4160xf32>
    %8 = vector.extract_strided_slice %4 {offsets = [0, 0], sizes = [8, 4096], strides = [1, 1]} : vector<8x4160xf32> to vector<8x4096xf32>
    %9 = vector.extract_strided_slice %7 {offsets = [0, 64], sizes = [8, 4096], strides = [1, 1]} : vector<8x4160xf32> to vector<8x4096xf32>
    %10 = arith.addf %8, %9 : vector<8x4096xf32>
    %11 = arith.truncf %10 : vector<8x4096xf32> to vector<8x4096xbf16>
    %c0_9 = arith.constant 0 : index
    %c0_10 = arith.constant 0 : index
    %c0_11 = arith.constant 0 : index
    %12 = vector.load %arg4[%c0_9, %c0_10, %c0_11] : memref<1x8x4096xbf16, #tpu.memory_space<vmem>>, vector<1x8x4096xbf16>
    %13 = vector.shape_cast %12 : vector<1x8x4096xbf16> to vector<8x4096xbf16>
    %14 = vector.shape_cast %11 : vector<8x4096xbf16> to vector<1x8x4096xbf16>
    tpu.vector_store %arg4[%c0_9, %c0_10, %c0_11], %14 {strides = array<i32>} : memref<1x8x4096xbf16, #tpu.memory_space<vmem>>, vector<1x8x4096xbf16>,
    %c0_i32 = arith.constant 0 : i32
    %15 = arith.cmpi eq, %arg1, %c0_i32 : i32
    %16 = arith.extui %15 : i1 to i32
    %c0_i32_12 = arith.constant 0 : i32
    %17 = arith.cmpi ne, %16, %c0_i32_12 : i32
    scf.if %17 {
      %cst_27 = arith.constant 0.000000e+00 : f32
      %35 = vector.broadcast %cst_27 : f32 to vector<1x8x1xf32>
      %c0_28 = arith.constant 0 : index
      %c0_29 = arith.constant 0 : index
      %c0_30 = arith.constant 0 : index
      %36 = vector.load %arg5[%c0_28, %c0_29, %c0_30] : memref<1x8x1xf32, #tpu.memory_space<vmem>>, vector<1x8x1xf32>
      tpu.vector_store %arg5[%c0_28, %c0_29, %c0_30], %35 {strides = array<i32>} : memref<1x8x1xf32, #tpu.memory_space<vmem>>, vector<1x8x1xf32>,
      %cst_31 = arith.constant 0.000000e+00 : f32
      %37 = vector.broadcast %cst_31 : f32 to vector<1x8x1xf32>
      %c0_32 = arith.constant 0 : index
      %c0_33 = arith.constant 0 : index
      %c0_34 = arith.constant 0 : index
      %38 = vector.load %arg6[%c0_32, %c0_33, %c0_34] : memref<1x8x1xf32, #tpu.memory_space<vmem>>, vector<1x8x1xf32>
      tpu.vector_store %arg6[%c0_32, %c0_33, %c0_34], %37 {strides = array<i32>} : memref<1x8x1xf32, #tpu.memory_space<vmem>>, vector<1x8x1xf32>,
    } else {
    }
    %c0_13 = arith.constant 0 : index
    %c0_14 = arith.constant 0 : index
    %c0_15 = arith.constant 0 : index
    %18 = vector.load %arg5[%c0_13, %c0_14, %c0_15] : memref<1x8x1xf32, #tpu.memory_space<vmem>>, vector<1x8x1xf32>
    %19 = vector.shape_cast %18 : vector<1x8x1xf32> to vector<8x1xf32>
    %cst_16 = arith.constant dense<0.000000e+00> : vector<8xf32>
    %20 = vector.multi_reduction <add>, %10, %cst_16 [1] : vector<8x4096xf32> to vector<8xf32>
    %21 = vector.shape_cast %20 : vector<8xf32> to vector<8x1xf32>
    %22 = arith.addf %19, %21 : vector<8x1xf32>
    %c0_17 = arith.constant 0 : index
    %c0_18 = arith.constant 0 : index
    %c0_19 = arith.constant 0 : index
    %23 = vector.load %arg5[%c0_17, %c0_18, %c0_19] : memref<1x8x1xf32, #tpu.memory_space<vmem>>, vector<1x8x1xf32>
    %24 = vector.shape_cast %23 : vector<1x8x1xf32> to vector<8x1xf32>
    %25 = vector.shape_cast %22 : vector<8x1xf32> to vector<1x8x1xf32>
    tpu.vector_store %arg5[%c0_17, %c0_18, %c0_19], %25 {strides = array<i32>} : memref<1x8x1xf32, #tpu.memory_space<vmem>>, vector<1x8x1xf32>,
    %c0_20 = arith.constant 0 : index
    %c0_21 = arith.constant 0 : index
    %c0_22 = arith.constant 0 : index
    %26 = vector.load %arg6[%c0_20, %c0_21, %c0_22] : memref<1x8x1xf32, #tpu.memory_space<vmem>>, vector<1x8x1xf32>
    %27 = vector.shape_cast %26 : vector<1x8x1xf32> to vector<8x1xf32>
    %28 = arith.mulf %10, %10 : vector<8x4096xf32>
    %cst_23 = arith.constant dense<0.000000e+00> : vector<8xf32>
    %29 = vector.multi_reduction <add>, %28, %cst_23 [1] : vector<8x4096xf32> to vector<8xf32>
    %30 = vector.shape_cast %29 : vector<8xf32> to vector<8x1xf32>
    %31 = arith.addf %27, %30 : vector<8x1xf32>
    %c0_24 = arith.constant 0 : index
    %c0_25 = arith.constant 0 : index
    %c0_26 = arith.constant 0 : index
    %32 = vector.load %arg6[%c0_24, %c0_25, %c0_26] : memref<1x8x1xf32, #tpu.memory_space<vmem>>, vector<1x8x1xf32>
    %33 = vector.shape_cast %32 : vector<1x8x1xf32> to vector<8x1xf32>
    %34 = vector.shape_cast %31 : vector<8x1xf32> to vector<1x8x1xf32>
    tpu.vector_store %arg6[%c0_24, %c0_25, %c0_26], %34 {strides = array<i32>} : memref<1x8x1xf32, #tpu.memory_space<vmem>>, vector<1x8x1xf32>,
    return
  }
  func.func @transform_0(%arg0: i32, %arg1: i32) -> (i32, i32, i32, i32) {
    %c0_i32 = arith.constant 0 : i32
    %c0_i32_0 = arith.constant 0 : i32
    %c0_i32_1 = arith.constant 0 : i32
    return %arg0, %arg1, %c0_i32, %c0_i32_0 : i32, i32, i32, i32
  }
  func.func @transform_1(%arg0: i32, %arg1: i32) -> (i32, i32, i32) {
    %c0_i32 = arith.constant 0 : i32
    %c0_i32_0 = arith.constant 0 : i32
    %c0_i32_1 = arith.constant 0 : i32
    %c0_i32_2 = arith.constant 0 : i32
    return %c0_i32, %c0_i32_0, %c0_i32_1 : i32, i32, i32
  }
  func.func @transform_2(%arg0: i32, %arg1: i32) -> (i32, i32, i32) {
    %c0_i32 = arith.constant 0 : i32
    %c0_i32_0 = arith.constant 0 : i32
    return %arg0, %c0_i32, %arg1 : i32, i32, i32
  }
  func.func @transform_3(%arg0: i32, %arg1: i32) -> (i32, i32, i32) {
    %c0_i32 = arith.constant 0 : i32
    %c0_i32_0 = arith.constant 0 : i32
    %c0_i32_1 = arith.constant 0 : i32
    return %arg0, %c0_i32, %c0_i32_0 : i32, i32, i32
  }
  func.func @transform_4(%arg0: i32, %arg1: i32) -> (i32, i32, i32) {
    %c0_i32 = arith.constant 0 : i32
    %c0_i32_0 = arith.constant 0 : i32
    %c0_i32_1 = arith.constant 0 : i32
    return %arg0, %c0_i32, %c0_i32_0 : i32, i32, i32
  }
}

module attributes {stable_mosaic.version = 11 : i64} {
  func.func @_conv_stats_kernel(%arg0: i32, %arg1: i32, %arg2: memref<1x1x64x1056xbf16, #tpu.memory_space<vmem>>, %arg3: memref<2x16x64xbf16, #tpu.memory_space<vmem>>, %arg4: memref<1x16x1024xbf16, #tpu.memory_space<vmem>>, %arg5: memref<1x16x1xf32, #tpu.memory_space<vmem>>, %arg6: memref<1x16x1xf32, #tpu.memory_space<vmem>>) attributes {dimension_semantics = [#tpu.dimension_semantics<parallel>, #tpu.dimension_semantics<arbitrary>], iteration_bounds = array<i64: 2, 1>, scalar_prefetch = 0 : i64, scratch_operands = 0 : i64, tpu.core_type = #tpu.core_type<tc>, window_params = [{transform_indices = @transform_0, window_bounds = array<i64: 1, 1, 64, 1056>}, {pipeline_mode = #tpu.pipeline_mode<synchronous>, transform_indices = @transform_1, window_bounds = array<i64: 2, 16, 64>}, {transform_indices = @transform_2, window_bounds = array<i64: 1, 16, 1024>}, {transform_indices = @transform_3, window_bounds = array<i64: 1, 16, 1>}, {transform_indices = @transform_4, window_bounds = array<i64: 1, 16, 1>}]} {
    %c0 = arith.constant 0 : index
    %c0_0 = arith.constant 0 : index
    %c0_1 = arith.constant 0 : index
    %c0_2 = arith.constant 0 : index
    %0 = vector.load %arg2[%c0, %c0_0, %c0_1, %c0_2] : memref<1x1x64x1056xbf16, #tpu.memory_space<vmem>>, vector<1x1x64x1056xbf16>
    %1 = vector.shape_cast %0 : vector<1x1x64x1056xbf16> to vector<64x1056xbf16>
    %c0_3 = arith.constant 0 : index
    %c0_4 = arith.constant 0 : index
    %c0_5 = arith.constant 0 : index
    %2 = vector.load %arg3[%c0_3, %c0_4, %c0_5] : memref<2x16x64xbf16, #tpu.memory_space<vmem>>, vector<1x16x64xbf16>
    %3 = vector.shape_cast %2 : vector<1x16x64xbf16> to vector<16x64xbf16>
    %cst = arith.constant dense<0.000000e+00> : vector<16x1056xf32>
    %4 = tpu.matmul %3, %1, %cst {dimension_numbers = #tpu.dot_dimension_numbers<[1], [0], [0], [1], [0, 0, 1, 1], [], []>} : vector<16x64xbf16>, vector<64x1056xbf16>, vector<16x1056xf32> -> vector<16x1056xf32>
    %c1 = arith.constant 1 : index
    %c0_6 = arith.constant 0 : index
    %c0_7 = arith.constant 0 : index
    %5 = vector.load %arg3[%c1, %c0_6, %c0_7] : memref<2x16x64xbf16, #tpu.memory_space<vmem>>, vector<1x16x64xbf16>
    %6 = vector.shape_cast %5 : vector<1x16x64xbf16> to vector<16x64xbf16>
    %cst_8 = arith.constant dense<0.000000e+00> : vector<16x1056xf32>
    %7 = tpu.matmul %6, %1, %cst_8 {dimension_numbers = #tpu.dot_dimension_numbers<[1], [0], [0], [1], [0, 0, 1, 1], [], []>} : vector<16x64xbf16>, vector<64x1056xbf16>, vector<16x1056xf32> -> vector<16x1056xf32>
    %8 = vector.extract_strided_slice %4 {offsets = [0, 0], sizes = [16, 1024], strides = [1, 1]} : vector<16x1056xf32> to vector<16x1024xf32>
    %9 = vector.extract_strided_slice %7 {offsets = [0, 32], sizes = [16, 1024], strides = [1, 1]} : vector<16x1056xf32> to vector<16x1024xf32>
    %10 = arith.addf %8, %9 : vector<16x1024xf32>
    %11 = arith.truncf %10 : vector<16x1024xf32> to vector<16x1024xbf16>
    %c0_9 = arith.constant 0 : index
    %c0_10 = arith.constant 0 : index
    %c0_11 = arith.constant 0 : index
    %12 = vector.load %arg4[%c0_9, %c0_10, %c0_11] : memref<1x16x1024xbf16, #tpu.memory_space<vmem>>, vector<1x16x1024xbf16>
    %13 = vector.shape_cast %12 : vector<1x16x1024xbf16> to vector<16x1024xbf16>
    %14 = vector.shape_cast %11 : vector<16x1024xbf16> to vector<1x16x1024xbf16>
    tpu.vector_store %arg4[%c0_9, %c0_10, %c0_11], %14 {strides = array<i32>} : memref<1x16x1024xbf16, #tpu.memory_space<vmem>>, vector<1x16x1024xbf16>,
    %c0_i32 = arith.constant 0 : i32
    %15 = arith.cmpi eq, %arg1, %c0_i32 : i32
    %16 = arith.extui %15 : i1 to i32
    %c0_i32_12 = arith.constant 0 : i32
    %17 = arith.cmpi ne, %16, %c0_i32_12 : i32
    scf.if %17 {
      %cst_27 = arith.constant 0.000000e+00 : f32
      %35 = vector.broadcast %cst_27 : f32 to vector<1x16x1xf32>
      %c0_28 = arith.constant 0 : index
      %c0_29 = arith.constant 0 : index
      %c0_30 = arith.constant 0 : index
      %36 = vector.load %arg5[%c0_28, %c0_29, %c0_30] : memref<1x16x1xf32, #tpu.memory_space<vmem>>, vector<1x16x1xf32>
      tpu.vector_store %arg5[%c0_28, %c0_29, %c0_30], %35 {strides = array<i32>} : memref<1x16x1xf32, #tpu.memory_space<vmem>>, vector<1x16x1xf32>,
      %cst_31 = arith.constant 0.000000e+00 : f32
      %37 = vector.broadcast %cst_31 : f32 to vector<1x16x1xf32>
      %c0_32 = arith.constant 0 : index
      %c0_33 = arith.constant 0 : index
      %c0_34 = arith.constant 0 : index
      %38 = vector.load %arg6[%c0_32, %c0_33, %c0_34] : memref<1x16x1xf32, #tpu.memory_space<vmem>>, vector<1x16x1xf32>
      tpu.vector_store %arg6[%c0_32, %c0_33, %c0_34], %37 {strides = array<i32>} : memref<1x16x1xf32, #tpu.memory_space<vmem>>, vector<1x16x1xf32>,
    } else {
    }
    %c0_13 = arith.constant 0 : index
    %c0_14 = arith.constant 0 : index
    %c0_15 = arith.constant 0 : index
    %18 = vector.load %arg5[%c0_13, %c0_14, %c0_15] : memref<1x16x1xf32, #tpu.memory_space<vmem>>, vector<1x16x1xf32>
    %19 = vector.shape_cast %18 : vector<1x16x1xf32> to vector<16x1xf32>
    %cst_16 = arith.constant dense<0.000000e+00> : vector<16xf32>
    %20 = vector.multi_reduction <add>, %10, %cst_16 [1] : vector<16x1024xf32> to vector<16xf32>
    %21 = vector.shape_cast %20 : vector<16xf32> to vector<16x1xf32>
    %22 = arith.addf %19, %21 : vector<16x1xf32>
    %c0_17 = arith.constant 0 : index
    %c0_18 = arith.constant 0 : index
    %c0_19 = arith.constant 0 : index
    %23 = vector.load %arg5[%c0_17, %c0_18, %c0_19] : memref<1x16x1xf32, #tpu.memory_space<vmem>>, vector<1x16x1xf32>
    %24 = vector.shape_cast %23 : vector<1x16x1xf32> to vector<16x1xf32>
    %25 = vector.shape_cast %22 : vector<16x1xf32> to vector<1x16x1xf32>
    tpu.vector_store %arg5[%c0_17, %c0_18, %c0_19], %25 {strides = array<i32>} : memref<1x16x1xf32, #tpu.memory_space<vmem>>, vector<1x16x1xf32>,
    %c0_20 = arith.constant 0 : index
    %c0_21 = arith.constant 0 : index
    %c0_22 = arith.constant 0 : index
    %26 = vector.load %arg6[%c0_20, %c0_21, %c0_22] : memref<1x16x1xf32, #tpu.memory_space<vmem>>, vector<1x16x1xf32>
    %27 = vector.shape_cast %26 : vector<1x16x1xf32> to vector<16x1xf32>
    %28 = arith.mulf %10, %10 : vector<16x1024xf32>
    %cst_23 = arith.constant dense<0.000000e+00> : vector<16xf32>
    %29 = vector.multi_reduction <add>, %28, %cst_23 [1] : vector<16x1024xf32> to vector<16xf32>
    %30 = vector.shape_cast %29 : vector<16xf32> to vector<16x1xf32>
    %31 = arith.addf %27, %30 : vector<16x1xf32>
    %c0_24 = arith.constant 0 : index
    %c0_25 = arith.constant 0 : index
    %c0_26 = arith.constant 0 : index
    %32 = vector.load %arg6[%c0_24, %c0_25, %c0_26] : memref<1x16x1xf32, #tpu.memory_space<vmem>>, vector<1x16x1xf32>
    %33 = vector.shape_cast %32 : vector<1x16x1xf32> to vector<16x1xf32>
    %34 = vector.shape_cast %31 : vector<16x1xf32> to vector<1x16x1xf32>
    tpu.vector_store %arg6[%c0_24, %c0_25, %c0_26], %34 {strides = array<i32>} : memref<1x16x1xf32, #tpu.memory_space<vmem>>, vector<1x16x1xf32>,
    return
  }
  func.func @transform_0(%arg0: i32, %arg1: i32) -> (i32, i32, i32, i32) {
    %c0_i32 = arith.constant 0 : i32
    %c0_i32_0 = arith.constant 0 : i32
    %c0_i32_1 = arith.constant 0 : i32
    return %arg0, %arg1, %c0_i32, %c0_i32_0 : i32, i32, i32, i32
  }
  func.func @transform_1(%arg0: i32, %arg1: i32) -> (i32, i32, i32) {
    %c0_i32 = arith.constant 0 : i32
    %c0_i32_0 = arith.constant 0 : i32
    %c0_i32_1 = arith.constant 0 : i32
    %c0_i32_2 = arith.constant 0 : i32
    return %c0_i32, %c0_i32_0, %c0_i32_1 : i32, i32, i32
  }
  func.func @transform_2(%arg0: i32, %arg1: i32) -> (i32, i32, i32) {
    %c0_i32 = arith.constant 0 : i32
    %c0_i32_0 = arith.constant 0 : i32
    return %arg0, %c0_i32, %arg1 : i32, i32, i32
  }
  func.func @transform_3(%arg0: i32, %arg1: i32) -> (i32, i32, i32) {
    %c0_i32 = arith.constant 0 : i32
    %c0_i32_0 = arith.constant 0 : i32
    %c0_i32_1 = arith.constant 0 : i32
    return %arg0, %c0_i32, %c0_i32_0 : i32, i32, i32
  }
  func.func @transform_4(%arg0: i32, %arg1: i32) -> (i32, i32, i32) {
    %c0_i32 = arith.constant 0 : i32
    %c0_i32_0 = arith.constant 0 : i32
    %c0_i32_1 = arith.constant 0 : i32
    return %arg0, %c0_i32, %c0_i32_0 : i32, i32, i32
  }
}

module attributes {stable_mosaic.version = 11 : i64} {
  func.func @_conv_stats_kernel(%arg0: i32, %arg1: i32, %arg2: memref<1x1x128x272xbf16, #tpu.memory_space<vmem>>, %arg3: memref<2x32x128xbf16, #tpu.memory_space<vmem>>, %arg4: memref<1x32x256xbf16, #tpu.memory_space<vmem>>, %arg5: memref<1x32x1xf32, #tpu.memory_space<vmem>>, %arg6: memref<1x32x1xf32, #tpu.memory_space<vmem>>) attributes {dimension_semantics = [#tpu.dimension_semantics<parallel>, #tpu.dimension_semantics<arbitrary>], iteration_bounds = array<i64: 2, 1>, scalar_prefetch = 0 : i64, scratch_operands = 0 : i64, tpu.core_type = #tpu.core_type<tc>, window_params = [{transform_indices = @transform_0, window_bounds = array<i64: 1, 1, 128, 272>}, {pipeline_mode = #tpu.pipeline_mode<synchronous>, transform_indices = @transform_1, window_bounds = array<i64: 2, 32, 128>}, {transform_indices = @transform_2, window_bounds = array<i64: 1, 32, 256>}, {transform_indices = @transform_3, window_bounds = array<i64: 1, 32, 1>}, {transform_indices = @transform_4, window_bounds = array<i64: 1, 32, 1>}]} {
    %c0 = arith.constant 0 : index
    %c0_0 = arith.constant 0 : index
    %c0_1 = arith.constant 0 : index
    %c0_2 = arith.constant 0 : index
    %0 = vector.load %arg2[%c0, %c0_0, %c0_1, %c0_2] : memref<1x1x128x272xbf16, #tpu.memory_space<vmem>>, vector<1x1x128x272xbf16>
    %1 = vector.shape_cast %0 : vector<1x1x128x272xbf16> to vector<128x272xbf16>
    %c0_3 = arith.constant 0 : index
    %c0_4 = arith.constant 0 : index
    %c0_5 = arith.constant 0 : index
    %2 = vector.load %arg3[%c0_3, %c0_4, %c0_5] : memref<2x32x128xbf16, #tpu.memory_space<vmem>>, vector<1x32x128xbf16>
    %3 = vector.shape_cast %2 : vector<1x32x128xbf16> to vector<32x128xbf16>
    %cst = arith.constant dense<0.000000e+00> : vector<32x272xf32>
    %4 = tpu.matmul %3, %1, %cst {dimension_numbers = #tpu.dot_dimension_numbers<[1], [0], [0], [1], [0, 0, 1, 1], [], []>} : vector<32x128xbf16>, vector<128x272xbf16>, vector<32x272xf32> -> vector<32x272xf32>
    %c1 = arith.constant 1 : index
    %c0_6 = arith.constant 0 : index
    %c0_7 = arith.constant 0 : index
    %5 = vector.load %arg3[%c1, %c0_6, %c0_7] : memref<2x32x128xbf16, #tpu.memory_space<vmem>>, vector<1x32x128xbf16>
    %6 = vector.shape_cast %5 : vector<1x32x128xbf16> to vector<32x128xbf16>
    %cst_8 = arith.constant dense<0.000000e+00> : vector<32x272xf32>
    %7 = tpu.matmul %6, %1, %cst_8 {dimension_numbers = #tpu.dot_dimension_numbers<[1], [0], [0], [1], [0, 0, 1, 1], [], []>} : vector<32x128xbf16>, vector<128x272xbf16>, vector<32x272xf32> -> vector<32x272xf32>
    %8 = vector.extract_strided_slice %4 {offsets = [0, 0], sizes = [32, 256], strides = [1, 1]} : vector<32x272xf32> to vector<32x256xf32>
    %9 = vector.extract_strided_slice %7 {offsets = [0, 16], sizes = [32, 256], strides = [1, 1]} : vector<32x272xf32> to vector<32x256xf32>
    %10 = arith.addf %8, %9 : vector<32x256xf32>
    %11 = arith.truncf %10 : vector<32x256xf32> to vector<32x256xbf16>
    %c0_9 = arith.constant 0 : index
    %c0_10 = arith.constant 0 : index
    %c0_11 = arith.constant 0 : index
    %12 = vector.load %arg4[%c0_9, %c0_10, %c0_11] : memref<1x32x256xbf16, #tpu.memory_space<vmem>>, vector<1x32x256xbf16>
    %13 = vector.shape_cast %12 : vector<1x32x256xbf16> to vector<32x256xbf16>
    %14 = vector.shape_cast %11 : vector<32x256xbf16> to vector<1x32x256xbf16>
    tpu.vector_store %arg4[%c0_9, %c0_10, %c0_11], %14 {strides = array<i32>} : memref<1x32x256xbf16, #tpu.memory_space<vmem>>, vector<1x32x256xbf16>,
    %c0_i32 = arith.constant 0 : i32
    %15 = arith.cmpi eq, %arg1, %c0_i32 : i32
    %16 = arith.extui %15 : i1 to i32
    %c0_i32_12 = arith.constant 0 : i32
    %17 = arith.cmpi ne, %16, %c0_i32_12 : i32
    scf.if %17 {
      %cst_27 = arith.constant 0.000000e+00 : f32
      %35 = vector.broadcast %cst_27 : f32 to vector<1x32x1xf32>
      %c0_28 = arith.constant 0 : index
      %c0_29 = arith.constant 0 : index
      %c0_30 = arith.constant 0 : index
      %36 = vector.load %arg5[%c0_28, %c0_29, %c0_30] : memref<1x32x1xf32, #tpu.memory_space<vmem>>, vector<1x32x1xf32>
      tpu.vector_store %arg5[%c0_28, %c0_29, %c0_30], %35 {strides = array<i32>} : memref<1x32x1xf32, #tpu.memory_space<vmem>>, vector<1x32x1xf32>,
      %cst_31 = arith.constant 0.000000e+00 : f32
      %37 = vector.broadcast %cst_31 : f32 to vector<1x32x1xf32>
      %c0_32 = arith.constant 0 : index
      %c0_33 = arith.constant 0 : index
      %c0_34 = arith.constant 0 : index
      %38 = vector.load %arg6[%c0_32, %c0_33, %c0_34] : memref<1x32x1xf32, #tpu.memory_space<vmem>>, vector<1x32x1xf32>
      tpu.vector_store %arg6[%c0_32, %c0_33, %c0_34], %37 {strides = array<i32>} : memref<1x32x1xf32, #tpu.memory_space<vmem>>, vector<1x32x1xf32>,
    } else {
    }
    %c0_13 = arith.constant 0 : index
    %c0_14 = arith.constant 0 : index
    %c0_15 = arith.constant 0 : index
    %18 = vector.load %arg5[%c0_13, %c0_14, %c0_15] : memref<1x32x1xf32, #tpu.memory_space<vmem>>, vector<1x32x1xf32>
    %19 = vector.shape_cast %18 : vector<1x32x1xf32> to vector<32x1xf32>
    %cst_16 = arith.constant dense<0.000000e+00> : vector<32xf32>
    %20 = vector.multi_reduction <add>, %10, %cst_16 [1] : vector<32x256xf32> to vector<32xf32>
    %21 = vector.shape_cast %20 : vector<32xf32> to vector<32x1xf32>
    %22 = arith.addf %19, %21 : vector<32x1xf32>
    %c0_17 = arith.constant 0 : index
    %c0_18 = arith.constant 0 : index
    %c0_19 = arith.constant 0 : index
    %23 = vector.load %arg5[%c0_17, %c0_18, %c0_19] : memref<1x32x1xf32, #tpu.memory_space<vmem>>, vector<1x32x1xf32>
    %24 = vector.shape_cast %23 : vector<1x32x1xf32> to vector<32x1xf32>
    %25 = vector.shape_cast %22 : vector<32x1xf32> to vector<1x32x1xf32>
    tpu.vector_store %arg5[%c0_17, %c0_18, %c0_19], %25 {strides = array<i32>} : memref<1x32x1xf32, #tpu.memory_space<vmem>>, vector<1x32x1xf32>,
    %c0_20 = arith.constant 0 : index
    %c0_21 = arith.constant 0 : index
    %c0_22 = arith.constant 0 : index
    %26 = vector.load %arg6[%c0_20, %c0_21, %c0_22] : memref<1x32x1xf32, #tpu.memory_space<vmem>>, vector<1x32x1xf32>
    %27 = vector.shape_cast %26 : vector<1x32x1xf32> to vector<32x1xf32>
    %28 = arith.mulf %10, %10 : vector<32x256xf32>
    %cst_23 = arith.constant dense<0.000000e+00> : vector<32xf32>
    %29 = vector.multi_reduction <add>, %28, %cst_23 [1] : vector<32x256xf32> to vector<32xf32>
    %30 = vector.shape_cast %29 : vector<32xf32> to vector<32x1xf32>
    %31 = arith.addf %27, %30 : vector<32x1xf32>
    %c0_24 = arith.constant 0 : index
    %c0_25 = arith.constant 0 : index
    %c0_26 = arith.constant 0 : index
    %32 = vector.load %arg6[%c0_24, %c0_25, %c0_26] : memref<1x32x1xf32, #tpu.memory_space<vmem>>, vector<1x32x1xf32>
    %33 = vector.shape_cast %32 : vector<1x32x1xf32> to vector<32x1xf32>
    %34 = vector.shape_cast %31 : vector<32x1xf32> to vector<1x32x1xf32>
    tpu.vector_store %arg6[%c0_24, %c0_25, %c0_26], %34 {strides = array<i32>} : memref<1x32x1xf32, #tpu.memory_space<vmem>>, vector<1x32x1xf32>,
    return
  }
  func.func @transform_0(%arg0: i32, %arg1: i32) -> (i32, i32, i32, i32) {
    %c0_i32 = arith.constant 0 : i32
    %c0_i32_0 = arith.constant 0 : i32
    %c0_i32_1 = arith.constant 0 : i32
    return %arg0, %arg1, %c0_i32, %c0_i32_0 : i32, i32, i32, i32
  }
  func.func @transform_1(%arg0: i32, %arg1: i32) -> (i32, i32, i32) {
    %c0_i32 = arith.constant 0 : i32
    %c0_i32_0 = arith.constant 0 : i32
    %c0_i32_1 = arith.constant 0 : i32
    %c0_i32_2 = arith.constant 0 : i32
    return %c0_i32, %c0_i32_0, %c0_i32_1 : i32, i32, i32
  }
  func.func @transform_2(%arg0: i32, %arg1: i32) -> (i32, i32, i32) {
    %c0_i32 = arith.constant 0 : i32
    %c0_i32_0 = arith.constant 0 : i32
    return %arg0, %c0_i32, %arg1 : i32, i32, i32
  }
  func.func @transform_3(%arg0: i32, %arg1: i32) -> (i32, i32, i32) {
    %c0_i32 = arith.constant 0 : i32
    %c0_i32_0 = arith.constant 0 : i32
    %c0_i32_1 = arith.constant 0 : i32
    return %arg0, %c0_i32, %c0_i32_0 : i32, i32, i32
  }
  func.func @transform_4(%arg0: i32, %arg1: i32) -> (i32, i32, i32) {
    %c0_i32 = arith.constant 0 : i32
    %c0_i32_0 = arith.constant 0 : i32
    %c0_i32_1 = arith.constant 0 : i32
    return %arg0, %c0_i32, %c0_i32_0 : i32, i32, i32
  }
}

module attributes {stable_mosaic.version = 11 : i64} {
  func.func @_conv_stats_kernel(%arg0: i32, %arg1: i32, %arg2: memref<1x1x256x72xbf16, #tpu.memory_space<vmem>>, %arg3: memref<2x32x256xbf16, #tpu.memory_space<vmem>>, %arg4: memref<1x32x64xbf16, #tpu.memory_space<vmem>>, %arg5: memref<1x32x1xf32, #tpu.memory_space<vmem>>, %arg6: memref<1x32x1xf32, #tpu.memory_space<vmem>>) attributes {dimension_semantics = [#tpu.dimension_semantics<parallel>, #tpu.dimension_semantics<arbitrary>], iteration_bounds = array<i64: 2, 1>, scalar_prefetch = 0 : i64, scratch_operands = 0 : i64, tpu.core_type = #tpu.core_type<tc>, window_params = [{transform_indices = @transform_0, window_bounds = array<i64: 1, 1, 256, 72>}, {pipeline_mode = #tpu.pipeline_mode<synchronous>, transform_indices = @transform_1, window_bounds = array<i64: 2, 32, 256>}, {transform_indices = @transform_2, window_bounds = array<i64: 1, 32, 64>}, {transform_indices = @transform_3, window_bounds = array<i64: 1, 32, 1>}, {transform_indices = @transform_4, window_bounds = array<i64: 1, 32, 1>}]} {
    %c0 = arith.constant 0 : index
    %c0_0 = arith.constant 0 : index
    %c0_1 = arith.constant 0 : index
    %c0_2 = arith.constant 0 : index
    %0 = vector.load %arg2[%c0, %c0_0, %c0_1, %c0_2] : memref<1x1x256x72xbf16, #tpu.memory_space<vmem>>, vector<1x1x256x72xbf16>
    %1 = vector.shape_cast %0 : vector<1x1x256x72xbf16> to vector<256x72xbf16>
    %c0_3 = arith.constant 0 : index
    %c0_4 = arith.constant 0 : index
    %c0_5 = arith.constant 0 : index
    %2 = vector.load %arg3[%c0_3, %c0_4, %c0_5] : memref<2x32x256xbf16, #tpu.memory_space<vmem>>, vector<1x32x256xbf16>
    %3 = vector.shape_cast %2 : vector<1x32x256xbf16> to vector<32x256xbf16>
    %cst = arith.constant dense<0.000000e+00> : vector<32x72xf32>
    %4 = tpu.matmul %3, %1, %cst {dimension_numbers = #tpu.dot_dimension_numbers<[1], [0], [0], [1], [0, 0, 1, 1], [], []>} : vector<32x256xbf16>, vector<256x72xbf16>, vector<32x72xf32> -> vector<32x72xf32>
    %c1 = arith.constant 1 : index
    %c0_6 = arith.constant 0 : index
    %c0_7 = arith.constant 0 : index
    %5 = vector.load %arg3[%c1, %c0_6, %c0_7] : memref<2x32x256xbf16, #tpu.memory_space<vmem>>, vector<1x32x256xbf16>
    %6 = vector.shape_cast %5 : vector<1x32x256xbf16> to vector<32x256xbf16>
    %cst_8 = arith.constant dense<0.000000e+00> : vector<32x72xf32>
    %7 = tpu.matmul %6, %1, %cst_8 {dimension_numbers = #tpu.dot_dimension_numbers<[1], [0], [0], [1], [0, 0, 1, 1], [], []>} : vector<32x256xbf16>, vector<256x72xbf16>, vector<32x72xf32> -> vector<32x72xf32>
    %8 = vector.extract_strided_slice %4 {offsets = [0, 0], sizes = [32, 64], strides = [1, 1]} : vector<32x72xf32> to vector<32x64xf32>
    %9 = vector.extract_strided_slice %7 {offsets = [0, 8], sizes = [32, 64], strides = [1, 1]} : vector<32x72xf32> to vector<32x64xf32>
    %10 = arith.addf %8, %9 : vector<32x64xf32>
    %11 = arith.truncf %10 : vector<32x64xf32> to vector<32x64xbf16>
    %c0_9 = arith.constant 0 : index
    %c0_10 = arith.constant 0 : index
    %c0_11 = arith.constant 0 : index
    %12 = vector.load %arg4[%c0_9, %c0_10, %c0_11] : memref<1x32x64xbf16, #tpu.memory_space<vmem>>, vector<1x32x64xbf16>
    %13 = vector.shape_cast %12 : vector<1x32x64xbf16> to vector<32x64xbf16>
    %14 = vector.shape_cast %11 : vector<32x64xbf16> to vector<1x32x64xbf16>
    tpu.vector_store %arg4[%c0_9, %c0_10, %c0_11], %14 {strides = array<i32>} : memref<1x32x64xbf16, #tpu.memory_space<vmem>>, vector<1x32x64xbf16>,
    %c0_i32 = arith.constant 0 : i32
    %15 = arith.cmpi eq, %arg1, %c0_i32 : i32
    %16 = arith.extui %15 : i1 to i32
    %c0_i32_12 = arith.constant 0 : i32
    %17 = arith.cmpi ne, %16, %c0_i32_12 : i32
    scf.if %17 {
      %cst_27 = arith.constant 0.000000e+00 : f32
      %35 = vector.broadcast %cst_27 : f32 to vector<1x32x1xf32>
      %c0_28 = arith.constant 0 : index
      %c0_29 = arith.constant 0 : index
      %c0_30 = arith.constant 0 : index
      %36 = vector.load %arg5[%c0_28, %c0_29, %c0_30] : memref<1x32x1xf32, #tpu.memory_space<vmem>>, vector<1x32x1xf32>
      tpu.vector_store %arg5[%c0_28, %c0_29, %c0_30], %35 {strides = array<i32>} : memref<1x32x1xf32, #tpu.memory_space<vmem>>, vector<1x32x1xf32>,
      %cst_31 = arith.constant 0.000000e+00 : f32
      %37 = vector.broadcast %cst_31 : f32 to vector<1x32x1xf32>
      %c0_32 = arith.constant 0 : index
      %c0_33 = arith.constant 0 : index
      %c0_34 = arith.constant 0 : index
      %38 = vector.load %arg6[%c0_32, %c0_33, %c0_34] : memref<1x32x1xf32, #tpu.memory_space<vmem>>, vector<1x32x1xf32>
      tpu.vector_store %arg6[%c0_32, %c0_33, %c0_34], %37 {strides = array<i32>} : memref<1x32x1xf32, #tpu.memory_space<vmem>>, vector<1x32x1xf32>,
    } else {
    }
    %c0_13 = arith.constant 0 : index
    %c0_14 = arith.constant 0 : index
    %c0_15 = arith.constant 0 : index
    %18 = vector.load %arg5[%c0_13, %c0_14, %c0_15] : memref<1x32x1xf32, #tpu.memory_space<vmem>>, vector<1x32x1xf32>
    %19 = vector.shape_cast %18 : vector<1x32x1xf32> to vector<32x1xf32>
    %cst_16 = arith.constant dense<0.000000e+00> : vector<32xf32>
    %20 = vector.multi_reduction <add>, %10, %cst_16 [1] : vector<32x64xf32> to vector<32xf32>
    %21 = vector.shape_cast %20 : vector<32xf32> to vector<32x1xf32>
    %22 = arith.addf %19, %21 : vector<32x1xf32>
    %c0_17 = arith.constant 0 : index
    %c0_18 = arith.constant 0 : index
    %c0_19 = arith.constant 0 : index
    %23 = vector.load %arg5[%c0_17, %c0_18, %c0_19] : memref<1x32x1xf32, #tpu.memory_space<vmem>>, vector<1x32x1xf32>
    %24 = vector.shape_cast %23 : vector<1x32x1xf32> to vector<32x1xf32>
    %25 = vector.shape_cast %22 : vector<32x1xf32> to vector<1x32x1xf32>
    tpu.vector_store %arg5[%c0_17, %c0_18, %c0_19], %25 {strides = array<i32>} : memref<1x32x1xf32, #tpu.memory_space<vmem>>, vector<1x32x1xf32>,
    %c0_20 = arith.constant 0 : index
    %c0_21 = arith.constant 0 : index
    %c0_22 = arith.constant 0 : index
    %26 = vector.load %arg6[%c0_20, %c0_21, %c0_22] : memref<1x32x1xf32, #tpu.memory_space<vmem>>, vector<1x32x1xf32>
    %27 = vector.shape_cast %26 : vector<1x32x1xf32> to vector<32x1xf32>
    %28 = arith.mulf %10, %10 : vector<32x64xf32>
    %cst_23 = arith.constant dense<0.000000e+00> : vector<32xf32>
    %29 = vector.multi_reduction <add>, %28, %cst_23 [1] : vector<32x64xf32> to vector<32xf32>
    %30 = vector.shape_cast %29 : vector<32xf32> to vector<32x1xf32>
    %31 = arith.addf %27, %30 : vector<32x1xf32>
    %c0_24 = arith.constant 0 : index
    %c0_25 = arith.constant 0 : index
    %c0_26 = arith.constant 0 : index
    %32 = vector.load %arg6[%c0_24, %c0_25, %c0_26] : memref<1x32x1xf32, #tpu.memory_space<vmem>>, vector<1x32x1xf32>
    %33 = vector.shape_cast %32 : vector<1x32x1xf32> to vector<32x1xf32>
    %34 = vector.shape_cast %31 : vector<32x1xf32> to vector<1x32x1xf32>
    tpu.vector_store %arg6[%c0_24, %c0_25, %c0_26], %34 {strides = array<i32>} : memref<1x32x1xf32, #tpu.memory_space<vmem>>, vector<1x32x1xf32>,
    return
  }
  func.func @transform_0(%arg0: i32, %arg1: i32) -> (i32, i32, i32, i32) {
    %c0_i32 = arith.constant 0 : i32
    %c0_i32_0 = arith.constant 0 : i32
    %c0_i32_1 = arith.constant 0 : i32
    return %arg0, %arg1, %c0_i32, %c0_i32_0 : i32, i32, i32, i32
  }
  func.func @transform_1(%arg0: i32, %arg1: i32) -> (i32, i32, i32) {
    %c0_i32 = arith.constant 0 : i32
    %c0_i32_0 = arith.constant 0 : i32
    %c0_i32_1 = arith.constant 0 : i32
    %c0_i32_2 = arith.constant 0 : i32
    return %c0_i32, %c0_i32_0, %c0_i32_1 : i32, i32, i32
  }
  func.func @transform_2(%arg0: i32, %arg1: i32) -> (i32, i32, i32) {
    %c0_i32 = arith.constant 0 : i32
    %c0_i32_0 = arith.constant 0 : i32
    return %arg0, %c0_i32, %arg1 : i32, i32, i32
  }
  func.func @transform_3(%arg0: i32, %arg1: i32) -> (i32, i32, i32) {
    %c0_i32 = arith.constant 0 : i32
    %c0_i32_0 = arith.constant 0 : i32
    %c0_i32_1 = arith.constant 0 : i32
    return %arg0, %c0_i32, %c0_i32_0 : i32, i32, i32
  }
  func.func @transform_4(%arg0: i32, %arg1: i32) -> (i32, i32, i32) {
    %c0_i32 = arith.constant 0 : i32
    %c0_i32_0 = arith.constant 0 : i32
    %c0_i32_1 = arith.constant 0 : i32
    return %arg0, %c0_i32, %c0_i32_0 : i32, i32, i32
  }
}

</mosaic_0001>

<bundles_post_ra>
// kernel: forward.5
= control target key start
LH: loop header
LB: loop body
LE: loop exit
PB: predicated region body
PF: predicated region fallthrough
CT: control target
= control target key end

     0   :  { %s2345_s15 = smov 0   ;;  %s2347_s16 = smov 0   ;;  %s3313_s0 = inlined_call_operand.vmem [shape: bf16[2,4,24,4224], index: 0, kind: input, shape index: {}]   ;;  %s3314_s1 = inlined_call_operand.vmem [shape: bf16[2,4,24], index: 1, kind: input, shape index: {}]   ;;  %s3315_s2 = inlined_call_operand.vmem [shape: bf16[2,4,16384], index: 2, kind: output, shape index: {0}]   ;;  %s3316_s3 = inlined_call_operand.vmem [shape: f32[2,4,1], index: 3, kind: output, shape index: {1}]   ;;  %s3317_s4 = inlined_call_operand.vmem [shape: f32[2,4,1], index: 4, kind: output, shape index: {2}]  }
   0x1   :  { %s2349_s17 = smov 0   ;;  %s2351_s18 = smov 0  }
   0x2   :  { %s2353_s19 = smov 0  }
   0x3 LB: > { %s24_s20 = sadd.s32 1, %s2309_s17  ;;  %s27_s21 = sadd.s32 1, %s2313_s18  ;;  %s2317_s19 = sphi %s2353_s19, %s15_s19   ;;  %s2313_s18 = sphi %s2351_s18, %s3345_s18   ;;  %s2309_s17 = sphi %s2349_s17, %s3344_s17   ;;  %s2305_s16 = sphi %s2347_s16, %s3343_s16   ;;  %s2301_s15 = sphi %s2345_s15, %s3342_s15  }
   0x4   : > { %p25_p0 = scmp.ge.s32.totalorder %s24_s20, 4  ;;  %p1996_p1 = scmp.ge.s32.totalorder %s2317_s19, 1 }
   0x5   : > { %p187_p2 = scmp.lt.s32.totalorder %s2317_s19, 9 }
   0x6   : > { %s3347_s20 = smov (%p25_p0, %s24_s20), 0  ;;  %s3349_s21 = smov (!%p25_p0, %s27_s21), %s2313_s18 }
   0x7   : > { %p188_p3 = pnand %p1996_p1, %p187_p2  ;;  %p29_p4 = scmp.ge.s32.totalorder %s3349_s21, 2 }
   0x9   : > { %s3351_s21 = smov (%p29_p4, %s3349_s21), 0  ;;  %191 = sbr.rel (%p188_p3) target bundleno = 612 (0x264), region = 28 }
   0xe   : > { %p229_p5 = scmp.lt.s32.totalorder %s2305_s16, 1  ;;  %p231_p6 = scmp.lt.s32.totalorder %s2301_s15, 3  ;;  %vm553_vm0 = vcmask 1043456   ;;  %v2445_v47 = vld [vmem:[%s3314_s1] sm:$0x3]  ;;  %vm549_vm1 = vcmask 195584  }
   0xf   : > { %vm1587_vm2 = vcmask 1041408   ;;  %vm1591_vm3 = vcmask 1045508   ;;  %p2200_p8 = scmp.ne.s32.totalorder %s2301_s15, 0 }
  0x10   : > { %s3353_s16 = smov (!%p229_p5, %s2305_s16), 1 }
  0x11   : > { %s232_s22 = scalar_select %p231_p6, %s2301_s15, 3 }
  0x12   : > { %s2237_s23 = smul.u32 396, %s3353_s16  ;;  %s2001_s24 = sshll.u32 %s3353_s16, 2 }
  0x13   : > { %s2236_s25 = smul.u32 99, %s232_s22  ;;  %s2386_s28 = scalar_lea.vmem %s3316_s3, %s2001_s24 }
  0x14   : > { %s2391_s5 = scalar_lea.vmem %s3317_s4, %s2001_s24  ;;  %s1998_s22 = sshll.u32 %s2301_s15, 5 }
  0x15   : > { %s235_s6 = sadd.s32 %s2237_s23, %s2236_s25  ;;  %p241_p7 = scmp.lt.s32.totalorder %s1998_s22, 127 }
  0x16   : > { %s1997_s7 = sshll.u32 %s235_s6, 2  ;;  %s1999_s23 = sshll.u32 %s3353_s16, 7 }
  0x17   : > { %s2396_s10 = scalar_lea.vmem %s3313_s0, %s1997_s7  ;;  %s3355_s22 = smov (!%p241_p7, %s1998_s22), 127 }
  0x18   : > { %v291_v0 = vld [vmem:[%s2396_s10 + $0x108] sm:$0xff]  ;;  %v292_v1 = vld [vmem:[%s2396_s10 + $0x110] sm:$0xff]  ;;  %v2005_v2 = vld [vmem:[%s2396_s10] sm:$0xf]  ;;  %s244_s24 = sadd.s32 %s1999_s23, %s3355_s22 }
  0x19   : > { %v421_v3 = vunpack.c.l.b16 %v291_v0  ;;  %v422_v4 = vunpack.c.h.b16 %v291_v0  ;;  %v423_v5 = vunpack.c.l.b16 %v292_v1  ;;  %v424_v6 = vunpack.c.h.b16 %v292_v1  ;;  %v2219_v7 = vld [vmem:[%s2396_s10 + $0x80] sm:$0xf0]  ;;  %v2007_v9 = vld [vmem:[%s2396_s10 + $0x84] sm:$0xf0]  ;;  %v293_v16 = vld [vmem:[%s2396_s10 + $0x118] sm:$0xff]  ;;  %s2000_s25 = sshll.u32 %s244_s24, 1 }
  0x1a   : > { %v2203_v8 = vld [vmem:[%s2396_s10 + $0x4] sm:$0xf]  ;;  %v2013_v14 = vld [vmem:[%s2396_s10 + $0x8] sm:$0xf]  ;;  %v2006_v17 = vor.u32 %v2219_v7, %v2005_v2  ;;  %v2220_v19 = vld [vmem:[%s2396_s10 + $0x88] sm:$0xf0]  ;;  %v425_v30 = vunpack.c.l.b16 %v293_v16  ;;  %v426_v31 = vunpack.c.h.b16 %v293_v16  ;;  %s2985_s27 = scalar_lea.vmem %s3315_s2, %s2000_s25 }
  0x1b   : > { %v485_v10 = vpack.c.b16 %v421_v3, %v421_v3  ;;  %v486_v11 = vpack.c.b16 %v422_v4, %v422_v4  ;;  %v487_v12 = vpack.c.b16 %v423_v5, %v423_v5  ;;  %v488_v13 = vpack.c.b16 %v424_v6, %v424_v6  ;;  %v294_v15 = vld [vmem:[%s2396_s10 + $0x120] sm:$0xff]  ;;  %v2204_v20 = vld [vmem:[%s2396_s10 + $0xc] sm:$0xf]  ;;  %v2015_v21 = vld [vmem:[%s2396_s10 + $0x8c] sm:$0xf0] }
  0x1c   : > { %v2407_v18 = vor.u32 %v2203_v8, %v2007_v9  ;;  %v427_v22 = vunpack.c.l.b16 %v294_v15  ;;  %v428_v23 = vunpack.c.h.b16 %v294_v15  ;;  %v2425_v32 = vor.u32 %v2220_v19, %v2013_v14  ;;  %v296_v34 = vld [vmem:[%s2396_s10 + $0x130] sm:$0xff]  ;;  %v295_v35 = vld [vmem:[%s2396_s10 + $0x128] sm:$0xff]  ;;  %v2029_v39 = vld [vmem:[%s2396_s10 + $0x18] sm:$0xf] }
  0x1d   : > { %v555_v24 = vsel %vm553_vm0, %v485_v10, 0  ;;  %v2414_v25 = vsel %vm553_vm0, %v486_v11, 0  ;;  %v2417_v26 = vsel %vm553_vm0, %v487_v12, 0  ;;  %v2420_v27 = vsel %vm553_vm0, %v488_v13, 0  ;;  %v2222_v40 = vld [vmem:[%s2396_s10 + $0x98] sm:$0xf0] }
  0x1e   : > { %656 = vmatpush.bf16.msra.mxu0 %v555_v24  ;;  %669 = vmatpush.bf16.msra.mxu1 %v2414_v25  ;;  %v491_v28 = vpack.c.b16 %v427_v22, %v427_v22  ;;  %v492_v29 = vpack.c.b16 %v428_v23, %v428_v23  ;;  %v2427_v33 = vor.u32 %v2204_v20, %v2015_v21  ;;  %v2206_v42 = vld [vmem:[%s2396_s10 + $0x1c] sm:$0xf]  ;;  %v2031_v43 = vld [vmem:[%s2396_s10 + $0x9c] sm:$0xf0]  ;;  %v431_v44 = vunpack.c.l.b16 %v296_v34  ;;  %v2021_v49 = vld [vmem:[%s2396_s10 + $0x10] sm:$0xf] }
  0x1f   : > { %682 = vmatpush.bf16.msra.mxu2 %v2417_v26  ;;  %695 = vmatpush.bf16.msra.mxu3 %v2420_v27  ;;  %v489_v37 = vpack.c.b16 %v425_v30, %v425_v30  ;;  %v490_v38 = vpack.c.b16 %v426_v31, %v426_v31  ;;  %v432_v45 = vunpack.c.h.b16 %v296_v34  ;;  %v429_v46 = vunpack.c.l.b16 %v295_v35  ;;  %v2221_v50 = vld [vmem:[%s2396_s10 + $0x90] sm:$0xf0]  ;;  %v2023_v58 = vld [vmem:[%s2396_s10 + $0x94] sm:$0xf0]  ;;  %v2045_v61 = vld [vmem:[%s2396_s10 + $0x28] sm:$0xf] }
  0x20   : > { %v2432_v36 = vsel %vm553_vm0, %v491_v28, 0  ;;  %v2437_v41 = vsel %vm553_vm0, %v492_v29, 0  ;;  %v430_v48 = vunpack.c.h.b16 %v295_v35  ;;  %v495_v51 = vpack.c.b16 %v431_v44, %v431_v44  ;;  %v2205_v57 = vld [vmem:[%s2396_s10 + $0x14] sm:$0xf]  ;;  %v2224_v62 = vld [vmem:[%s2396_s10 + $0xa8] sm:$0xf0] }
  0x21   : > { %v496_v52 = vpack.c.b16 %v432_v45, %v432_v45  ;;  %v2454_v53 = vsel %vm553_vm0, %v489_v37, 0  ;;  %v2457_v54 = vsel %vm553_vm0, %v490_v38, 0  ;;  %v2459_v55 = vor.u32 %v2222_v40, %v2029_v39  ;;  %v2208_v1 = vld [vmem:[%s2396_s10 + $0x2c] sm:$0xf]  ;;  %v2047_v2 = vld [vmem:[%s2396_s10 + $0xac] sm:$0xf0] }
  0x22   : > { %657 = vmatpush.bf16.msra.mxu0 %v2006_v17  ;;  %670 = vmatpush.bf16.msra.mxu1 %v2407_v18  ;;  %v2461_v56 = vor.u32 %v2206_v42, %v2031_v43  ;;  %v493_v59 = vpack.c.b16 %v429_v46, %v429_v46  ;;  %v494_v60 = vpack.c.b16 %v430_v48, %v430_v48  ;;  %v2476_v63 = vsel %vm553_vm0, %v495_v51, 0  ;;  %v2037_v5 = vld [vmem:[%s2396_s10 + $0x20] sm:$0xf]  ;;  %v2223_v6 = vld [vmem:[%s2396_s10 + $0xa0] sm:$0xf0]  ;;  %v297_v14 = vld [vmem:[%s2396_s10 + $0x138] sm:$0xff] }
  0x23   : > { %683 = vmatpush.bf16.msra.mxu2 %v2425_v32  ;;  %696 = vmatpush.bf16.msra.mxu3 %v2427_v33  ;;  %v2479_v0 = vsel %vm553_vm0, %v496_v52, 0  ;;  %v2485_v3 = vor.u32 %v2221_v50, %v2021_v49  ;;  %v2487_v4 = vor.u32 %v2205_v57, %v2023_v58  ;;  %v2207_v7 = vld [vmem:[%s2396_s10 + $0x24] sm:$0xf]  ;;  %v2502_v10 = vor.u32 %v2224_v62, %v2045_v61  ;;  %v2039_v12 = vld [vmem:[%s2396_s10 + $0xa4] sm:$0xf0]  ;;  %v300_v50 = vld [vmem:[%s2396_s10 + $0x150] sm:$0xff] }
  0x24   : > { %v2497_v8 = vsel %vm553_vm0, %v493_v59, 0  ;;  %v2500_v9 = vsel %vm553_vm0, %v494_v60, 0  ;;  %v2504_v11 = vor.u32 %v2208_v1, %v2047_v2  ;;  %v298_v13 = vld [vmem:[%s2396_s10 + $0x140] sm:$0xff]  ;;  %v2513_v15 = vor.u32 %v2223_v6, %v2037_v5  ;;  %v2061_v29 = vld [vmem:[%s2396_s10 + $0x38] sm:$0xf]  ;;  %v299_v51 = vld [vmem:[%s2396_s10 + $0x148] sm:$0xff] }
  0x25   : > { %2131 = vmatmul.msk.bf16.vlgmr.msra.gmra.mxu0 %vm549_vm1, %v2445_v47  ;;  %2132 = vmatmul.msk.bf16.vlgmr.msra.gmra.mxu1 %vm549_vm1, %v2445_v47  ;;  %v2515_v16 = vor.u32 %v2207_v7, %v2039_v12  ;;  %v435_v17 = vunpack.c.l.b16 %v298_v13  ;;  %v436_v19 = vunpack.c.h.b16 %v298_v13  ;;  %v433_v20 = vunpack.c.l.b16 %v297_v14  ;;  %v2226_v30 = vld [vmem:[%s2396_s10 + $0xb8] sm:$0xf0]  ;;  %v2063_v34 = vld [vmem:[%s2396_s10 + $0xbc] sm:$0xf0]  ;;  %v2053_v38 = vld [vmem:[%s2396_s10 + $0x30] sm:$0xf] }
  0x26   : > { %2133 = vmatmul.msk.bf16.vlgmr.msra.gmra.mxu2 %vm549_vm1, %v2445_v47  ;;  %2134 = vmatmul.msk.bf16.vlgmr.msra.gmra.mxu3 %vm549_vm1, %v2445_v47  ;;  %v434_v21 = vunpack.c.h.b16 %v297_v14  ;;  %v2210_v31 = vld [vmem:[%s2396_s10 + $0x3c] sm:$0xf]  ;;  %v2225_v39 = vld [vmem:[%s2396_s10 + $0xb0] sm:$0xf0]  ;;  %v2055_v44 = vld [vmem:[%s2396_s10 + $0xb4] sm:$0xf0]  ;;  %v2551_v45 = vor.u32 %v2226_v30, %v2061_v29  ;;  %v439_v52 = vunpack.c.l.b16 %v300_v50  ;;  %v440_v57 = vunpack.c.h.b16 %v300_v50 }
  0x27   : > { %734 = vmatpush.bf16.msrb.mxu2 %v2432_v36  ;;  %747 = vmatpush.bf16.msrb.mxu3 %v2437_v41  ;;  %v499_v22 = vpack.c.b16 %v435_v17, %v435_v17  ;;  %v500_v23 = vpack.c.b16 %v436_v19, %v436_v19  ;;  %v497_v24 = vpack.c.b16 %v433_v20, %v433_v20  ;;  %v2209_v43 = vld [vmem:[%s2396_s10 + $0x34] sm:$0xf]  ;;  %v437_v58 = vunpack.c.l.b16 %v299_v51  ;;  %v2077_v2 = vld [vmem:[%s2396_s10 + $0x48] sm:$0xf]  ;;  %v2228_v5 = vld [vmem:[%s2396_s10 + $0xc8] sm:$0xf0] }
  0x28   : > { %708 = vmatpush.bf16.msrb.mxu0 %v2454_v53  ;;  %721 = vmatpush.bf16.msrb.mxu1 %v2457_v54  ;;  %v498_v28 = vpack.c.b16 %v434_v21, %v434_v21  ;;  %v2553_v46 = vor.u32 %v2210_v31, %v2063_v34  ;;  %v2557_v48 = vor.u32 %v2225_v39, %v2053_v38  ;;  %v438_v59 = vunpack.c.h.b16 %v299_v51  ;;  %v2212_v6 = vld [vmem:[%s2396_s10 + $0x4c] sm:$0xf]  ;;  %v2079_v7 = vld [vmem:[%s2396_s10 + $0xcc] sm:$0xf0]  ;;  %v2069_v14 = vld [vmem:[%s2396_s10 + $0x40] sm:$0xf] }
  0x29   : > { %v2526_v35 = vsel %vm553_vm0, %v499_v22, 0  ;;  %v2529_v37 = vsel %vm553_vm0, %v500_v23, 0  ;;  %v2538_v40 = vsel %vm553_vm0, %v497_v24, 0  ;;  %v2559_v49 = vor.u32 %v2209_v43, %v2055_v44  ;;  %v2227_v17 = vld [vmem:[%s2396_s10 + $0xc0] sm:$0xf0]  ;;  %v301_v31 = vld [vmem:[%s2396_s10 + $0x158] sm:$0xff] }
  0x2a   : > { %v2541_v42 = vsel %vm553_vm0, %v498_v28, 0  ;;  %v503_v60 = vpack.c.b16 %v439_v52, %v439_v52  ;;  %v504_v61 = vpack.c.b16 %v440_v57, %v440_v57  ;;  %v501_v62 = vpack.c.b16 %v437_v58, %v437_v58  ;;  %v2211_v21 = vld [vmem:[%s2396_s10 + $0x44] sm:$0xf]  ;;  %v2071_v22 = vld [vmem:[%s2396_s10 + $0xc4] sm:$0xf0] }
  0x2b   : > { %735 = vmatpush.bf16.msrb.mxu2 %v2459_v55  ;;  %748 = vmatpush.bf16.msrb.mxu3 %v2461_v56  ;;  %v502_v1 = vpack.c.b16 %v438_v59, %v438_v59  ;;  %v2597_v23 = vor.u32 %v2228_v5, %v2077_v2  ;;  %v2599_v24 = vor.u32 %v2212_v6, %v2079_v7  ;;  %v302_v30 = vld [vmem:[%s2396_s10 + $0x160] sm:$0xff]  ;;  %v441_v39 = vunpack.c.l.b16 %v301_v31  ;;  %v2093_v57 = vld [vmem:[%s2396_s10 + $0x58] sm:$0xf]  ;;  %v2230_v58 = vld [vmem:[%s2396_s10 + $0xd8] sm:$0xf0] }
  0x2c   : > { %709 = vmatpush.bf16.msrb.mxu0 %v2485_v3  ;;  %722 = vmatpush.bf16.msrb.mxu1 %v2487_v4  ;;  %v2572_v12 = vsel %vm553_vm0, %v503_v60, 0  ;;  %v2575_v13 = vsel %vm553_vm0, %v504_v61, 0  ;;  %v2584_v19 = vsel %vm553_vm0, %v501_v62, 0  ;;  %v2603_v28 = vor.u32 %v2227_v17, %v2069_v14  ;;  %v2214_v59 = vld [vmem:[%s2396_s10 + $0x5c] sm:$0xf] }
  0x2d   : > { %v2587_v20 = vsel %vm553_vm0, %v502_v1, 0  ;;  %v2605_v29 = vor.u32 %v2211_v21, %v2071_v22  ;;  %v443_v34 = vunpack.c.l.b16 %v302_v30  ;;  %v444_v38 = vunpack.c.h.b16 %v302_v30  ;;  %v2095_v60 = vld [vmem:[%s2396_s10 + $0xdc] sm:$0xf0]  ;;  %v2085_v1 = vld [vmem:[%s2396_s10 + $0x50] sm:$0xf] }
  0x2e   : > { %v442_v43 = vunpack.c.h.b16 %v301_v31  ;;  %v505_v51 = vpack.c.b16 %v441_v39, %v441_v39  ;;  %v2229_v2 = vld [vmem:[%s2396_s10 + $0xd0] sm:$0xf0]  ;;  %v2087_v14 = vld [vmem:[%s2396_s10 + $0xd4] sm:$0xf0]  ;;  %v2643_v17 = vor.u32 %v2230_v58, %v2093_v57  ;;  %v2645_v21 = vor.u32 %v2214_v59, %v2095_v60  ;;  %v2109_v58 = vld [vmem:[%s2396_s10 + $0x68] sm:$0xf] }
  0x2f   : > { %786 = vmatpush.bf16.msra.mxu2 %v2476_v63  ;;  %799 = vmatpush.bf16.msra.mxu3 %v2479_v0  ;;  %v507_v44 = vpack.c.b16 %v443_v34, %v443_v34  ;;  %v508_v50 = vpack.c.b16 %v444_v38, %v444_v38  ;;  %v2213_v7 = vld [vmem:[%s2396_s10 + $0x54] sm:$0xf]  ;;  %v2649_v22 = vor.u32 %v2229_v2, %v2085_v1  ;;  %v303_v34 = vld [vmem:[%s2396_s10 + $0x168] sm:$0xff]  ;;  %v2111_v1 = vld [vmem:[%s2396_s10 + $0xec] sm:$0xf0] }
  0x30   : > { %760 = vmatpush.bf16.msra.mxu0 %v2497_v8  ;;  %773 = vmatpush.bf16.msra.mxu1 %v2500_v9  ;;  %v506_v52 = vpack.c.b16 %v442_v43, %v442_v43  ;;  %v2630_v5 = vsel %vm553_vm0, %v505_v51, 0  ;;  %3326 = vst [vmem:[#allocation2_spill] sm:$0xff] %v2643_v17  ;;  %v2651_v30 = vor.u32 %v2213_v7, %v2087_v14  ;;  %v304_v31 = vld [vmem:[%s2396_s10 + $0x170] sm:$0xff]  ;;  %v445_v43 = vunpack.c.l.b16 %v303_v34  ;;  %v2232_v59 = vld [vmem:[%s2396_s10 + $0xe8] sm:$0xf0] }
  0x31   : > { %v2618_v61 = vsel %vm553_vm0, %v507_v44, 0  ;;  %v2621_v62 = vsel %vm553_vm0, %v508_v50, 0  ;;  %v447_v38 = vunpack.c.l.b16 %v304_v31  ;;  %v448_v39 = vunpack.c.h.b16 %v304_v31  ;;  %v2216_v60 = vld [vmem:[%s2396_s10 + $0x6c] sm:$0xf]  ;;  %v2101_v14 = vld [vmem:[%s2396_s10 + $0x60] sm:$0xf] }
  0x32   : > { %v2633_v6 = vsel %vm553_vm0, %v506_v52, 0  ;;  %3327 = vst [vmem:[#allocation3_spill] sm:$0xff] %v2651_v30  ;;  %v446_v44 = vunpack.c.h.b16 %v303_v34  ;;  %v509_v52 = vpack.c.b16 %v445_v43, %v445_v43  ;;  %v2231_v31 = vld [vmem:[%s2396_s10 + $0xe0] sm:$0xf0]  ;;  %v2103_v43 = vld [vmem:[%s2396_s10 + $0xe4] sm:$0xf0] }
  0x33   : > { %787 = vmatpush.bf16.msra.mxu2 %v2502_v10  ;;  %800 = vmatpush.bf16.msra.mxu3 %v2504_v11  ;;  %v511_v50 = vpack.c.b16 %v447_v38, %v447_v38  ;;  %v512_v51 = vpack.c.b16 %v448_v39, %v448_v39  ;;  %v2215_v39 = vld [vmem:[%s2396_s10 + $0x64] sm:$0xf] }
  0x34   : > { %761 = vmatpush.bf16.msra.mxu0 %v2513_v15  ;;  %774 = vmatpush.bf16.msra.mxu1 %v2515_v16  ;;  %v510_v57 = vpack.c.b16 %v446_v44, %v446_v44  ;;  %v2676_v34 = vsel %vm553_vm0, %v509_v52, 0  ;;  %v2689_v44 = vor.u32 %v2232_v59, %v2109_v58  ;;  %v2697_v52 = vor.u32 %v2215_v39, %v2103_v43 }
  0x35   : > { %2135 = vmatmul.msk.bf16.vlgmr.msrb.gmra.mxu0 %vm549_vm1, %v2445_v47  ;;  %2136 = vmatmul.msk.bf16.vlgmr.msrb.gmra.mxu1 %vm549_vm1, %v2445_v47  ;;  %v2664_v2 = vsel %vm553_vm0, %v511_v50, 0  ;;  %v2667_v7 = vsel %vm553_vm0, %v512_v51, 0  ;;  %v2691_v50 = vor.u32 %v2216_v60, %v2111_v1  ;;  %v2695_v51 = vor.u32 %v2231_v31, %v2101_v14 }
  0x36   : > { %2137 = vmatmul.msk.bf16.vlgmr.msrb.gmra.mxu2 %vm549_vm1, %v2445_v47  ;;  %2138 = vmatmul.msk.bf16.vlgmr.msrb.gmra.mxu3 %vm549_vm1, %v2445_v47  ;;  %3328 = vst [vmem:[#allocation4_spill] sm:$0xff] %v2664_v2  ;;  %v2679_v38 = vsel %vm553_vm0, %v510_v57, 0  ;;  %v306_v57 = vld [vmem:[%s2396_s10 + $0x180] sm:$0xff] }
  0x37   : > { %838 = vmatpush.bf16.msrb.mxu2 %v2526_v35  ;;  %851 = vmatpush.bf16.msrb.mxu3 %v2529_v37  ;;  %3329 = vst [vmem:[#allocation5_spill] sm:$0xff] %v2667_v7  ;;  %v451_v58 = vunpack.c.l.b16 %v306_v57  ;;  %v452_v59 = vunpack.c.h.b16 %v306_v57  ;;  %v2233_v57 = vld [vmem:[%s2396_s10 + $0xf0] sm:$0xf0] }
  0x38   : > { %812 = vmatpush.bf16.msrb.mxu0 %v2538_v40  ;;  %825 = vmatpush.bf16.msrb.mxu1 %v2541_v42  ;;  %3330 = vst [vmem:[#allocation6_spill] sm:$0xff] %v2679_v38 }
  0x39   : > { %3331 = vst [vmem:[#allocation7_spill] sm:$0xff] %v2689_v44  ;;  %v515_v14 = vpack.c.b16 %v451_v58, %v451_v58  ;;  %v516_v31 = vpack.c.b16 %v452_v59, %v452_v59  ;;  %v2217_v59 = vld [vmem:[%s2396_s10 + $0x74] sm:$0xf] }
  0x3a   : > { %3332 = vst [vmem:[#allocation8_spill] sm:$0xff] %v2691_v50 }
  0x3b   : > { %839 = vmatpush.bf16.msrb.mxu2 %v2551_v45  ;;  %852 = vmatpush.bf16.msrb.mxu3 %v2553_v46  ;;  %3333 = vst [vmem:[#allocation9_spill] sm:$0xff] %v2697_v52 }
  0x3c   : > { %813 = vmatpush.bf16.msrb.mxu0 %v2557_v48  ;;  %826 = vmatpush.bf16.msrb.mxu1 %v2559_v49 }
  0x45   : > { %2139 = vmatmul.msk.bf16.vlgmr.msra.gmra.mxu0 %vm549_vm1, %v2445_v47  ;;  %2140 = vmatmul.msk.bf16.vlgmr.msra.gmra.mxu1 %vm549_vm1, %v2445_v47 }
  0x46   : > { %2141 = vmatmul.msk.bf16.vlgmr.msra.gmra.mxu2 %vm549_vm1, %v2445_v47  ;;  %2142 = vmatmul.msk.bf16.vlgmr.msra.gmra.mxu3 %vm549_vm1, %v2445_v47 }
  0x47   : > { %890 = vmatpush.bf16.msra.mxu2 %v2572_v12  ;;  %903 = vmatpush.bf16.msra.mxu3 %v2575_v13 }
  0x48   : > { %864 = vmatpush.bf16.msra.mxu0 %v2584_v19  ;;  %877 = vmatpush.bf16.msra.mxu1 %v2587_v20 }
  0x4b   : > { %891 = vmatpush.bf16.msra.mxu2 %v2597_v23  ;;  %904 = vmatpush.bf16.msra.mxu3 %v2599_v24 }
  0x4c   : > { %865 = vmatpush.bf16.msra.mxu0 %v2603_v28  ;;  %878 = vmatpush.bf16.msra.mxu1 %v2605_v29 }
  0x55   : > { %2143 = vmatmul.msk.bf16.vlgmr.msrb.gmra.mxu0 %vm549_vm1, %v2445_v47  ;;  %2144 = vmatmul.msk.bf16.vlgmr.msrb.gmra.mxu1 %vm549_vm1, %v2445_v47 }
  0x56   : > { %2145 = vmatmul.msk.bf16.vlgmr.msrb.gmra.mxu2 %vm549_vm1, %v2445_v47  ;;  %2146 = vmatmul.msk.bf16.vlgmr.msrb.gmra.mxu3 %vm549_vm1, %v2445_v47 }
  0x57   : > { %942 = vmatpush.bf16.msrb.mxu2 %v2618_v61  ;;  %955 = vmatpush.bf16.msrb.mxu3 %v2621_v62 }
  0x58   : > { %916 = vmatpush.bf16.msrb.mxu0 %v2630_v5  ;;  %929 = vmatpush.bf16.msrb.mxu1 %v2633_v6 }
  0x5b   : > { %943 = vmatpush.bf16.msrb.mxu2 %v2643_v17  ;;  %956 = vmatpush.bf16.msrb.mxu3 %v2645_v21  ;;  %v305_v17 = vld [vmem:[%s2396_s10 + $0x178] sm:$0xff] }
  0x5c   : > { %917 = vmatpush.bf16.msrb.mxu0 %v2649_v22  ;;  %930 = vmatpush.bf16.msrb.mxu1 %v2651_v30  ;;  %v449_v60 = vunpack.c.l.b16 %v305_v17  ;;  %v450_v1 = vunpack.c.h.b16 %v305_v17  ;;  %v2117_v30 = vld [vmem:[%s2396_s10 + $0x70] sm:$0xf] }
  0x5e   : > { %v513_v39 = vpack.c.b16 %v449_v60, %v449_v60  ;;  %v514_v43 = vpack.c.b16 %v450_v1, %v450_v1  ;;  %v2119_v60 = vld [vmem:[%s2396_s10 + $0xf4] sm:$0xf0] }
  0x60   : > { %v2722_v17 = vsel %vm553_vm0, %v513_v39, 0  ;;  %v2725_v58 = vsel %vm553_vm0, %v514_v43, 0  ;;  %v2743_v39 = vor.u32 %v2217_v59, %v2119_v60  ;;  %v2166_v59 = vld [vmem:[%s2396_s10 + $0x80] sm:$0xf]  ;;  %v2235_v60 = vld [vmem:[%s2396_s10 + $0x100] sm:$0xf0] }
  0x65   : > { %2147 = vmatmul.msk.bf16.vlgmr.msra.gmra.mxu0 %vm549_vm1, %v2445_v47  ;;  %2148 = vmatmul.msk.bf16.vlgmr.msra.gmra.mxu1 %vm549_vm1, %v2445_v47 }
  0x66   : > { %2149 = vmatmul.msk.bf16.vlgmr.msra.gmra.mxu2 %vm549_vm1, %v2445_v47  ;;  %2150 = vmatmul.msk.bf16.vlgmr.msra.gmra.mxu3 %vm549_vm1, %v2445_v47 }
  0x67   : > { %994 = vmatpush.bf16.msra.mxu2 %v2664_v2  ;;  %1007 = vmatpush.bf16.msra.mxu3 %v2667_v7  ;;  %v2125_v2 = vld [vmem:[%s2396_s10 + $0x78] sm:$0xf]  ;;  %v2710_v7 = vsel %vm553_vm0, %v515_v14, 0 }
  0x68   : > { %968 = vmatpush.bf16.msra.mxu0 %v2676_v34  ;;  %981 = vmatpush.bf16.msra.mxu1 %v2679_v38  ;;  %v2218_v38 = vld [vmem:[%s2396_s10 + $0x7c] sm:$0xf] }
  0x6b   : > { %995 = vmatpush.bf16.msra.mxu2 %v2689_v44  ;;  %1008 = vmatpush.bf16.msra.mxu3 %v2691_v50  ;;  %v2234_v44 = vld [vmem:[%s2396_s10 + $0xf8] sm:$0xf0]  ;;  %v2127_v50 = vld [vmem:[%s2396_s10 + $0xfc] sm:$0xf0] }
  0x6c   : > { %969 = vmatpush.bf16.msra.mxu0 %v2695_v51  ;;  %982 = vmatpush.bf16.msra.mxu1 %v2697_v52  ;;  %v2713_v52 = vsel %vm553_vm0, %v516_v31, 0  ;;  %v2735_v1 = vor.u32 %v2234_v44, %v2125_v2  ;;  %v2737_v14 = vor.u32 %v2218_v38, %v2127_v50  ;;  %v2741_v31 = vor.u32 %v2233_v57, %v2117_v30  ;;  %v3339_v30 = vld [vmem:[#allocation8_spill] sm:$0xff]  ;;  %v3340_v2 = vld [vmem:[#allocation9_spill] sm:$0xff] }
  0x75   : > { %2151 = vmatmul.msk.bf16.vlgmr.msrb.gmra.mxu0 %vm549_vm1, %v2445_v47  ;;  %2152 = vmatmul.msk.bf16.vlgmr.msrb.gmra.mxu1 %vm549_vm1, %v2445_v47 }
  0x76   : > { %2153 = vmatmul.msk.bf16.vlgmr.msrb.gmra.mxu2 %vm549_vm1, %v2445_v47  ;;  %2154 = vmatmul.msk.bf16.vlgmr.msrb.gmra.mxu3 %vm549_vm1, %v2445_v47 }
  0x77   : > { %1046 = vmatpush.bf16.msrb.mxu2 %v2710_v7  ;;  %1059 = vmatpush.bf16.msrb.mxu3 %v2713_v52 }
  0x78   : > { %1020 = vmatpush.bf16.msrb.mxu0 %v2722_v17  ;;  %1033 = vmatpush.bf16.msrb.mxu1 %v2725_v58 }
  0x7b   : > { %1047 = vmatpush.bf16.msrb.mxu2 %v2735_v1  ;;  %1060 = vmatpush.bf16.msrb.mxu3 %v2737_v14 }
  0x7c   : > { %1021 = vmatpush.bf16.msrb.mxu0 %v2741_v31  ;;  %1034 = vmatpush.bf16.msrb.mxu1 %v2743_v39 }
  0x85   : > { %2155 = vmatmul.msk.bf16.vlgmr.msra.gmra.mxu0 %vm549_vm1, %v2445_v47  ;;  %2156 = vmatmul.msk.bf16.vlgmr.msra.gmra.mxu1 %vm549_vm1, %v2445_v47 }
  0x86   : > { %2157 = vmatmul.msk.bf16.vlgmr.msra.gmra.mxu2 %vm549_vm1, %v2445_v47  ;;  %2158 = vmatmul.msk.bf16.vlgmr.msra.gmra.mxu3 %vm549_vm1, %v2445_v47 }
  0x87   : > { %1115 = vmatpush.bf16.msra.mxu2 %v2420_v27  ;;  %1128 = vmatpush.bf16.msra.mxu3 %v2454_v53 }
  0x88   : > { %1089 = vmatpush.bf16.msra.mxu0 %v2414_v25  ;;  %1102 = vmatpush.bf16.msra.mxu1 %v2417_v26  ;;  %v2788_v26 = vld [vmem:[%s3314_s1 + $0x2] sm:$0x3] }
  0x8b   : > { %1116 = vmatpush.bf16.msra.mxu2 %v2427_v33  ;;  %1129 = vmatpush.bf16.msra.mxu3 %v2485_v3 }
  0x8c   : > { %1090 = vmatpush.bf16.msra.mxu0 %v2407_v18  ;;  %1103 = vmatpush.bf16.msra.mxu1 %v2425_v32 }
  0x95   : > { %2159 = vmatmul.msk.bf16.vlgmr.msrb.gmra.mxu0 %vm549_vm1, %v2445_v47  ;;  %2160 = vmatmul.msk.bf16.vlgmr.msrb.gmra.mxu1 %vm549_vm1, %v2445_v47 }
  0x96   : > { %2161 = vmatmul.msk.bf16.vlgmr.msrb.gmra.mxu2 %vm549_vm1, %v2445_v47  ;;  %2162 = vmatmul.msk.bf16.vlgmr.msrb.gmra.mxu3 %vm549_vm1, %v2445_v47 }
  0x97   : > { %1167 = vmatpush.bf16.msrb.mxu2 %v2437_v41  ;;  %1180 = vmatpush.bf16.msrb.mxu3 %v2497_v8 }
  0x98   : > { %1141 = vmatpush.bf16.msrb.mxu0 %v2457_v54  ;;  %1154 = vmatpush.bf16.msrb.mxu1 %v2432_v36 }
  0x9b   : > { %1168 = vmatpush.bf16.msrb.mxu2 %v2461_v56  ;;  %1181 = vmatpush.bf16.msrb.mxu3 %v2513_v15 }
  0x9c   : > { %1142 = vmatpush.bf16.msrb.mxu0 %v2487_v4  ;;  %1155 = vmatpush.bf16.msrb.mxu1 %v2459_v55 }
  0xa2   : > { %v2781_v18 = vpop.f32.mrf.mxu0  ;;  %v2783_v25 = vpop.f32.mrf.mxu1 }
  0xa5   : > { %2168 = vmatmul.msk.bf16.vlgmr.msra.gmra.mxu0 %vm549_vm1, %v2788_v26  ;;  %2169 = vmatmul.msk.bf16.vlgmr.msra.gmra.mxu1 %vm549_vm1, %v2788_v26 }
  0xa6   : > { %2170 = vmatmul.msk.bf16.vlgmr.msra.gmra.mxu2 %vm549_vm1, %v2788_v26  ;;  %2171 = vmatmul.msk.bf16.vlgmr.msra.gmra.mxu3 %vm549_vm1, %v2788_v26 }
  0xa7   : > { %1219 = vmatpush.bf16.msra.mxu2 %v2479_v0  ;;  %1232 = vmatpush.bf16.msra.mxu3 %v2538_v40 }
  0xa8   : > { %1193 = vmatpush.bf16.msra.mxu0 %v2500_v9  ;;  %1206 = vmatpush.bf16.msra.mxu1 %v2476_v63 }
  0xa9   : > { %v2802_v27 = vpop.f32.mrf.mxu2  ;;  %v2804_v32 = vpop.f32.mrf.mxu3 }
  0xaa   : > { %v661_v33 = vpop.f32.mrf.mxu0  ;;  %v674_v36 = vpop.f32.mrf.mxu1 }
  0xab   : > { %1220 = vmatpush.bf16.msra.mxu2 %v2504_v11  ;;  %1233 = vmatpush.bf16.msra.mxu3 %v2557_v48 }
  0xac   : > { %1194 = vmatpush.bf16.msra.mxu0 %v2515_v16  ;;  %1207 = vmatpush.bf16.msra.mxu1 %v2502_v10 }
  0xb1   : > { %v687_v41 = vpop.f32.mrf.mxu2  ;;  %v700_v47 = vpop.f32.mrf.mxu3 }
  0xb2   : > { %v2810_v53 = vpop.f32.mrf.mxu0  ;;  %v2812_v54 = vpop.f32.mrf.mxu1 }
  0xb5   : > { %2172 = vmatmul.msk.bf16.vlgmr.msrb.gmra.mxu0 %vm549_vm1, %v2788_v26  ;;  %2173 = vmatmul.msk.bf16.vlgmr.msrb.gmra.mxu1 %vm549_vm1, %v2788_v26 }
  0xb6   : > { %2174 = vmatmul.msk.bf16.vlgmr.msrb.gmra.mxu2 %vm549_vm1, %v2788_v26  ;;  %2175 = vmatmul.msk.bf16.vlgmr.msrb.gmra.mxu3 %vm549_vm1, %v2788_v26 }
  0xb7   : > { %1271 = vmatpush.bf16.msrb.mxu2 %v2529_v37  ;;  %1284 = vmatpush.bf16.msrb.mxu3 %v2584_v19 }
  0xb8   : > { %1245 = vmatpush.bf16.msrb.mxu0 %v2541_v42  ;;  %1258 = vmatpush.bf16.msrb.mxu1 %v2526_v35 }
  0xb9   : > { %v2826_v55 = vpop.f32.mrf.mxu2  ;;  %v2828_v56 = vpop.f32.mrf.mxu3 }
  0xba   : > { %v713_v63 = vpop.f32.mrf.mxu0  ;;  %v726_v0 = vpop.f32.mrf.mxu1 }
  0xbb   : > { %1272 = vmatpush.bf16.msrb.mxu2 %v2553_v46  ;;  %1285 = vmatpush.bf16.msrb.mxu3 %v2603_v28  ;;  %v3336_v28 = vld [vmem:[#allocation5_spill] sm:$0xff] }
  0xbc   : > { %1246 = vmatpush.bf16.msrb.mxu0 %v2559_v49  ;;  %1259 = vmatpush.bf16.msrb.mxu1 %v2551_v45 }
  0xc1   : > { %v739_v3 = vpop.f32.mrf.mxu2  ;;  %v752_v4 = vpop.f32.mrf.mxu3 }
  0xc2   : > { %v2834_v8 = vpop.f32.mrf.mxu0  ;;  %v2836_v9 = vpop.f32.mrf.mxu1 }
  0xc5   : > { %2176 = vmatmul.msk.bf16.vlgmr.msra.gmra.mxu0 %vm549_vm1, %v2788_v26  ;;  %2177 = vmatmul.msk.bf16.vlgmr.msra.gmra.mxu1 %vm549_vm1, %v2788_v26 }
  0xc6   : > { %2178 = vmatmul.msk.bf16.vlgmr.msra.gmra.mxu2 %vm549_vm1, %v2788_v26  ;;  %2179 = vmatmul.msk.bf16.vlgmr.msra.gmra.mxu3 %vm549_vm1, %v2788_v26 }
  0xc7   : > { %1323 = vmatpush.bf16.msra.mxu2 %v2575_v13  ;;  %1336 = vmatpush.bf16.msra.mxu3 %v2630_v5  ;;  %v3335_v13 = vld [vmem:[#allocation2_spill] sm:$0xff] }
  0xc8   : > { %1297 = vmatpush.bf16.msra.mxu0 %v2587_v20  ;;  %1310 = vmatpush.bf16.msra.mxu1 %v2572_v12  ;;  %v3334_v12 = vld [vmem:[#allocation3_spill] sm:$0xff] }
  0xc9   : > { %v2850_v10 = vpop.f32.mrf.mxu2  ;;  %v2852_v11 = vpop.f32.mrf.mxu3 }
  0xca   : > { %v765_v15 = vpop.f32.mrf.mxu0  ;;  %v778_v16 = vpop.f32.mrf.mxu1 }
  0xcb   : > { %1324 = vmatpush.bf16.msra.mxu2 %v2599_v24  ;;  %1337 = vmatpush.bf16.msra.mxu3 %v2649_v22 }
  0xcc   : > { %1298 = vmatpush.bf16.msra.mxu0 %v2605_v29  ;;  %1311 = vmatpush.bf16.msra.mxu1 %v2597_v23  ;;  %v3337_v29 = vld [vmem:[#allocation6_spill] sm:$0xff] }
  0xd1   : > { %v791_v35 = vpop.f32.mrf.mxu2  ;;  %v804_v37 = vpop.f32.mrf.mxu3 }
  0xd2   : > { %v2858_v40 = vpop.f32.mrf.mxu0  ;;  %v2860_v42 = vpop.f32.mrf.mxu1 }
  0xd5   : > { %2180 = vmatmul.msk.bf16.vlgmr.msrb.gmra.mxu0 %vm549_vm1, %v2788_v26  ;;  %2181 = vmatmul.msk.bf16.vlgmr.msrb.gmra.mxu1 %vm549_vm1, %v2788_v26 }
  0xd6   : > { %2182 = vmatmul.msk.bf16.vlgmr.msrb.gmra.mxu2 %vm549_vm1, %v2788_v26  ;;  %2183 = vmatmul.msk.bf16.vlgmr.msrb.gmra.mxu3 %vm549_vm1, %v2788_v26 }
  0xd7   : > { %1375 = vmatpush.bf16.msrb.mxu2 %v2621_v62  ;;  %1388 = vmatpush.bf16.msrb.mxu3 %v2676_v34  ;;  %v3341_v34 = vld [vmem:[#allocation7_spill] sm:$0xff] }
  0xd8   : > { %1349 = vmatpush.bf16.msrb.mxu0 %v2633_v6  ;;  %1362 = vmatpush.bf16.msrb.mxu1 %v2618_v61  ;;  %v3338_v61 = vld [vmem:[#allocation4_spill] sm:$0xff]  ;;  %v307_v6 = vld [vmem:[%s2396_s10 + $0x188] sm:$0xf] }
  0xd9   : > { %v2874_v45 = vpop.f32.mrf.mxu2  ;;  %v2876_v46 = vpop.f32.mrf.mxu3  ;;  %v1073_v38 = vunpack.c.l.b16 %v307_v6 }
  0xda   : > { %v817_v48 = vpop.f32.mrf.mxu0  ;;  %v830_v49 = vpop.f32.mrf.mxu1 }
  0xdb   : > { %1376 = vmatpush.bf16.msrb.mxu2 %v2645_v21  ;;  %1389 = vmatpush.bf16.msrb.mxu3 %v2695_v51  ;;  %v1075_v44 = vpack.c.b16 %v1073_v38, %v1073_v38 }
  0xdc   : > { %1350 = vmatpush.bf16.msrb.mxu0 %v3334_v12  ;;  %1363 = vmatpush.bf16.msrb.mxu1 %v3335_v13 }
  0xe1   : > { %v843_v19 = vpop.f32.mrf.mxu2  ;;  %v856_v20 = vpop.f32.mrf.mxu3 }
  0xe2   : > { %v2882_v23 = vpop.f32.mrf.mxu0  ;;  %v2884_v24 = vpop.f32.mrf.mxu1 }
  0xe5   : > { %2184 = vmatmul.msk.bf16.vlgmr.msra.gmra.mxu0 %vm549_vm1, %v2788_v26  ;;  %2185 = vmatmul.msk.bf16.vlgmr.msra.gmra.mxu1 %vm549_vm1, %v2788_v26 }
  0xe6   : > { %2186 = vmatmul.msk.bf16.vlgmr.msra.gmra.mxu2 %vm549_vm1, %v2788_v26  ;;  %2187 = vmatmul.msk.bf16.vlgmr.msra.gmra.mxu3 %vm549_vm1, %v2788_v26 }
  0xe7   : > { %1427 = vmatpush.bf16.msra.mxu2 %v3336_v28  ;;  %1440 = vmatpush.bf16.msra.mxu3 %v2722_v17  ;;  %v1081_v17 = vsel %vm553_vm0, %v1075_v44, 0 }
  0xe8   : > { %1401 = vmatpush.bf16.msra.mxu0 %v3337_v29  ;;  %1414 = vmatpush.bf16.msra.mxu1 %v3338_v61 }
  0xe9   : > { %v2898_v62 = vpop.f32.mrf.mxu2  ;;  %v2900_v5 = vpop.f32.mrf.mxu3 }
  0xea   : > { %v869_v21 = vpop.f32.mrf.mxu0  ;;  %v882_v22 = vpop.f32.mrf.mxu1 }
  0xeb   : > { %1428 = vmatpush.bf16.msra.mxu2 %v3339_v30  ;;  %1441 = vmatpush.bf16.msra.mxu3 %v2741_v31  ;;  %v2167_v31 = vor.u32 %v2235_v60, %v2166_v59 }
  0xec   : > { %1402 = vmatpush.bf16.msra.mxu0 %v3340_v2  ;;  %1415 = vmatpush.bf16.msra.mxu1 %v3341_v34 }
  0xf1   : > { %v895_v50 = vpop.f32.mrf.mxu2  ;;  %v908_v51 = vpop.f32.mrf.mxu3 }
  0xf2   : > { %v2907_v43 = vpop.f32.mrf.mxu0  ;;  %v2909_v57 = vpop.f32.mrf.mxu1 }
  0xf5   : > { %2188 = vmatmul.msk.bf16.vlgmr.msrb.gmra.mxu0 %vm549_vm1, %v2788_v26  ;;  %2189 = vmatmul.msk.bf16.vlgmr.msrb.gmra.mxu1 %vm549_vm1, %v2788_v26 }
  0xf6   : > { %2190 = vmatmul.msk.bf16.vlgmr.msrb.gmra.mxu2 %vm549_vm1, %v2788_v26  ;;  %2191 = vmatmul.msk.bf16.vlgmr.msrb.gmra.mxu3 %vm549_vm1, %v2788_v26 }
  0xf7   : > { %1479 = vmatpush.bf16.msrb.mxu2 %v2713_v52  ;;  %1492 = vmatpush.bf16.msrb.mxu3 %v1081_v17 }
  0xf8   : > { %1453 = vmatpush.bf16.msrb.mxu0 %v2725_v58  ;;  %1466 = vmatpush.bf16.msrb.mxu1 %v2710_v7 }
  0xf9   : > { %v2925_v33 = vpop.f32.mrf.mxu2  ;;  %v2927_v36 = vpop.f32.mrf.mxu3 }
  0xfa   : > { %v921_v41 = vpop.f32.mrf.mxu0  ;;  %v934_v47 = vpop.f32.mrf.mxu1 }
  0xfb   : > { %1480 = vmatpush.bf16.msrb.mxu2 %v2737_v14  ;;  %1493 = vmatpush.bf16.msrb.mxu3 %v2167_v31 }
  0xfc   : > { %1454 = vmatpush.bf16.msrb.mxu0 %v2743_v39  ;;  %1467 = vmatpush.bf16.msrb.mxu1 %v2735_v1 }
 0x101   : > { %v947_v52 = vpop.f32.mrf.mxu2  ;;  %v960_v63 = vpop.f32.mrf.mxu3 }
 0x102   : > { %v2932_v0 = vpop.f32.mrf.mxu0  ;;  %v2934_v58 = vpop.f32.mrf.mxu1 }
 0x105   : > { %2192 = vmatmul.msk.bf16.vlgmr.msra.gmra.mxu0 %vm549_vm1, %v2788_v26  ;;  %2193 = vmatmul.msk.bf16.vlgmr.msra.gmra.mxu1 %vm549_vm1, %v2788_v26 }
 0x106   : > { %2194 = vmatmul.msk.bf16.vlgmr.msra.gmra.mxu2 %vm549_vm1, %v2788_v26  ;;  %2195 = vmatmul.msk.bf16.vlgmr.msra.gmra.mxu3 %vm549_vm1, %v2788_v26 }
 0x109   : > { %v2944_v7 = vpop.f32.mrf.mxu2  ;;  %v2946_v1 = vpop.f32.mrf.mxu3 }
 0x10a   : > { %v973_v14 = vpop.f32.mrf.mxu0  ;;  %v986_v39 = vpop.f32.mrf.mxu1 }
 0x111   : > { %v999_v3 = vpop.f32.mrf.mxu2  ;;  %v1012_v4 = vpop.f32.mrf.mxu3 }
 0x112   : > { %v2948_v15 = vpop.f32.mrf.mxu0  ;;  %v2950_v16 = vpop.f32.mrf.mxu1 }
 0x115   : > { %2196 = vmatmul.msk.bf16.vlgmr.msrb.gmra.mxu0 %vm549_vm1, %v2788_v26  ;;  %2197 = vmatmul.msk.bf16.vlgmr.msrb.gmra.mxu1 %vm549_vm1, %v2788_v26 }
 0x116   : > { %2198 = vmatmul.msk.bf16.vlgmr.msrb.gmra.mxu2 %vm549_vm1, %v2788_v26  ;;  %2199 = vmatmul.msk.bf16.vlgmr.msrb.gmra.mxu3 %vm549_vm1, %v2788_v26 }
 0x119   : > { %v2960_v35 = vpop.f32.mrf.mxu2  ;;  %v2962_v37 = vpop.f32.mrf.mxu3 }
 0x11a   : > { %v1025_v48 = vpop.f32.mrf.mxu0  ;;  %v1038_v49 = vpop.f32.mrf.mxu1 }
 0x121   : > { %v1051_v12 = vpop.f32.mrf.mxu2  ;;  %v1064_v13 = vpop.f32.mrf.mxu3 }
 0x122   : > { %v1092_v19 = vpop.f32.mrf.mxu0  ;;  %v1105_v20 = vpop.f32.mrf.mxu1 }
 0x123   : > { %v2966_v28 = vadd.f32 %v1092_v19, %v2781_v18  ;;  %v2969_v29 = vadd.f32 %v1105_v20, %v2783_v25 }
 0x125   : > { %v1531_v26 = vpack.c.bf16 %v2969_v29, %v2966_v28 }
 0x127   : > { %v1563_v2 = vrot.slane %v1531_v26, 2 }
 0x129   : > { %v1118_v61 = vpop.f32.mrf.mxu2  ;;  %v1131_v6 = vpop.f32.mrf.mxu3 }
 0x12a   : > { %v2975_v21 = vadd.f32 %v1118_v61, %v2802_v27  ;;  %v2978_v22 = vadd.f32 %v1131_v6, %v2804_v32  ;;  %v1094_v30 = vpop.f32.mrf.mxu0  ;;  %v1107_v18 = vpop.f32.mrf.mxu1  ;;  %v1590_v27 = vsel %vm1587_vm2, %v1531_v26, %v1563_v2 }
 0x12c   : > { %v1532_v25 = vpack.c.bf16 %v2978_v22, %v2975_v21 }
 0x12e   : > { %v1564_v34 = vrot.slane %v1532_v25, 4  ;;  %v1565_v38 = vrot.slane %v1532_v25, 6 }
 0x130   : > { %v1594_v32 = vsel %vm1591_vm3, %v1564_v34, %v1565_v38 }
 0x131   : > { %v1595_v44 = vsel %vm553_vm0, %v1590_v27, %v1594_v32  ;;  %v1120_v50 = vpop.f32.mrf.mxu2  ;;  %v1133_v51 = vpop.f32.mrf.mxu3 }
 0x132   : > { %1653 = vst [vmem:[%s2985_s27] sm:$0xff] %v1595_v44  ;;  %v1144_v17 = vpop.f32.mrf.mxu0  ;;  %v1157_v59 = vpop.f32.mrf.mxu1 }
 0x133   : > { %v2992_v60 = vadd.f32 %v1144_v17, %v2810_v53  ;;  %v2995_v31 = vadd.f32 %v1157_v59, %v2812_v54 }
 0x135   : > { %v1533_v41 = vpack.c.bf16 %v2995_v31, %v2992_v60 }
 0x137   : > { %v1566_v4 = vrot.slane %v1533_v41, 2 }
 0x139   : > { %v1170_v47 = vpop.f32.mrf.mxu2  ;;  %v1183_v52 = vpop.f32.mrf.mxu3  ;;  %v1598_v49 = vsel %vm1587_vm2, %v1533_v41, %v1566_v4 }
 0x13a   : > { %v3000_v63 = vadd.f32 %v1170_v47, %v2826_v55  ;;  %v3003_v14 = vadd.f32 %v1183_v52, %v2828_v56  ;;  %v1146_v39 = vpop.f32.mrf.mxu0  ;;  %v1159_v3 = vpop.f32.mrf.mxu1 }
 0x13c   : > { %v1534_v53 = vpack.c.bf16 %v3003_v14, %v3000_v63 }
 0x13e   : > { %v1567_v54 = vrot.slane %v1534_v53, 4  ;;  %v1568_v48 = vrot.slane %v1534_v53, 6 }
 0x140   : > { %v1601_v12 = vsel %vm1591_vm3, %v1567_v54, %v1568_v48 }
 0x141   : > { %v1602_v13 = vsel %vm553_vm0, %v1598_v49, %v1601_v12  ;;  %v1172_v19 = vpop.f32.mrf.mxu2  ;;  %v1185_v55 = vpop.f32.mrf.mxu3 }
 0x142   : > { %1654 = vst [vmem:[%s2985_s27 + $0x8] sm:$0xff] %v1602_v13  ;;  %v1196_v20 = vpop.f32.mrf.mxu0  ;;  %v1209_v56 = vpop.f32.mrf.mxu1 }
 0x143   : > { %v3012_v26 = vadd.f32 %v1196_v20, %v2834_v8  ;;  %v3015_v61 = vadd.f32 %v1209_v56, %v2836_v9 }
 0x145   : > { %v1535_v6 = vpack.c.bf16 %v3015_v61, %v3012_v26 }
 0x147   : > { %v1569_v27 = vrot.slane %v1535_v6, 2 }
 0x149   : > { %v1222_v30 = vpop.f32.mrf.mxu2  ;;  %v1235_v18 = vpop.f32.mrf.mxu3  ;;  %v1605_v44 = vsel %vm1587_vm2, %v1535_v6, %v1569_v27 }
 0x14a   : > { %v3020_v2 = vadd.f32 %v1222_v30, %v2850_v10  ;;  %v3023_v25 = vadd.f32 %v1235_v18, %v2852_v11  ;;  %v1198_v34 = vpop.f32.mrf.mxu0  ;;  %v1211_v38 = vpop.f32.mrf.mxu1 }
 0x14c   : > { %v1536_v8 = vpack.c.bf16 %v3023_v25, %v3020_v2 }
 0x14e   : > { %v1570_v9 = vrot.slane %v1536_v8, 4  ;;  %v1571_v32 = vrot.slane %v1536_v8, 6 }
 0x150   : > { %v1608_v50 = vsel %vm1591_vm3, %v1570_v9, %v1571_v32 }
 0x151   : > { %v1609_v51 = vsel %vm553_vm0, %v1605_v44, %v1608_v50  ;;  %v1224_v17 = vpop.f32.mrf.mxu2  ;;  %v1237_v10 = vpop.f32.mrf.mxu3 }
 0x152   : > { %1655 = vst [vmem:[%s2985_s27 + $0x10] sm:$0xff] %v1609_v51  ;;  %v1248_v59 = vpop.f32.mrf.mxu0  ;;  %v1261_v11 = vpop.f32.mrf.mxu1 }
 0x153   : > { %v3032_v41 = vadd.f32 %v1248_v59, %v2858_v40  ;;  %v3035_v47 = vadd.f32 %v1261_v11, %v2860_v42 }
 0x155   : > { %v1537_v52 = vpack.c.bf16 %v3035_v47, %v3032_v41 }
 0x157   : > { %v1572_v49 = vrot.slane %v1537_v52, 2 }
 0x159   : > { %v1274_v39 = vpop.f32.mrf.mxu2  ;;  %v1287_v3 = vpop.f32.mrf.mxu3  ;;  %v1612_v13 = vsel %vm1587_vm2, %v1537_v52, %v1572_v49 }
 0x15a   : > { %v3040_v4 = vadd.f32 %v1274_v39, %v2874_v45  ;;  %v3043_v53 = vadd.f32 %v1287_v3, %v2876_v46  ;;  %v1250_v54 = vpop.f32.mrf.mxu0  ;;  %v1263_v48 = vpop.f32.mrf.mxu1 }
 0x15c   : > { %v1538_v40 = vpack.c.bf16 %v3043_v53, %v3040_v4 }
 0x15e   : > { %v1573_v42 = vrot.slane %v1538_v40, 4  ;;  %v1574_v12 = vrot.slane %v1538_v40, 6 }
 0x160   : > { %v1615_v19 = vsel %vm1591_vm3, %v1573_v42, %v1574_v12 }
 0x161   : > { %v1616_v55 = vsel %vm553_vm0, %v1612_v13, %v1615_v19  ;;  %v1276_v20 = vpop.f32.mrf.mxu2  ;;  %v1289_v45 = vpop.f32.mrf.mxu3 }
 0x162   : > { %1656 = vst [vmem:[%s2985_s27 + $0x18] sm:$0xff] %v1616_v55  ;;  %v1300_v56 = vpop.f32.mrf.mxu0  ;;  %v1313_v46 = vpop.f32.mrf.mxu1 }
 0x163   : > { %v3052_v6 = vadd.f32 %v1300_v56, %v2882_v23  ;;  %v3055_v30 = vadd.f32 %v1313_v46, %v2884_v24 }
 0x165   : > { %v1539_v18 = vpack.c.bf16 %v3055_v30, %v3052_v6 }
 0x167   : > { %v1575_v44 = vrot.slane %v1539_v18, 2 }
 0x169   : > { %v1326_v34 = vpop.f32.mrf.mxu2  ;;  %v1339_v38 = vpop.f32.mrf.mxu3  ;;  %v1619_v51 = vsel %vm1587_vm2, %v1539_v18, %v1575_v44 }
 0x16a   : > { %v3060_v27 = vadd.f32 %v1326_v34, %v2898_v62  ;;  %v3063_v8 = vadd.f32 %v1339_v38, %v2900_v5  ;;  %v1302_v9 = vpop.f32.mrf.mxu0  ;;  %v1315_v32 = vpop.f32.mrf.mxu1 }
 0x16c   : > { %v1540_v23 = vpack.c.bf16 %v3063_v8, %v3060_v27 }
 0x16e   : > { %v1576_v24 = vrot.slane %v1540_v23, 4  ;;  %v1577_v50 = vrot.slane %v1540_v23, 6 }
 0x170   : > { %v1622_v17 = vsel %vm1591_vm3, %v1576_v24, %v1577_v50 }
 0x171   : > { %v1623_v10 = vsel %vm553_vm0, %v1619_v51, %v1622_v17  ;;  %v1328_v59 = vpop.f32.mrf.mxu2  ;;  %v1341_v62 = vpop.f32.mrf.mxu3 }
 0x172   : > { %1657 = vst [vmem:[%s2985_s27 + $0x20] sm:$0xff] %v1623_v10  ;;  %v1352_v11 = vpop.f32.mrf.mxu0  ;;  %v1365_v5 = vpop.f32.mrf.mxu1 }
 0x173   : > { %v3072_v52 = vadd.f32 %v1352_v11, %v2907_v43  ;;  %v3075_v39 = vadd.f32 %v1365_v5, %v2909_v57 }
 0x175   : > { %v1541_v3 = vpack.c.bf16 %v3075_v39, %v3072_v52 }
 0x177   : > { %v1578_v13 = vrot.slane %v1541_v3, 2 }
 0x179   : > { %v1378_v54 = vpop.f32.mrf.mxu2  ;;  %v1391_v48 = vpop.f32.mrf.mxu3  ;;  %v1626_v55 = vsel %vm1587_vm2, %v1541_v3, %v1578_v13 }
 0x17a   : > { %v3080_v49 = vadd.f32 %v1378_v54, %v2925_v33  ;;  %v3083_v40 = vadd.f32 %v1391_v48, %v2927_v36  ;;  %v1354_v42 = vpop.f32.mrf.mxu0  ;;  %v1367_v12 = vpop.f32.mrf.mxu1 }
 0x17c   : > { %v1542_v43 = vpack.c.bf16 %v3083_v40, %v3080_v49 }
 0x17e   : > { %v1579_v57 = vrot.slane %v1542_v43, 4  ;;  %v1580_v19 = vrot.slane %v1542_v43, 6 }
 0x180   : > { %v1629_v20 = vsel %vm1591_vm3, %v1579_v57, %v1580_v19 }
 0x181   : > { %v1630_v45 = vsel %vm553_vm0, %v1626_v55, %v1629_v20  ;;  %v1380_v56 = vpop.f32.mrf.mxu2  ;;  %v1393_v33 = vpop.f32.mrf.mxu3 }
 0x182   : > { %1658 = vst [vmem:[%s2985_s27 + $0x28] sm:$0xff] %v1630_v45  ;;  %v1404_v46 = vpop.f32.mrf.mxu0  ;;  %v1417_v36 = vpop.f32.mrf.mxu1 }
 0x183   : > { %v3092_v18 = vadd.f32 %v1404_v46, %v2932_v0  ;;  %v3095_v34 = vadd.f32 %v1417_v36, %v2934_v58 }
 0x185   : > { %v1543_v38 = vpack.c.bf16 %v3095_v34, %v3092_v18 }
 0x187   : > { %v1581_v51 = vrot.slane %v1543_v38, 2 }
 0x189   : > { %v1430_v9 = vpop.f32.mrf.mxu2  ;;  %v1443_v32 = vpop.f32.mrf.mxu3  ;;  %v1633_v10 = vsel %vm1587_vm2, %v1543_v38, %v1581_v51 }
 0x18a   : > { %v3100_v44 = vadd.f32 %v1430_v9, %v2944_v7  ;;  %v3103_v23 = vadd.f32 %v1443_v32, %v2946_v1  ;;  %v1406_v24 = vpop.f32.mrf.mxu0  ;;  %v1419_v50 = vpop.f32.mrf.mxu1 }
 0x18c   : > { %v1544_v0 = vpack.c.bf16 %v3103_v23, %v3100_v44 }
 0x18e   : > { %v1582_v58 = vrot.slane %v1544_v0, 4  ;;  %v1583_v17 = vrot.slane %v1544_v0, 6 }
 0x190   : > { %v1636_v59 = vsel %vm1591_vm3, %v1582_v58, %v1583_v17 }
 0x191   : > { %v1637_v62 = vsel %vm553_vm0, %v1633_v10, %v1636_v59  ;;  %v1432_v11 = vpop.f32.mrf.mxu2  ;;  %v1445_v7 = vpop.f32.mrf.mxu3 }
 0x192   : > { %1659 = vst [vmem:[%s2985_s27 + $0x30] sm:$0xff] %v1637_v62  ;;  %v1456_v5 = vpop.f32.mrf.mxu0  ;;  %v1469_v1 = vpop.f32.mrf.mxu1 }
 0x193   : > { %v3112_v3 = vadd.f32 %v1456_v5, %v2948_v15  ;;  %v3115_v54 = vadd.f32 %v1469_v1, %v2950_v16 }
 0x195   : > { %v1545_v48 = vpack.c.bf16 %v3115_v54, %v3112_v3 }
 0x197   : > { %v1584_v55 = vrot.slane %v1545_v48, 2 }
 0x199   : > { %v1482_v42 = vpop.f32.mrf.mxu2  ;;  %v1495_v12 = vpop.f32.mrf.mxu3  ;;  %v1640_v45 = vsel %vm1587_vm2, %v1545_v48, %v1584_v55 }
 0x19a   : > { %v3120_v13 = vadd.f32 %v1482_v42, %v2960_v35  ;;  %v3123_v43 = vadd.f32 %v1495_v12, %v2962_v37  ;;  %v1458_v57 = vpop.f32.mrf.mxu0  ;;  %v1471_v19 = vpop.f32.mrf.mxu1 }
 0x19c   : > { %v1546_v15 = vpack.c.bf16 %v3123_v43, %v3120_v13 }
 0x19e   : > { %v1585_v16 = vrot.slane %v1546_v15, 4  ;;  %v1586_v20 = vrot.slane %v1546_v15, 6  ;;  %1664 = sbr.rel (%p2200_p8) target bundleno = 422 (0x1a6), region = 32 }
 0x1a0   : > { %v1643_v56 = vsel %vm1591_vm3, %v1585_v16, %v1586_v20 }
 0x1a1   : > { %v1644_v33 = vsel %vm553_vm0, %v1640_v45, %v1643_v56  ;;  %v1484_v46 = vpop.f32.mrf.mxu2  ;;  %v1497_v35 = vpop.f32.mrf.mxu3 }
 0x1a2   : > { %1660 = vst [vmem:[%s2985_s27 + $0x38] sm:$0xff] %v1644_v33 }
 0x1a3   : > { %vm1665_vm4 = vcmask 3072   ;;  %v2319_v37 = vmov 0.0  }
 0x1a4   : > { %1666 = vst.msk [vmem:[%s2386_s28] sm:$0xf] %vm1665_vm4, %v2319_v37 }
 0x1a5   : > { %1667 = vst.msk [vmem:[%s2391_s5] sm:$0xf] %vm1665_vm4, %v2319_v37 }
 0x1a6 PF: > { %v1669_v36 = vsel %vm553_vm0, %v2966_v28, 0.0  ;;  %v1670_v38 = vsel %vm553_vm0, %v2969_v29, 0.0  ;;  %v1672_v9 = vsel %vm553_vm0, %v2975_v21, 0.0  ;;  %v1674_v24 = vsel %vm553_vm0, %v2978_v22, 0.0 }
 0x1a7   : > { %v1671_v32 = vadd.f32 %v1670_v38, %v1669_v36  ;;  %v1676_v51 = vsel %vm553_vm0, %v2992_v60, 0.0  ;;  %v1678_v58 = vsel %vm553_vm0, %v2995_v31, 0.0  ;;  %v1680_v10 = vsel %vm553_vm0, %v3000_v63, 0.0 }
 0x1a8   : > { %v1738_v59 = vmul.f32 %v2966_v28, %v2966_v28  ;;  %v1739_v11 = vmul.f32 %v2969_v29, %v2969_v29  ;;  %v1740_v7 = vmul.f32 %v2975_v21, %v2975_v21  ;;  %v1682_v5 = vsel %vm553_vm0, %v3003_v14, 0.0 }
 0x1a9   : > { %v1673_v50 = vadd.f32 %v1672_v9, %v1671_v32  ;;  %v1741_v48 = vmul.f32 %v2978_v22, %v2978_v22  ;;  %v1684_v42 = vsel %vm553_vm0, %v3012_v26, 0.0  ;;  %v1742_v57 = vmul.f32 %v2992_v60, %v2992_v60 }
 0x1aa   : > { %v1770_v12 = vsel %vm553_vm0, %v1738_v59, 0.0  ;;  %v1771_v29 = vsel %vm553_vm0, %v1739_v11, 0.0  ;;  %v1773_v21 = vsel %vm553_vm0, %v1740_v7, 0.0  ;;  %v1686_v19 = vsel %vm553_vm0, %v3015_v61, 0.0 }
 0x1ab   : > { %v1675_v0 = vadd.f32 %v1674_v24, %v1673_v50  ;;  %v1772_v55 = vadd.f32 %v1771_v29, %v1770_v12  ;;  %v1743_v22 = vmul.f32 %v2995_v31, %v2995_v31  ;;  %v1775_v16 = vsel %vm553_vm0, %v1741_v48, 0.0 }
 0x1ac   : > { %v1688_v20 = vsel %vm553_vm0, %v3020_v2, 0.0  ;;  %v1744_v60 = vmul.f32 %v3000_v63, %v3000_v63  ;;  %v1777_v33 = vsel %vm553_vm0, %v1742_v57, 0.0  ;;  %v1690_v46 = vsel %vm553_vm0, %v3023_v25, 0.0 }
 0x1ad   : > { %v1677_v17 = vadd.f32 %v1676_v51, %v1675_v0  ;;  %v1774_v45 = vadd.f32 %v1773_v21, %v1772_v55  ;;  %v1745_v31 = vmul.f32 %v3003_v14, %v3003_v14  ;;  %v1779_v36 = vsel %vm553_vm0, %v1743_v22, 0.0 }
 0x1ae   : > { %v1692_v38 = vsel %vm553_vm0, %v3032_v41, 0.0  ;;  %v1746_v63 = vmul.f32 %v3012_v26, %v3012_v26  ;;  %v1781_v24 = vsel %vm553_vm0, %v1744_v60, 0.0  ;;  %v1694_v50 = vsel %vm553_vm0, %v3035_v47, 0.0 }
 0x1af   : > { %v1679_v62 = vadd.f32 %v1678_v58, %v1677_v17  ;;  %v1776_v35 = vadd.f32 %v1775_v16, %v1774_v45  ;;  %v1747_v14 = vmul.f32 %v3015_v61, %v3015_v61  ;;  %v1783_v58 = vsel %vm553_vm0, %v1745_v31, 0.0 }
 0x1b0   : > { %v1696_v17 = vsel %vm553_vm0, %v3040_v4, 0.0  ;;  %v1748_v26 = vmul.f32 %v3020_v2, %v3020_v2  ;;  %v1698_v11 = vsel %vm553_vm0, %v3043_v53, 0.0  ;;  %v1749_v61 = vmul.f32 %v3023_v25, %v3023_v25 }
 0x1b1   : > { %v1681_v1 = vadd.f32 %v1680_v10, %v1679_v62  ;;  %v1778_v9 = vadd.f32 %v1777_v33, %v1776_v35  ;;  %v1785_v62 = vsel %vm553_vm0, %v1746_v63, 0.0  ;;  %v1700_v48 = vsel %vm553_vm0, %v3052_v6, 0.0 }
 0x1b2   : > { %v1750_v2 = vmul.f32 %v3032_v41, %v3032_v41  ;;  %v1702_v57 = vsel %vm553_vm0, %v3055_v30, 0.0  ;;  %v1751_v25 = vmul.f32 %v3035_v47, %v3035_v47  ;;  %v1704_v55 = vsel %vm553_vm0, %v3060_v27, 0.0 }
 0x1b3   : > { %v1683_v28 = vadd.f32 %v1682_v5, %v1681_v1  ;;  %v1780_v51 = vadd.f32 %v1779_v36, %v1778_v9  ;;  %v1787_v1 = vsel %vm553_vm0, %v1747_v14, 0.0  ;;  %v1752_v41 = vmul.f32 %v3040_v4, %v3040_v4 }
 0x1b4   : > { %v1793_v16 = vsel %vm553_vm0, %v1750_v2, 0.0  ;;  %v1753_v47 = vmul.f32 %v3043_v53, %v3043_v53  ;;  %v1795_v60 = vsel %vm553_vm0, %v1751_v25, 0.0  ;;  %v1708_v33 = vsel %vm553_vm0, %v3072_v52, 0.0 }
 0x1b5   : > { %v1685_v15 = vadd.f32 %v1684_v42, %v1683_v28  ;;  %v1782_v10 = vadd.f32 %v1781_v24, %v1780_v51  ;;  %v1789_v28 = vsel %vm553_vm0, %v1748_v26, 0.0  ;;  %v1754_v4 = vmul.f32 %v3052_v6, %v3052_v6 }
 0x1b6   : > { %v1710_v31 = vsel %vm553_vm0, %v3075_v39, 0.0  ;;  %v1755_v53 = vmul.f32 %v3055_v30, %v3055_v30  ;;  %v1799_v9 = vsel %vm553_vm0, %v1753_v47, 0.0  ;;  %v1756_v6 = vmul.f32 %v3060_v27, %v3060_v27 }
 0x1b7   : > { %v1687_v56 = vadd.f32 %v1686_v19, %v1685_v15  ;;  %v1784_v7 = vadd.f32 %v1783_v58, %v1782_v10  ;;  %v1791_v19 = vsel %vm553_vm0, %v1749_v61, 0.0  ;;  %v1714_v51 = vsel %vm553_vm0, %v3083_v40, 0.0 }
 0x1b8   : > { %v1757_v30 = vmul.f32 %v3063_v8, %v3063_v8  ;;  %v1803_v58 = vsel %vm553_vm0, %v1755_v53, 0.0  ;;  %v1758_v27 = vmul.f32 %v3072_v52, %v3072_v52  ;;  %v1805_v26 = vsel %vm553_vm0, %v1756_v6, 0.0 }
 0x1b9   : > { %v1689_v37 = vadd.f32 %v1688_v20, %v1687_v56  ;;  %v1786_v42 = vadd.f32 %v1785_v62, %v1784_v7  ;;  %v1706_v20 = vsel %vm553_vm0, %v3063_v8, 0.0  ;;  %v1718_v62 = vsel %vm553_vm0, %v3095_v34, 0.0 }
 0x1ba   : > { %v1759_v8 = vmul.f32 %v3075_v39, %v3075_v39  ;;  %v1720_v61 = vsel %vm553_vm0, %v3100_v44, 0.0  ;;  %v1760_v52 = vmul.f32 %v3080_v49, %v3080_v49  ;;  %v1761_v39 = vmul.f32 %v3083_v40, %v3083_v40 }
 0x1bb   : > { %v1691_v32 = vadd.f32 %v1690_v46, %v1689_v37  ;;  %v1788_v29 = vadd.f32 %v1787_v1, %v1786_v42  ;;  %v1797_v37 = vsel %vm553_vm0, %v1752_v41, 0.0  ;;  %v1809_v42 = vsel %vm553_vm0, %v1758_v27, 0.0 }
 0x1bc   : > { %v1763_v40 = vmul.f32 %v3095_v34, %v3095_v34  ;;  %v1815_v41 = vsel %vm553_vm0, %v1761_v39, 0.0  ;;  %v1730_v47 = vsel %vm553_vm0, %v3123_v43, 0.0  ;;  %v1765_v34 = vmul.f32 %v3103_v23, %v3103_v23 }
 0x1bd   : > { %v1693_v0 = vadd.f32 %v1692_v38, %v1691_v32  ;;  %v1790_v15 = vadd.f32 %v1789_v28, %v1788_v29  ;;  %v1712_v32 = vsel %vm553_vm0, %v3080_v49, 0.0  ;;  %v1724_v29 = vsel %vm553_vm0, %v3112_v3, 0.0 }
 0x1be   : > { %v1762_v49 = vmul.f32 %v3092_v18, %v3092_v18  ;;  %vm1735_vm5 = vcmask 3072  }
 0x1bf   : > { %v1695_v59 = vadd.f32 %v1694_v50, %v1693_v0  ;;  %v1792_v45 = vadd.f32 %v1791_v19, %v1790_v15  ;;  %v1801_v50 = vsel %vm553_vm0, %v1754_v4, 0.0  ;;  %v1813_v19 = vsel %vm553_vm0, %v1760_v52, 0.0 }
 0x1c1   : > { %v1697_v5 = vadd.f32 %v1696_v17, %v1695_v59  ;;  %v1794_v46 = vadd.f32 %v1793_v16, %v1792_v45  ;;  %v1716_v17 = vsel %vm553_vm0, %v3092_v18, 0.0  ;;  %v1728_v16 = vsel %vm553_vm0, %v3120_v13, 0.0 }
 0x1c2   : > { %v1764_v18 = vmul.f32 %v3100_v44, %v3100_v44 }
 0x1c3   : > { %v1699_v12 = vadd.f32 %v1698_v11, %v1697_v5  ;;  %v1796_v36 = vadd.f32 %v1795_v60, %v1794_v46  ;;  %v1807_v5 = vsel %vm553_vm0, %v1757_v30, 0.0  ;;  %v1819_v46 = vsel %vm553_vm0, %v1763_v40, 0.0 }
 0x1c5   : > { %v1701_v21 = vadd.f32 %v1700_v48, %v1699_v12  ;;  %v1798_v63 = vadd.f32 %v1797_v37, %v1796_v36  ;;  %v1722_v12 = vsel %vm553_vm0, %v3103_v23, 0.0  ;;  %v1766_v37 = vmul.f32 %v3112_v3, %v3112_v3 }
 0x1c6   : > { %v1767_v36 = vmul.f32 %v3115_v54, %v3115_v54  ;;  %v1768_v23 = vmul.f32 %v3120_v13, %v3120_v13  ;;  %v1769_v3 = vmul.f32 %v3123_v43, %v3123_v43  ;;  %v1668_v13 = vld [vmem:[%s2386_s28] sm:$0xf] }
 0x1c7   : > { %v1703_v22 = vadd.f32 %v1702_v57, %v1701_v21  ;;  %v1800_v0 = vadd.f32 %v1799_v9, %v1798_v63  ;;  %v1811_v57 = vsel %vm553_vm0, %v1759_v8, 0.0  ;;  %v1825_v9 = vsel %vm553_vm0, %v1766_v37, 0.0 }
 0x1c8   : > { %v1827_v63 = vsel %vm553_vm0, %v1767_v36, 0.0 }
 0x1c9   : > { %v1705_v56 = vadd.f32 %v1704_v55, %v1703_v22  ;;  %v1802_v10 = vadd.f32 %v1801_v50, %v1800_v0  ;;  %v1726_v55 = vsel %vm553_vm0, %v3115_v54, 0.0  ;;  %v1829_v54 = vsel %vm553_vm0, %v1768_v23, 0.0 }
 0x1ca   : > { %v1831_v50 = vsel %vm553_vm0, %v1769_v3, 0.0 }
 0x1cb   : > { %v1707_v35 = vadd.f32 %v1706_v20, %v1705_v56  ;;  %v1804_v11 = vadd.f32 %v1803_v58, %v1802_v10  ;;  %v1817_v56 = vsel %vm553_vm0, %v1762_v49, 0.0  ;;  %v1737_v58 = vld [vmem:[%s2391_s5] sm:$0xf] }
 0x1cd   : > { %v1709_v38 = vadd.f32 %v1708_v33, %v1707_v35  ;;  %v1806_v1 = vadd.f32 %v1805_v26, %v1804_v11 }
 0x1cf   : > { %v1711_v24 = vadd.f32 %v1710_v31, %v1709_v38  ;;  %v1808_v2 = vadd.f32 %v1807_v5, %v1806_v1  ;;  %v1821_v31 = vsel %vm553_vm0, %v1764_v18, 0.0  ;;  %v1823_v38 = vsel %vm553_vm0, %v1765_v34, 0.0 }
 0x1d1   : > { %v1713_v14 = vadd.f32 %v1712_v32, %v1711_v24  ;;  %v1810_v21 = vadd.f32 %v1809_v42, %v1808_v2 }
 0x1d3   : > { %v1715_v59 = vadd.f32 %v1714_v51, %v1713_v14  ;;  %v1812_v15 = vadd.f32 %v1811_v57, %v1810_v21 }
 0x1d5   : > { %v1717_v7 = vadd.f32 %v1716_v17, %v1715_v59  ;;  %v1814_v20 = vadd.f32 %v1813_v19, %v1812_v15 }
 0x1d7   : > { %v1719_v48 = vadd.f32 %v1718_v62, %v1717_v7  ;;  %v1816_v60 = vadd.f32 %v1815_v41, %v1814_v20 }
 0x1d9   : > { %v1721_v28 = vadd.f32 %v1720_v61, %v1719_v48  ;;  %v1818_v35 = vadd.f32 %v1817_v56, %v1816_v60 }
 0x1db   : > { %v1723_v25 = vadd.f32 %v1722_v12, %v1721_v28  ;;  %v1820_v44 = vadd.f32 %v1819_v46, %v1818_v35 }
 0x1dd   : > { %v1725_v22 = vadd.f32 %v1724_v29, %v1723_v25  ;;  %v1822_v53 = vadd.f32 %v1821_v31, %v1820_v44 }
 0x1df   : > { %v1727_v45 = vadd.f32 %v1726_v55, %v1725_v22  ;;  %v1824_v32 = vadd.f32 %v1823_v38, %v1822_v53 }
 0x1e1   : > { %v1729_v33 = vadd.f32 %v1728_v16, %v1727_v45  ;;  %v1826_v24 = vadd.f32 %v1825_v9, %v1824_v32 }
 0x1e3   : > { %v1731_v4 = vadd.f32 %v1730_v47, %v1729_v33  ;;  %v1828_v6 = vadd.f32 %v1827_v63, %v1826_v24 }
 0x1e5   : > { %1732 = vadd.xlane.f32.xlu0 %v1731_v4  ;;  %v1830_v51 = vadd.f32 %v1829_v54, %v1828_v6 }
 0x1e7   : > { %v1832_v0 = vadd.f32 %v1831_v50, %v1830_v51 }
 0x1ed   : > { %1833 = vadd.xlane.f32.xlu0 %v1832_v0 }
 0x258   : > { %v1733_v14 = vpop.xlane.xlu0 %1732 }
 0x259   : > { %v1734_v30 = vadd.f32 %v1733_v14, %v1668_v13 }
 0x25b   : > { %1736 = vst.msk [vmem:[%s2386_s28] sm:$0xf] %vm1735_vm5, %v1734_v30 }
 0x260   : > { %v1834_v17 = vpop.xlane.xlu0 %1833 }
 0x261   : > { %v1835_v43 = vadd.f32 %v1834_v17, %v1737_v58 }
 0x263   : > { %1836 = vst.msk [vmem:[%s2391_s5] sm:$0xf] %vm1735_vm5, %v1835_v43 }
 0x264 PF: > { %s15_s19 = sadd.s32 1, %s2317_s19   ;;  %s3342_s15 = smov %s2309_s17 }
 0x265   : > { %p12_p9 = scmp.ge.s32.totalorder %s15_s19, 10   ;;  %s3343_s16 = smov %s2313_s18 }
 0x266   : > { %s3344_s17 = smov %s3347_s20  ;;  %s3345_s18 = smov %s3351_s21 }
 0x267   :  { %14 = sbr.rel (!%p12_p9) target bundleno = 3 (0x3), region = 87 }

// kernel: forward.6
= control target key start
LH: loop header
LB: loop body
LE: loop exit
PB: predicated region body
PF: predicated region fallthrough
CT: control target
= control target key end

     0   :  { %s2491_s15 = smov 0   ;;  %s2493_s16 = smov 0   ;;  %s3262_s0 = inlined_call_operand.vmem [shape: bf16[2,1,32,4160], index: 0, kind: input, shape index: {}]   ;;  %s3263_s1 = inlined_call_operand.vmem [shape: bf16[2,8,32], index: 1, kind: input, shape index: {}]   ;;  %s3264_s2 = inlined_call_operand.vmem [shape: bf16[2,8,4096], index: 2, kind: output, shape index: {0}]   ;;  %s3265_s3 = inlined_call_operand.vmem [shape: f32[2,8,1], index: 3, kind: output, shape index: {1}]   ;;  %s3266_s4 = inlined_call_operand.vmem [shape: f32[2,8,1], index: 4, kind: output, shape index: {2}]  }
   0x1   :  { %s2495_s17 = smov 0  }
   0x2 LB: > { %s27_s18 = sadd.s32 1, %s2458_s16  ;;  %p2008_p0 = scmp.ge.s32.totalorder %s2462_s17, 1  ;;  %s2462_s17 = sphi %s2495_s17, %s15_s17   ;;  %s2458_s16 = sphi %s2493_s16, %s3301_s16   ;;  %s2454_s15 = sphi %s2491_s15, %s3300_s15  }
   0x3   : > { %p29_p1 = scmp.ge.s32.totalorder %s27_s18, 2  ;;  %p187_p2 = scmp.lt.s32.totalorder %s2462_s17, 3 }
   0x5   : > { %s3303_s18 = smov (%p29_p1, %s27_s18), 0  ;;  %p188_p3 = pnand %p2008_p0, %p187_p2 }
   0x7   : > { %191 = sbr.rel (%p188_p3) target bundleno = 648 (0x288), region = 28 }
   0xc   : > { %p229_p4 = scmp.lt.s32.totalorder %s2454_s15, 1  ;;  %vm646_vm0 = vcmask 261120   ;;  %v2554_v23 = vld [vmem:[%s3263_s1] sm:$0xf]  ;;  %s2464_s27 = smov 64   ;;  %vm1611_vm1 = vcmask 523264  }
   0xd   : > { %vm1744_vm2 = vcmask 7168  }
   0xe   : > { %s3305_s15 = smov (!%p229_p4, %s2454_s15), 1 }
   0xf   : > { %s2413_s19 = smul.u32 528, %s3305_s15  ;;  %s2346_s28 = sshll.u32 %s3305_s15, 7 }
  0x10   : > { %s3149_s5 = scalar_lea.vmem %s3264_s2, %s2346_s28  ;;  %s2012_s6 = sshll.u32 %s3305_s15, 3 }
  0x11   : > { %s2515_s22 = scalar_lea.vmem %s3262_s0, %s2413_s19  ;;  %s3212_s9 = scalar_lea.vmem %s3265_s3, %s2012_s6 }
  0x12   : > { %v2144_v0 = vld [vmem:[%s2515_s22 + $0x108] sm:$0xf]  ;;  %v2396_v1 = vld [vmem:[%s2515_s22 + $0x188] sm:$0xf0]  ;;  %v2146_v4 = vld [vmem:[%s2515_s22 + $0x18c] sm:$0xf0]  ;;  %s3230_s12 = scalar_lea.vmem %s3266_s4, %s2012_s6 }
  0x13   : > { %v2380_v2 = vld [vmem:[%s2515_s22 + $0x10c] sm:$0xf]  ;;  %v2520_v3 = vor.u32 %v2396_v1, %v2144_v0  ;;  %v2152_v5 = vld [vmem:[%s2515_s22 + $0x110] sm:$0xf]  ;;  %v2397_v6 = vld [vmem:[%s2515_s22 + $0x190] sm:$0xf0] }
  0x14   : > { %v2525_v7 = vor.u32 %v2380_v2, %v2146_v4  ;;  %v2527_v8 = vor.u32 %v2397_v6, %v2152_v5  ;;  %v2381_v9 = vld [vmem:[%s2515_s22 + $0x114] sm:$0xf]  ;;  %v2154_v10 = vld [vmem:[%s2515_s22 + $0x194] sm:$0xf0]  ;;  %v2016_v11 = vld [vmem:[%s2515_s22] sm:$0xf] }
  0x15   : > { %656 = vmatpush.bf16.msra.mxu0 %v2520_v3  ;;  %v2533_v12 = vor.u32 %v2381_v9, %v2154_v10  ;;  %v2363_v13 = vld [vmem:[%s2515_s22 + $0x80] sm:$0xf0]  ;;  %v2018_v15 = vld [vmem:[%s2515_s22 + $0x84] sm:$0xf0]  ;;  %v2364_v19 = vld [vmem:[%s2515_s22 + $0x88] sm:$0xf0] }
  0x16   : > { %v2347_v14 = vld [vmem:[%s2515_s22 + $0x4] sm:$0xf]  ;;  %669 = vmatpush.bf16.msra.mxu1 %v2525_v7  ;;  %682 = vmatpush.bf16.msra.mxu2 %v2527_v8  ;;  %v2540_v16 = vor.u32 %v2363_v13, %v2016_v11  ;;  %v2024_v18 = vld [vmem:[%s2515_s22 + $0x8] sm:$0xf]  ;;  %v2348_v20 = vld [vmem:[%s2515_s22 + $0xc] sm:$0xf] }
  0x17   : > { %v2542_v17 = vor.u32 %v2347_v14, %v2018_v15  ;;  %695 = vmatpush.bf16.msra.mxu3 %v2533_v12  ;;  %v2548_v21 = vor.u32 %v2364_v19, %v2024_v18  ;;  %v2026_v22 = vld [vmem:[%s2515_s22 + $0x8c] sm:$0xf0]  ;;  %v2160_v24 = vld [vmem:[%s2515_s22 + $0x118] sm:$0xf]  ;;  %v2398_v25 = vld [vmem:[%s2515_s22 + $0x198] sm:$0xf0] }
  0x18   : > { %v2558_v26 = vor.u32 %v2348_v20, %v2026_v22  ;;  %v2560_v27 = vor.u32 %v2398_v25, %v2160_v24  ;;  %v2168_v28 = vld [vmem:[%s2515_s22 + $0x120] sm:$0xf]  ;;  %v2399_v29 = vld [vmem:[%s2515_s22 + $0x1a0] sm:$0xf0]  ;;  %v2170_v32 = vld [vmem:[%s2515_s22 + $0x1a4] sm:$0xf0] }
  0x19   : > { %v2383_v30 = vld [vmem:[%s2515_s22 + $0x124] sm:$0xf]  ;;  %657 = vmatpush.bf16.msra.mxu0 %v2540_v16  ;;  %v2566_v31 = vor.u32 %v2399_v29, %v2168_v28  ;;  %v2032_v33 = vld [vmem:[%s2515_s22 + $0x10] sm:$0xf]  ;;  %v2365_v34 = vld [vmem:[%s2515_s22 + $0x90] sm:$0xf0] }
  0x1a   : > { %670 = vmatpush.bf16.msra.mxu1 %v2542_v17  ;;  %683 = vmatpush.bf16.msra.mxu2 %v2548_v21  ;;  %v2382_v35 = vld [vmem:[%s2515_s22 + $0x11c] sm:$0xf]  ;;  %v2162_v36 = vld [vmem:[%s2515_s22 + $0x19c] sm:$0xf0]  ;;  %v2040_v37 = vld [vmem:[%s2515_s22 + $0x18] sm:$0xf]  ;;  %v2578_v38 = vor.u32 %v2383_v30, %v2170_v32  ;;  %v2580_v39 = vor.u32 %v2365_v34, %v2032_v33 }
  0x1b   : > { %696 = vmatpush.bf16.msra.mxu3 %v2558_v26  ;;  %v2582_v40 = vor.u32 %v2382_v35, %v2162_v36  ;;  %v2366_v41 = vld [vmem:[%s2515_s22 + $0x98] sm:$0xf0]  ;;  %v2042_v43 = vld [vmem:[%s2515_s22 + $0x9c] sm:$0xf0]  ;;  %v2349_v45 = vld [vmem:[%s2515_s22 + $0x14] sm:$0xf] }
  0x1c   : > { %v2350_v42 = vld [vmem:[%s2515_s22 + $0x1c] sm:$0xf]  ;;  %2270 = vmatmul.msk.bf16.vlgmr.msra.gmra.mxu0 %vm646_vm0, %v2554_v23  ;;  %v2590_v44 = vor.u32 %v2366_v41, %v2040_v37  ;;  %v2034_v46 = vld [vmem:[%s2515_s22 + $0x94] sm:$0xf0]  ;;  %v2176_v47 = vld [vmem:[%s2515_s22 + $0x128] sm:$0xf] }
  0x1d   : > { %708 = vmatpush.bf16.msrb.mxu0 %v2560_v27  ;;  %2271 = vmatmul.msk.bf16.vlgmr.msra.gmra.mxu1 %vm646_vm0, %v2554_v23  ;;  %v2400_v48 = vld [vmem:[%s2515_s22 + $0x1a8] sm:$0xf0]  ;;  %v2184_v49 = vld [vmem:[%s2515_s22 + $0x130] sm:$0xf]  ;;  %v2401_v50 = vld [vmem:[%s2515_s22 + $0x1b0] sm:$0xf0]  ;;  %v2605_v51 = vor.u32 %v2349_v45, %v2034_v46  ;;  %v2616_v57 = vor.u32 %v2350_v42, %v2042_v43 }
  0x1e   : > { %734 = vmatpush.bf16.msrb.mxu2 %v2566_v31  ;;  %2273 = vmatmul.msk.bf16.vlgmr.msra.gmra.mxu3 %vm646_vm0, %v2554_v23  ;;  %v2607_v52 = vor.u32 %v2400_v48, %v2176_v47  ;;  %v2609_v53 = vor.u32 %v2401_v50, %v2184_v49  ;;  %v2385_v54 = vld [vmem:[%s2515_s22 + $0x134] sm:$0xf]  ;;  %v2186_v55 = vld [vmem:[%s2515_s22 + $0x1b4] sm:$0xf0]  ;;  %v2048_v56 = vld [vmem:[%s2515_s22 + $0x20] sm:$0xf] }
  0x1f   : > { %2272 = vmatmul.msk.bf16.vlgmr.msra.gmra.mxu2 %vm646_vm0, %v2554_v23  ;;  %721 = vmatpush.bf16.msrb.mxu1 %v2582_v40  ;;  %v2367_v58 = vld [vmem:[%s2515_s22 + $0xa0] sm:$0xf0]  ;;  %v2384_v59 = vld [vmem:[%s2515_s22 + $0x12c] sm:$0xf]  ;;  %v2178_v60 = vld [vmem:[%s2515_s22 + $0x1ac] sm:$0xf0]  ;;  %v2623_v61 = vor.u32 %v2385_v54, %v2186_v55 }
  0x20   : > { %747 = vmatpush.bf16.msrb.mxu3 %v2578_v38  ;;  %v2625_v62 = vor.u32 %v2367_v58, %v2048_v56  ;;  %v2627_v63 = vor.u32 %v2384_v59, %v2178_v60  ;;  %v2056_v0 = vld [vmem:[%s2515_s22 + $0x28] sm:$0xf]  ;;  %v2368_v1 = vld [vmem:[%s2515_s22 + $0xa8] sm:$0xf0]  ;;  %v2058_v5 = vld [vmem:[%s2515_s22 + $0xac] sm:$0xf0] }
  0x21   : > { %709 = vmatpush.bf16.msrb.mxu0 %v2580_v39  ;;  %v2352_v2 = vld [vmem:[%s2515_s22 + $0x2c] sm:$0xf]  ;;  %v2633_v4 = vor.u32 %v2368_v1, %v2056_v0  ;;  %v2351_v6 = vld [vmem:[%s2515_s22 + $0x24] sm:$0xf]  ;;  %v2050_v9 = vld [vmem:[%s2515_s22 + $0xa4] sm:$0xf0] }
  0x22   : > { %735 = vmatpush.bf16.msrb.mxu2 %v2590_v44  ;;  %v2641_v10 = vor.u32 %v2351_v6, %v2050_v9  ;;  %v2645_v11 = vor.u32 %v2352_v2, %v2058_v5  ;;  %v2192_v13 = vld [vmem:[%s2515_s22 + $0x138] sm:$0xf]  ;;  %v2402_v14 = vld [vmem:[%s2515_s22 + $0x1b8] sm:$0xf0]  ;;  %v2200_v15 = vld [vmem:[%s2515_s22 + $0x140] sm:$0xf] }
  0x23   : > { %722 = vmatpush.bf16.msrb.mxu1 %v2605_v51  ;;  %v2403_v18 = vld [vmem:[%s2515_s22 + $0x1c0] sm:$0xf0]  ;;  %v2202_v20 = vld [vmem:[%s2515_s22 + $0x1c4] sm:$0xf0]  ;;  %v2386_v22 = vld [vmem:[%s2515_s22 + $0x13c] sm:$0xf]  ;;  %v2658_v25 = vor.u32 %v2402_v14, %v2192_v13 }
  0x24   : > { %748 = vmatpush.bf16.msrb.mxu3 %v2616_v57  ;;  %v2387_v19 = vld [vmem:[%s2515_s22 + $0x144] sm:$0xf]  ;;  %v2194_v24 = vld [vmem:[%s2515_s22 + $0x1bc] sm:$0xf0]  ;;  %v2660_v28 = vor.u32 %v2403_v18, %v2200_v15  ;;  %v2064_v30 = vld [vmem:[%s2515_s22 + $0x30] sm:$0xf] }
  0x25   : > { %760 = vmatpush.bf16.msra.mxu0 %v2607_v52  ;;  %v2662_v29 = vor.u32 %v2387_v19, %v2202_v20  ;;  %v2369_v32 = vld [vmem:[%s2515_s22 + $0xb0] sm:$0xf0]  ;;  %v2072_v33 = vld [vmem:[%s2515_s22 + $0x38] sm:$0xf]  ;;  %v2669_v34 = vor.u32 %v2386_v22, %v2194_v24  ;;  %v2370_v35 = vld [vmem:[%s2515_s22 + $0xb8] sm:$0xf0] }
  0x26   : > { %786 = vmatpush.bf16.msra.mxu2 %v2609_v53  ;;  %v2354_v36 = vld [vmem:[%s2515_s22 + $0x3c] sm:$0xf]  ;;  %v2074_v37 = vld [vmem:[%s2515_s22 + $0xbc] sm:$0xf0]  ;;  %v2353_v41 = vld [vmem:[%s2515_s22 + $0x34] sm:$0xf]  ;;  %v2683_v43 = vor.u32 %v2369_v32, %v2064_v30  ;;  %v2687_v45 = vor.u32 %v2370_v35, %v2072_v33 }
  0x27   : > { %773 = vmatpush.bf16.msra.mxu1 %v2627_v63  ;;  %v2066_v42 = vld [vmem:[%s2515_s22 + $0xb4] sm:$0xf0]  ;;  %v2689_v46 = vor.u32 %v2354_v36, %v2074_v37  ;;  %v2208_v48 = vld [vmem:[%s2515_s22 + $0x148] sm:$0xf]  ;;  %v2404_v49 = vld [vmem:[%s2515_s22 + $0x1c8] sm:$0xf0] }
  0x28   : > { %799 = vmatpush.bf16.msra.mxu3 %v2623_v61  ;;  %v2692_v47 = vor.u32 %v2353_v41, %v2066_v42  ;;  %v2216_v50 = vld [vmem:[%s2515_s22 + $0x150] sm:$0xf]  ;;  %v2405_v54 = vld [vmem:[%s2515_s22 + $0x1d0] sm:$0xf0]  ;;  %v2218_v56 = vld [vmem:[%s2515_s22 + $0x1d4] sm:$0xf0]  ;;  %v2706_v60 = vor.u32 %v2404_v49, %v2208_v48 }
  0x29   : > { %761 = vmatpush.bf16.msra.mxu0 %v2625_v62  ;;  %v2389_v55 = vld [vmem:[%s2515_s22 + $0x154] sm:$0xf]  ;;  %v2388_v58 = vld [vmem:[%s2515_s22 + $0x14c] sm:$0xf]  ;;  %v2210_v59 = vld [vmem:[%s2515_s22 + $0x1cc] sm:$0xf0]  ;;  %v2708_v0 = vor.u32 %v2405_v54, %v2216_v50 }
  0x2a   : > { %787 = vmatpush.bf16.msra.mxu2 %v2633_v4  ;;  %v2710_v1 = vor.u32 %v2389_v55, %v2218_v56  ;;  %v2080_v2 = vld [vmem:[%s2515_s22 + $0x40] sm:$0xf]  ;;  %v2371_v5 = vld [vmem:[%s2515_s22 + $0xc0] sm:$0xf0]  ;;  %v2088_v6 = vld [vmem:[%s2515_s22 + $0x48] sm:$0xf]  ;;  %v2717_v9 = vor.u32 %v2388_v58, %v2210_v59 }
  0x2b   : > { %774 = vmatpush.bf16.msra.mxu1 %v2641_v10  ;;  %v2372_v13 = vld [vmem:[%s2515_s22 + $0xc8] sm:$0xf0]  ;;  %v2090_v15 = vld [vmem:[%s2515_s22 + $0xcc] sm:$0xf0]  ;;  %v2355_v18 = vld [vmem:[%s2515_s22 + $0x44] sm:$0xf]  ;;  %v2731_v20 = vor.u32 %v2371_v5, %v2080_v2 }
  0x2c   : > { %800 = vmatpush.bf16.msra.mxu3 %v2645_v11  ;;  %2274 = vmatmul.msk.bf16.vlgmr.msrb.gmra.mxu0 %vm646_vm0, %v2554_v23  ;;  %v2356_v14 = vld [vmem:[%s2515_s22 + $0x4c] sm:$0xf]  ;;  %v2082_v19 = vld [vmem:[%s2515_s22 + $0xc4] sm:$0xf0]  ;;  %v2735_v22 = vor.u32 %v2372_v13, %v2088_v6  ;;  %v2224_v32 = vld [vmem:[%s2515_s22 + $0x158] sm:$0xf] }
  0x2d   : > { %2275 = vmatmul.msk.bf16.vlgmr.msrb.gmra.mxu1 %vm646_vm0, %v2554_v23  ;;  %812 = vmatpush.bf16.msrb.mxu0 %v2658_v25  ;;  %v2737_v24 = vor.u32 %v2356_v14, %v2090_v15  ;;  %v2740_v30 = vor.u32 %v2355_v18, %v2082_v19  ;;  %v2406_v33 = vld [vmem:[%s2515_s22 + $0x1d8] sm:$0xf0]  ;;  %v2232_v35 = vld [vmem:[%s2515_s22 + $0x160] sm:$0xf]  ;;  %v2407_v36 = vld [vmem:[%s2515_s22 + $0x1e0] sm:$0xf0] }
  0x2e   : > { %2277 = vmatmul.msk.bf16.vlgmr.msrb.gmra.mxu3 %vm646_vm0, %v2554_v23  ;;  %v2391_v37 = vld [vmem:[%s2515_s22 + $0x164] sm:$0xf]  ;;  %v2234_v41 = vld [vmem:[%s2515_s22 + $0x1e4] sm:$0xf0]  ;;  %v2390_v42 = vld [vmem:[%s2515_s22 + $0x15c] sm:$0xf]  ;;  %v2754_v49 = vor.u32 %v2406_v33, %v2224_v32  ;;  %v2756_v50 = vor.u32 %v2407_v36, %v2232_v35 }
  0x2f   : > { %2276 = vmatmul.msk.bf16.vlgmr.msrb.gmra.mxu2 %vm646_vm0, %v2554_v23  ;;  %825 = vmatpush.bf16.msrb.mxu1 %v2669_v34  ;;  %v2226_v48 = vld [vmem:[%s2515_s22 + $0x1dc] sm:$0xf0]  ;;  %v2758_v54 = vor.u32 %v2391_v37, %v2234_v41  ;;  %v2096_v55 = vld [vmem:[%s2515_s22 + $0x50] sm:$0xf]  ;;  %v2373_v56 = vld [vmem:[%s2515_s22 + $0xd0] sm:$0xf0] }
  0x30   : > { %838 = vmatpush.bf16.msrb.mxu2 %v2660_v28  ;;  %851 = vmatpush.bf16.msrb.mxu3 %v2662_v29  ;;  %v2104_v58 = vld [vmem:[%s2515_s22 + $0x58] sm:$0xf]  ;;  %v2765_v59 = vor.u32 %v2390_v42, %v2226_v48  ;;  %v2374_v2 = vld [vmem:[%s2515_s22 + $0xd8] sm:$0xf0]  ;;  %v2106_v6 = vld [vmem:[%s2515_s22 + $0xdc] sm:$0xf0]  ;;  %v2779_v15 = vor.u32 %v2373_v56, %v2096_v55 }
  0x31   : > { %813 = vmatpush.bf16.msrb.mxu0 %v2683_v43  ;;  %v2358_v5 = vld [vmem:[%s2515_s22 + $0x5c] sm:$0xf]  ;;  %v2357_v13 = vld [vmem:[%s2515_s22 + $0x54] sm:$0xf]  ;;  %v2098_v14 = vld [vmem:[%s2515_s22 + $0xd4] sm:$0xf0]  ;;  %v2783_v18 = vor.u32 %v2374_v2, %v2104_v58 }
  0x32   : > { %v2785_v19 = vor.u32 %v2358_v5, %v2106_v6  ;;  %v2788_v32 = vor.u32 %v2357_v13, %v2098_v14  ;;  %v2240_v33 = vld [vmem:[%s2515_s22 + $0x168] sm:$0xf]  ;;  %v2408_v35 = vld [vmem:[%s2515_s22 + $0x1e8] sm:$0xf0]  ;;  %v2248_v36 = vld [vmem:[%s2515_s22 + $0x170] sm:$0xf] }
  0x33   : > { %826 = vmatpush.bf16.msrb.mxu1 %v2692_v47  ;;  %3278 = vst [vmem:[#allocation2_spill] sm:$0xff] %v2783_v18  ;;  %v2409_v37 = vld [vmem:[%s2515_s22 + $0x1f0] sm:$0xf0]  ;;  %v2250_v42 = vld [vmem:[%s2515_s22 + $0x1f4] sm:$0xf0]  ;;  %v2802_v56 = vor.u32 %v2408_v35, %v2240_v33 }
  0x34   : > { %839 = vmatpush.bf16.msrb.mxu2 %v2687_v45  ;;  %852 = vmatpush.bf16.msrb.mxu3 %v2689_v46  ;;  %3279 = vst [vmem:[#allocation3_spill] sm:$0xff] %v2785_v19  ;;  %v2393_v41 = vld [vmem:[%s2515_s22 + $0x174] sm:$0xf]  ;;  %v2392_v48 = vld [vmem:[%s2515_s22 + $0x16c] sm:$0xf]  ;;  %v2804_v58 = vor.u32 %v2409_v37, %v2248_v36 }
  0x35   : > { %3280 = vst [vmem:[#allocation4_spill] sm:$0xff] %v2788_v32  ;;  %v2242_v55 = vld [vmem:[%s2515_s22 + $0x1ec] sm:$0xf0]  ;;  %v2806_v2 = vor.u32 %v2393_v41, %v2250_v42  ;;  %v2112_v5 = vld [vmem:[%s2515_s22 + $0x60] sm:$0xf] }
  0x36   : > { %3281 = vst [vmem:[#allocation5_spill] sm:$0xff] %v2802_v56  ;;  %v2375_v6 = vld [vmem:[%s2515_s22 + $0xe0] sm:$0xf0]  ;;  %v2120_v13 = vld [vmem:[%s2515_s22 + $0x68] sm:$0xf]  ;;  %v2813_v14 = vor.u32 %v2392_v48, %v2242_v55 }
  0x37   : > { %3282 = vst [vmem:[#allocation6_spill] sm:$0xff] %v2804_v58  ;;  %v2359_v33 = vld [vmem:[%s2515_s22 + $0x64] sm:$0xf]  ;;  %v2114_v35 = vld [vmem:[%s2515_s22 + $0xe4] sm:$0xf0]  ;;  %v2827_v36 = vor.u32 %v2375_v6, %v2112_v5 }
  0x38   : > { %3283 = vst [vmem:[#allocation7_spill] sm:$0xff] %v2806_v2  ;;  %v2836_v42 = vor.u32 %v2359_v33, %v2114_v35  ;;  %v2256_v48 = vld [vmem:[%s2515_s22 + $0x178] sm:$0xf]  ;;  %v2395_v55 = vld [vmem:[%s2515_s22 + $0x184] sm:$0xf] }
  0x39   : > { %3284 = vst [vmem:[#allocation8_spill] sm:$0xff] %v2813_v14  ;;  %v2266_v5 = vld [vmem:[%s2515_s22 + $0x204] sm:$0xf0]  ;;  %v2394_v6 = vld [vmem:[%s2515_s22 + $0x17c] sm:$0xf] }
  0x3a   : > { %3285 = vst [vmem:[#allocation9_spill] sm:$0xff] %v2827_v36 }
  0x3b   : > { %3288 = vst [vmem:[#allocation12_spill] sm:$0xff] %v2836_v42 }
  0x3c   : > { %2278 = vmatmul.msk.bf16.vlgmr.msra.gmra.mxu0 %vm646_vm0, %v2554_v23 }
  0x3d   : > { %2279 = vmatmul.msk.bf16.vlgmr.msra.gmra.mxu1 %vm646_vm0, %v2554_v23  ;;  %864 = vmatpush.bf16.msra.mxu0 %v2706_v60 }
  0x3e   : > { %2281 = vmatmul.msk.bf16.vlgmr.msra.gmra.mxu3 %vm646_vm0, %v2554_v23  ;;  %877 = vmatpush.bf16.msra.mxu1 %v2717_v9 }
  0x3f   : > { %2280 = vmatmul.msk.bf16.vlgmr.msra.gmra.mxu2 %vm646_vm0, %v2554_v23  ;;  %903 = vmatpush.bf16.msra.mxu3 %v2710_v1 }
  0x40   : > { %890 = vmatpush.bf16.msra.mxu2 %v2708_v0 }
  0x41   : > { %865 = vmatpush.bf16.msra.mxu0 %v2731_v20 }
  0x42   : > { %878 = vmatpush.bf16.msra.mxu1 %v2740_v30 }
  0x43   : > { %904 = vmatpush.bf16.msra.mxu3 %v2737_v24 }
  0x44   : > { %891 = vmatpush.bf16.msra.mxu2 %v2735_v22 }
  0x4c   : > { %2282 = vmatmul.msk.bf16.vlgmr.msrb.gmra.mxu0 %vm646_vm0, %v2554_v23 }
  0x4d   : > { %2283 = vmatmul.msk.bf16.vlgmr.msrb.gmra.mxu1 %vm646_vm0, %v2554_v23  ;;  %916 = vmatpush.bf16.msrb.mxu0 %v2754_v49 }
  0x4e   : > { %2285 = vmatmul.msk.bf16.vlgmr.msrb.gmra.mxu3 %vm646_vm0, %v2554_v23  ;;  %929 = vmatpush.bf16.msrb.mxu1 %v2765_v59 }
  0x4f   : > { %2284 = vmatmul.msk.bf16.vlgmr.msrb.gmra.mxu2 %vm646_vm0, %v2554_v23  ;;  %955 = vmatpush.bf16.msrb.mxu3 %v2758_v54 }
  0x50   : > { %942 = vmatpush.bf16.msrb.mxu2 %v2756_v50 }
  0x51   : > { %917 = vmatpush.bf16.msrb.mxu0 %v2779_v15 }
  0x52   : > { %930 = vmatpush.bf16.msrb.mxu1 %v2788_v32  ;;  %v2376_v32 = vld [vmem:[%s2515_s22 + $0xe8] sm:$0xf0] }
  0x53   : > { %956 = vmatpush.bf16.msrb.mxu3 %v2785_v19  ;;  %v2360_v19 = vld [vmem:[%s2515_s22 + $0x6c] sm:$0xf]  ;;  %v2831_v37 = vor.u32 %v2376_v32, %v2120_v13  ;;  %v2410_v32 = vld [vmem:[%s2515_s22 + $0x1f8] sm:$0xf0]  ;;  %v2258_v13 = vld [vmem:[%s2515_s22 + $0x1fc] sm:$0xf0] }
  0x54   : > { %943 = vmatpush.bf16.msrb.mxu2 %v2783_v18  ;;  %v2122_v18 = vld [vmem:[%s2515_s22 + $0xec] sm:$0xf0]  ;;  %v2850_v33 = vor.u32 %v2410_v32, %v2256_v48  ;;  %v2361_v48 = vld [vmem:[%s2515_s22 + $0x74] sm:$0xf]  ;;  %v2130_v32 = vld [vmem:[%s2515_s22 + $0xf4] sm:$0xf0] }
  0x55   : > { %3286 = vst [vmem:[#allocation10_spill] sm:$0xff] %v2831_v37  ;;  %v2833_v41 = vor.u32 %v2360_v19, %v2122_v18  ;;  %v2264_v18 = vld [vmem:[%s2515_s22 + $0x180] sm:$0xf]  ;;  %v2411_v19 = vld [vmem:[%s2515_s22 + $0x200] sm:$0xf0] }
  0x56   : > { %v2852_v35 = vor.u32 %v2411_v19, %v2264_v18 }
  0x57   : > { %3287 = vst [vmem:[#allocation11_spill] sm:$0xff] %v2833_v41 }
  0x5c   : > { %2286 = vmatmul.msk.bf16.vlgmr.msra.gmra.mxu0 %vm646_vm0, %v2554_v23 }
  0x5d   : > { %2287 = vmatmul.msk.bf16.vlgmr.msra.gmra.mxu1 %vm646_vm0, %v2554_v23  ;;  %968 = vmatpush.bf16.msra.mxu0 %v2802_v56  ;;  %v2138_v56 = vld [vmem:[%s2515_s22 + $0xfc] sm:$0xf0] }
  0x5e   : > { %2289 = vmatmul.msk.bf16.vlgmr.msra.gmra.mxu3 %vm646_vm0, %v2554_v23  ;;  %981 = vmatpush.bf16.msra.mxu1 %v2813_v14  ;;  %v2861_v14 = vor.u32 %v2394_v6, %v2258_v13 }
  0x5f   : > { %2288 = vmatmul.msk.bf16.vlgmr.msra.gmra.mxu2 %vm646_vm0, %v2554_v23  ;;  %1007 = vmatpush.bf16.msra.mxu3 %v2806_v2  ;;  %v2378_v2 = vld [vmem:[%s2515_s22 + $0xf8] sm:$0xf0] }
  0x60   : > { %994 = vmatpush.bf16.msra.mxu2 %v2804_v58  ;;  %v2362_v58 = vld [vmem:[%s2515_s22 + $0x7c] sm:$0xf] }
  0x61   : > { %969 = vmatpush.bf16.msra.mxu0 %v2827_v36  ;;  %v2136_v36 = vld [vmem:[%s2515_s22 + $0x78] sm:$0xf] }
  0x62   : > { %982 = vmatpush.bf16.msra.mxu1 %v2836_v42  ;;  %v2128_v42 = vld [vmem:[%s2515_s22 + $0x70] sm:$0xf]  ;;  %v2879_v19 = vor.u32 %v2378_v2, %v2136_v36  ;;  %v3298_v2 = vld [vmem:[#allocation11_spill] sm:$0xff] }
  0x63   : > { %1008 = vmatpush.bf16.msra.mxu3 %v2833_v41  ;;  %v2854_v41 = vor.u32 %v2395_v55, %v2266_v5  ;;  %v2881_v55 = vor.u32 %v2362_v58, %v2138_v56  ;;  %v2884_v5 = vor.u32 %v2361_v48, %v2130_v32  ;;  %v3296_v56 = vld [vmem:[#allocation9_spill] sm:$0xff]  ;;  %v3297_v58 = vld [vmem:[#allocation10_spill] sm:$0xff]  ;;  %v3299_v36 = vld [vmem:[#allocation12_spill] sm:$0xff] }
  0x64   : > { %995 = vmatpush.bf16.msra.mxu2 %v2831_v37  ;;  %v2377_v37 = vld [vmem:[%s2515_s22 + $0xf0] sm:$0xf0] }
  0x65   : > { %v2875_v18 = vor.u32 %v2377_v37, %v2128_v42 }
  0x6c   : > { %2290 = vmatmul.msk.bf16.vlgmr.msrb.gmra.mxu0 %vm646_vm0, %v2554_v23 }
  0x6d   : > { %2291 = vmatmul.msk.bf16.vlgmr.msrb.gmra.mxu1 %vm646_vm0, %v2554_v23  ;;  %1020 = vmatpush.bf16.msrb.mxu0 %v2850_v33 }
  0x6e   : > { %2293 = vmatmul.msk.bf16.vlgmr.msrb.gmra.mxu3 %vm646_vm0, %v2554_v23  ;;  %1033 = vmatpush.bf16.msrb.mxu1 %v2861_v14 }
  0x6f   : > { %2292 = vmatmul.msk.bf16.vlgmr.msrb.gmra.mxu2 %vm646_vm0, %v2554_v23  ;;  %1059 = vmatpush.bf16.msrb.mxu3 %v2854_v41 }
  0x70   : > { %1046 = vmatpush.bf16.msrb.mxu2 %v2852_v35 }
  0x71   : > { %1021 = vmatpush.bf16.msrb.mxu0 %v2875_v18 }
  0x72   : > { %1034 = vmatpush.bf16.msrb.mxu1 %v2884_v5 }
  0x73   : > { %1060 = vmatpush.bf16.msrb.mxu3 %v2881_v55 }
  0x74   : > { %1047 = vmatpush.bf16.msrb.mxu2 %v2879_v19 }
  0x7c   : > { %2294 = vmatmul.msk.bf16.vlgmr.msra.gmra.mxu0 %vm646_vm0, %v2554_v23 }
  0x7d   : > { %2295 = vmatmul.msk.bf16.vlgmr.msra.gmra.mxu1 %vm646_vm0, %v2554_v23  ;;  %1089 = vmatpush.bf16.msra.mxu0 %v2520_v3 }
  0x7e   : > { %2297 = vmatmul.msk.bf16.vlgmr.msra.gmra.mxu3 %vm646_vm0, %v2554_v23  ;;  %1102 = vmatpush.bf16.msra.mxu1 %v2525_v7  ;;  %v2927_v7 = vld [vmem:[%s3263_s1 + $0x4] sm:$0xf] }
  0x7f   : > { %2296 = vmatmul.msk.bf16.vlgmr.msra.gmra.mxu2 %vm646_vm0, %v2554_v23  ;;  %1128 = vmatpush.bf16.msra.mxu3 %v2533_v12 }
  0x80   : > { %1115 = vmatpush.bf16.msra.mxu2 %v2527_v8 }
  0x81   : > { %1090 = vmatpush.bf16.msra.mxu0 %v2540_v16 }
  0x82   : > { %1103 = vmatpush.bf16.msra.mxu1 %v2542_v17 }
  0x83   : > { %1129 = vmatpush.bf16.msra.mxu3 %v2558_v26 }
  0x84   : > { %1116 = vmatpush.bf16.msra.mxu2 %v2548_v21 }
  0x8c   : > { %2298 = vmatmul.msk.bf16.vlgmr.msrb.gmra.mxu0 %vm646_vm0, %v2554_v23 }
  0x8d   : > { %2299 = vmatmul.msk.bf16.vlgmr.msrb.gmra.mxu1 %vm646_vm0, %v2554_v23  ;;  %1141 = vmatpush.bf16.msrb.mxu0 %v2560_v27 }
  0x8e   : > { %2301 = vmatmul.msk.bf16.vlgmr.msrb.gmra.mxu3 %vm646_vm0, %v2554_v23  ;;  %1154 = vmatpush.bf16.msrb.mxu1 %v2582_v40 }
  0x8f   : > { %2300 = vmatmul.msk.bf16.vlgmr.msrb.gmra.mxu2 %vm646_vm0, %v2554_v23  ;;  %1180 = vmatpush.bf16.msrb.mxu3 %v2578_v38 }
  0x90   : > { %1167 = vmatpush.bf16.msrb.mxu2 %v2566_v31 }
  0x91   : > { %1142 = vmatpush.bf16.msrb.mxu0 %v2580_v39 }
  0x92   : > { %1155 = vmatpush.bf16.msrb.mxu1 %v2605_v51 }
  0x93   : > { %1181 = vmatpush.bf16.msrb.mxu3 %v2616_v57 }
  0x94   : > { %1168 = vmatpush.bf16.msrb.mxu2 %v2590_v44 }
  0x99   : > { %v2922_v3 = vpop.f32.mrf.mxu0 }
  0x9a   : > { %v2929_v8 = vpop.f32.mrf.mxu1 }
  0x9c   : > { %2311 = vmatmul.msk.bf16.vlgmr.msra.gmra.mxu0 %vm646_vm0, %v2927_v7 }
  0x9d   : > { %2312 = vmatmul.msk.bf16.vlgmr.msra.gmra.mxu1 %vm646_vm0, %v2927_v7  ;;  %1193 = vmatpush.bf16.msra.mxu0 %v2607_v52 }
  0x9e   : > { %2314 = vmatmul.msk.bf16.vlgmr.msra.gmra.mxu3 %vm646_vm0, %v2927_v7  ;;  %1206 = vmatpush.bf16.msra.mxu1 %v2627_v63 }
  0x9f   : > { %2313 = vmatmul.msk.bf16.vlgmr.msra.gmra.mxu2 %vm646_vm0, %v2927_v7  ;;  %1232 = vmatpush.bf16.msra.mxu3 %v2623_v61 }
  0xa0   : > { %1219 = vmatpush.bf16.msra.mxu2 %v2609_v53 }
  0xa1   : > { %v2945_v16 = vpop.f32.mrf.mxu3  ;;  %v661_v17 = vpop.f32.mrf.mxu0  ;;  %1194 = vmatpush.bf16.msra.mxu0 %v2625_v62 }
  0xa2   : > { %v2942_v12 = vpop.f32.mrf.mxu2  ;;  %v674_v21 = vpop.f32.mrf.mxu1  ;;  %1207 = vmatpush.bf16.msra.mxu1 %v2641_v10 }
  0xa3   : > { %1233 = vmatpush.bf16.msra.mxu3 %v2645_v11 }
  0xa4   : > { %1220 = vmatpush.bf16.msra.mxu2 %v2633_v4 }
  0xa9   : > { %v700_v26 = vpop.f32.mrf.mxu3  ;;  %v2951_v27 = vpop.f32.mrf.mxu0 }
  0xaa   : > { %v687_v23 = vpop.f32.mrf.mxu2  ;;  %v2953_v31 = vpop.f32.mrf.mxu1  ;;  %v2412_v26 = vld [vmem:[%s2515_s22 + $0x208] sm:$0xf0] }
  0xac   : > { %2315 = vmatmul.msk.bf16.vlgmr.msrb.gmra.mxu0 %vm646_vm0, %v2927_v7 }
  0xad   : > { %2316 = vmatmul.msk.bf16.vlgmr.msrb.gmra.mxu1 %vm646_vm0, %v2927_v7  ;;  %1245 = vmatpush.bf16.msrb.mxu0 %v2658_v25 }
  0xae   : > { %2318 = vmatmul.msk.bf16.vlgmr.msrb.gmra.mxu3 %vm646_vm0, %v2927_v7  ;;  %1258 = vmatpush.bf16.msrb.mxu1 %v2669_v34 }
  0xaf   : > { %2317 = vmatmul.msk.bf16.vlgmr.msrb.gmra.mxu2 %vm646_vm0, %v2927_v7  ;;  %1284 = vmatpush.bf16.msrb.mxu3 %v2662_v29 }
  0xb0   : > { %1271 = vmatpush.bf16.msrb.mxu2 %v2660_v28 }
  0xb1   : > { %v2969_v39 = vpop.f32.mrf.mxu3  ;;  %v713_v40 = vpop.f32.mrf.mxu0  ;;  %1246 = vmatpush.bf16.msrb.mxu0 %v2683_v43 }
  0xb2   : > { %v2966_v38 = vpop.f32.mrf.mxu2  ;;  %v726_v44 = vpop.f32.mrf.mxu1  ;;  %1259 = vmatpush.bf16.msrb.mxu1 %v2692_v47  ;;  %v3290_v47 = vld [vmem:[#allocation3_spill] sm:$0xff] }
  0xb3   : > { %1285 = vmatpush.bf16.msrb.mxu3 %v2689_v46  ;;  %v3289_v46 = vld [vmem:[#allocation2_spill] sm:$0xff] }
  0xb4   : > { %1272 = vmatpush.bf16.msrb.mxu2 %v2687_v45  ;;  %v2305_v44 = vld [vmem:[%s2515_s22 + $0x80] sm:$0xf] }
  0xb9   : > { %v752_v52 = vpop.f32.mrf.mxu3  ;;  %v2975_v53 = vpop.f32.mrf.mxu0 }
  0xba   : > { %v739_v51 = vpop.f32.mrf.mxu2  ;;  %v2977_v57 = vpop.f32.mrf.mxu1 }
  0xbb   : > { %v2379_v51 = vld [vmem:[%s2515_s22 + $0x100] sm:$0xf0] }
  0xbc   : > { %2319 = vmatmul.msk.bf16.vlgmr.msra.gmra.mxu0 %vm646_vm0, %v2927_v7  ;;  %v2306_v52 = vor.u32 %v2379_v51, %v2305_v44 }
  0xbd   : > { %2320 = vmatmul.msk.bf16.vlgmr.msra.gmra.mxu1 %vm646_vm0, %v2927_v7  ;;  %1297 = vmatpush.bf16.msra.mxu0 %v2706_v60  ;;  %v3291_v60 = vld [vmem:[#allocation4_spill] sm:$0xff] }
  0xbe   : > { %2322 = vmatmul.msk.bf16.vlgmr.msra.gmra.mxu3 %vm646_vm0, %v2927_v7  ;;  %1310 = vmatpush.bf16.msra.mxu1 %v2717_v9 }
  0xbf   : > { %2321 = vmatmul.msk.bf16.vlgmr.msra.gmra.mxu2 %vm646_vm0, %v2927_v7  ;;  %1336 = vmatpush.bf16.msra.mxu3 %v2710_v1 }
  0xc0   : > { %1323 = vmatpush.bf16.msra.mxu2 %v2708_v0 }
  0xc1   : > { %v2993_v62 = vpop.f32.mrf.mxu3  ;;  %v765_v63 = vpop.f32.mrf.mxu0  ;;  %1298 = vmatpush.bf16.msra.mxu0 %v2731_v20 }
  0xc2   : > { %v2990_v61 = vpop.f32.mrf.mxu2  ;;  %v778_v4 = vpop.f32.mrf.mxu1  ;;  %1311 = vmatpush.bf16.msra.mxu1 %v2740_v30  ;;  %v3294_v30 = vld [vmem:[#allocation7_spill] sm:$0xff] }
  0xc3   : > { %1337 = vmatpush.bf16.msra.mxu3 %v2737_v24  ;;  %v3293_v24 = vld [vmem:[#allocation6_spill] sm:$0xff] }
  0xc4   : > { %1324 = vmatpush.bf16.msra.mxu2 %v2735_v22  ;;  %v3292_v22 = vld [vmem:[#allocation5_spill] sm:$0xff] }
  0xc9   : > { %v804_v11 = vpop.f32.mrf.mxu3  ;;  %v2999_v25 = vpop.f32.mrf.mxu0 }
  0xca   : > { %v791_v10 = vpop.f32.mrf.mxu2  ;;  %v3001_v28 = vpop.f32.mrf.mxu1 }
  0xcc   : > { %2323 = vmatmul.msk.bf16.vlgmr.msrb.gmra.mxu0 %vm646_vm0, %v2927_v7 }
  0xcd   : > { %2324 = vmatmul.msk.bf16.vlgmr.msrb.gmra.mxu1 %vm646_vm0, %v2927_v7  ;;  %1349 = vmatpush.bf16.msrb.mxu0 %v2754_v49 }
  0xce   : > { %2326 = vmatmul.msk.bf16.vlgmr.msrb.gmra.mxu3 %vm646_vm0, %v2927_v7  ;;  %1362 = vmatpush.bf16.msrb.mxu1 %v2765_v59 }
  0xcf   : > { %2325 = vmatmul.msk.bf16.vlgmr.msrb.gmra.mxu2 %vm646_vm0, %v2927_v7  ;;  %1388 = vmatpush.bf16.msrb.mxu3 %v2758_v54 }
  0xd0   : > { %1375 = vmatpush.bf16.msrb.mxu2 %v2756_v50  ;;  %v3295_v50 = vld [vmem:[#allocation8_spill] sm:$0xff] }
  0xd1   : > { %v3017_v34 = vpop.f32.mrf.mxu3  ;;  %v817_v43 = vpop.f32.mrf.mxu0  ;;  %1350 = vmatpush.bf16.msrb.mxu0 %v2779_v15 }
  0xd2   : > { %v3014_v29 = vpop.f32.mrf.mxu2  ;;  %v830_v45 = vpop.f32.mrf.mxu1  ;;  %1363 = vmatpush.bf16.msrb.mxu1 %v3291_v60 }
  0xd3   : > { %1389 = vmatpush.bf16.msrb.mxu3 %v3290_v47 }
  0xd4   : > { %1376 = vmatpush.bf16.msrb.mxu2 %v3289_v46 }
  0xd9   : > { %v856_v1 = vpop.f32.mrf.mxu3  ;;  %v3023_v9 = vpop.f32.mrf.mxu0 }
  0xda   : > { %v843_v0 = vpop.f32.mrf.mxu2  ;;  %v3025_v20 = vpop.f32.mrf.mxu1 }
  0xdc   : > { %2327 = vmatmul.msk.bf16.vlgmr.msra.gmra.mxu0 %vm646_vm0, %v2927_v7 }
  0xdd   : > { %2328 = vmatmul.msk.bf16.vlgmr.msra.gmra.mxu1 %vm646_vm0, %v2927_v7  ;;  %1401 = vmatpush.bf16.msra.mxu0 %v3292_v22 }
  0xde   : > { %2330 = vmatmul.msk.bf16.vlgmr.msra.gmra.mxu3 %vm646_vm0, %v2927_v7  ;;  %1414 = vmatpush.bf16.msra.mxu1 %v3295_v50 }
  0xdf   : > { %2329 = vmatmul.msk.bf16.vlgmr.msra.gmra.mxu2 %vm646_vm0, %v2927_v7  ;;  %1440 = vmatpush.bf16.msra.mxu3 %v3294_v30 }
  0xe0   : > { %1427 = vmatpush.bf16.msra.mxu2 %v3293_v24 }
  0xe1   : > { %v3041_v54 = vpop.f32.mrf.mxu3  ;;  %v869_v59 = vpop.f32.mrf.mxu0  ;;  %1402 = vmatpush.bf16.msra.mxu0 %v3296_v56 }
  0xe2   : > { %v3038_v49 = vpop.f32.mrf.mxu2  ;;  %v882_v15 = vpop.f32.mrf.mxu1  ;;  %1415 = vmatpush.bf16.msra.mxu1 %v3299_v36 }
  0xe3   : > { %1441 = vmatpush.bf16.msra.mxu3 %v3298_v2 }
  0xe4   : > { %1428 = vmatpush.bf16.msra.mxu2 %v3297_v58 }
  0xe9   : > { %v908_v42 = vpop.f32.mrf.mxu3  ;;  %v3047_v6 = vpop.f32.mrf.mxu0 }
  0xea   : > { %v895_v37 = vpop.f32.mrf.mxu2  ;;  %v3049_v13 = vpop.f32.mrf.mxu1 }
  0xec   : > { %2331 = vmatmul.msk.bf16.vlgmr.msrb.gmra.mxu0 %vm646_vm0, %v2927_v7 }
  0xed   : > { %2332 = vmatmul.msk.bf16.vlgmr.msrb.gmra.mxu1 %vm646_vm0, %v2927_v7  ;;  %1453 = vmatpush.bf16.msrb.mxu0 %v2850_v33 }
  0xee   : > { %2334 = vmatmul.msk.bf16.vlgmr.msrb.gmra.mxu3 %vm646_vm0, %v2927_v7  ;;  %1466 = vmatpush.bf16.msrb.mxu1 %v2861_v14  ;;  %v2309_v14 = vld [vmem:[%s2515_s22 + $0x188] sm:$0xf] }
  0xef   : > { %2333 = vmatmul.msk.bf16.vlgmr.msrb.gmra.mxu2 %vm646_vm0, %v2927_v7  ;;  %1492 = vmatpush.bf16.msrb.mxu3 %v2854_v41  ;;  %v2310_v40 = vor.u32 %v2412_v26, %v2309_v14 }
  0xf0   : > { %1479 = vmatpush.bf16.msrb.mxu2 %v2852_v35 }
  0xf1   : > { %v3065_v32 = vpop.f32.mrf.mxu3  ;;  %v921_v17 = vpop.f32.mrf.mxu0  ;;  %1454 = vmatpush.bf16.msrb.mxu0 %v2875_v18 }
  0xf2   : > { %v3062_v48 = vpop.f32.mrf.mxu2  ;;  %v934_v21 = vpop.f32.mrf.mxu1  ;;  %1467 = vmatpush.bf16.msrb.mxu1 %v2884_v5 }
  0xf3   : > { %1493 = vmatpush.bf16.msrb.mxu3 %v2881_v55 }
  0xf4   : > { %1480 = vmatpush.bf16.msrb.mxu2 %v2879_v19 }
  0xf9   : > { %v960_v35 = vpop.f32.mrf.mxu3  ;;  %v3071_v41 = vpop.f32.mrf.mxu0 }
  0xfa   : > { %v947_v33 = vpop.f32.mrf.mxu2  ;;  %v3073_v23 = vpop.f32.mrf.mxu1 }
  0xfc   : > { %2335 = vmatmul.msk.bf16.vlgmr.msra.gmra.mxu0 %vm646_vm0, %v2927_v7 }
  0xfd   : > { %2336 = vmatmul.msk.bf16.vlgmr.msra.gmra.mxu1 %vm646_vm0, %v2927_v7  ;;  %1505 = vmatpush.bf16.msra.mxu0 %v2310_v40 }
  0xfe   : > { %2338 = vmatmul.msk.bf16.vlgmr.msra.gmra.mxu3 %vm646_vm0, %v2927_v7 }
  0xff   : > { %2337 = vmatmul.msk.bf16.vlgmr.msra.gmra.mxu2 %vm646_vm0, %v2927_v7 }
 0x101   : > { %v3087_v19 = vpop.f32.mrf.mxu3  ;;  %v973_v55 = vpop.f32.mrf.mxu0  ;;  %1506 = vmatpush.bf16.msra.mxu0 %v2306_v52 }
 0x102   : > { %v3085_v18 = vpop.f32.mrf.mxu2  ;;  %v986_v5 = vpop.f32.mrf.mxu1 }
 0x109   : > { %v1012_v4 = vpop.f32.mrf.mxu3  ;;  %v3091_v10 = vpop.f32.mrf.mxu0 }
 0x10a   : > { %v999_v63 = vpop.f32.mrf.mxu2  ;;  %v3093_v11 = vpop.f32.mrf.mxu1 }
 0x10c   : > { %2339 = vmatmul.msk.bf16.vlgmr.msrb.gmra.mxu0 %vm646_vm0, %v2927_v7 }
 0x10d   : > { %2340 = vmatmul.msk.bf16.vlgmr.msrb.gmra.mxu1 %vm646_vm0, %v2927_v7 }
 0x10e   : > { %2342 = vmatmul.msk.bf16.vlgmr.msrb.gmra.mxu3 %vm646_vm0, %v2927_v7 }
 0x10f   : > { %2341 = vmatmul.msk.bf16.vlgmr.msrb.gmra.mxu2 %vm646_vm0, %v2927_v7 }
 0x111   : > { %v3105_v45 = vpop.f32.mrf.mxu3  ;;  %v1025_v46 = vpop.f32.mrf.mxu0 }
 0x112   : > { %v3103_v43 = vpop.f32.mrf.mxu2  ;;  %v1038_v47 = vpop.f32.mrf.mxu1 }
 0x119   : > { %v1064_v0 = vpop.f32.mrf.mxu3  ;;  %v1092_v1 = vpop.f32.mrf.mxu0 }
 0x11a   : > { %v1051_v60 = vpop.f32.mrf.mxu2  ;;  %v1105_v22 = vpop.f32.mrf.mxu1  ;;  %1545 = vrot.lane.b32.xlu0 %v1092_v1, %s2464_s27 }
 0x11c   : > { %2343 = vmatmul.msk.bf16.vlgmr.msra.gmra.mxu0 %vm646_vm0, %v2927_v7 }
 0x121   : > { %v1131_v30 = vpop.f32.mrf.mxu3  ;;  %v1094_v50 = vpop.f32.mrf.mxu0 }
 0x122   : > { %v1118_v24 = vpop.f32.mrf.mxu2  ;;  %v1107_v59 = vpop.f32.mrf.mxu1  ;;  %1547 = vrot.lane.b32.xlu0 %v1105_v22, %s2464_s27 }
 0x123   : > { %1549 = vrot.lane.b32.xlu1 %v1118_v24, %s2464_s27 }
 0x129   : > { %v1133_v56 = vpop.f32.mrf.mxu3  ;;  %v1144_v58 = vpop.f32.mrf.mxu0 }
 0x12a   : > { %v1120_v15 = vpop.f32.mrf.mxu2  ;;  %v1157_v2 = vpop.f32.mrf.mxu1  ;;  %1553 = vrot.lane.b32.xlu2 %v1144_v58, %s2464_s27 }
 0x12b   : > { %1551 = vrot.lane.b32.xlu1 %v1131_v30, %s2464_s27 }
 0x131   : > { %v1183_v37 = vpop.f32.mrf.mxu3  ;;  %v1146_v7 = vpop.f32.mrf.mxu0 }
 0x132   : > { %v1170_v36 = vpop.f32.mrf.mxu2  ;;  %v1159_v42 = vpop.f32.mrf.mxu1  ;;  %1555 = vrot.lane.b32.xlu2 %v1157_v2, %s2464_s27 }
 0x133   : > { %1557 = vrot.lane.b32.xlu0 %v1170_v36, %s2464_s27  ;;  %1559 = vrot.lane.b32.xlu1 %v1183_v37, %s2464_s27 }
 0x139   : > { %v1185_v21 = vpop.f32.mrf.mxu3  ;;  %v1196_v33 = vpop.f32.mrf.mxu0 }
 0x13a   : > { %v1172_v17 = vpop.f32.mrf.mxu2  ;;  %v1209_v35 = vpop.f32.mrf.mxu1  ;;  %1561 = vrot.lane.b32.xlu2 %v1196_v33, %s2464_s27 }
 0x13b   : > { %1563 = vrot.lane.b32.xlu0 %v1209_v35, %s2464_s27 }
 0x141   : > { %v1235_v26 = vpop.f32.mrf.mxu3  ;;  %v1198_v40 = vpop.f32.mrf.mxu0 }
 0x142   : > { %v1222_v14 = vpop.f32.mrf.mxu2  ;;  %v1211_v55 = vpop.f32.mrf.mxu1  ;;  %1567 = vrot.lane.b32.xlu2 %v1235_v26, %s2464_s27 }
 0x143   : > { %1565 = vrot.lane.b32.xlu1 %v1222_v14, %s2464_s27 }
 0x149   : > { %v1237_v44 = vpop.f32.mrf.mxu3  ;;  %v1248_v51 = vpop.f32.mrf.mxu0 }
 0x14a   : > { %v1224_v5 = vpop.f32.mrf.mxu2  ;;  %v1261_v52 = vpop.f32.mrf.mxu1  ;;  %1569 = vrot.lane.b32.xlu0 %v1248_v51, %s2464_s27 }
 0x14b   : > { %1571 = vrot.lane.b32.xlu1 %v1261_v52, %s2464_s27 }
 0x151   : > { %v1287_v4 = vpop.f32.mrf.mxu3  ;;  %v1250_v46 = vpop.f32.mrf.mxu0 }
 0x152   : > { %v1274_v63 = vpop.f32.mrf.mxu2  ;;  %v1263_v47 = vpop.f32.mrf.mxu1  ;;  %1575 = vrot.lane.b32.xlu0 %v1287_v4, %s2464_s27 }
 0x153   : > { %1573 = vrot.lane.b32.xlu2 %v1274_v63, %s2464_s27 }
 0x159   : > { %v1289_v0 = vpop.f32.mrf.mxu3  ;;  %v1300_v1 = vpop.f32.mrf.mxu0 }
 0x15a   : > { %v1276_v60 = vpop.f32.mrf.mxu2  ;;  %v1313_v22 = vpop.f32.mrf.mxu1  ;;  %1577 = vrot.lane.b32.xlu1 %v1300_v1, %s2464_s27 }
 0x15b   : > { %1579 = vrot.lane.b32.xlu2 %v1313_v22, %s2464_s27 }
 0x161   : > { %v1339_v30 = vpop.f32.mrf.mxu3  ;;  %v1302_v50 = vpop.f32.mrf.mxu0 }
 0x162   : > { %v1326_v24 = vpop.f32.mrf.mxu2  ;;  %v1315_v59 = vpop.f32.mrf.mxu1  ;;  %1583 = vrot.lane.b32.xlu1 %v1339_v30, %s2464_s27 }
 0x163   : > { %1581 = vrot.lane.b32.xlu0 %v1326_v24, %s2464_s27 }
 0x169   : > { %v1341_v56 = vpop.f32.mrf.mxu3  ;;  %v1352_v58 = vpop.f32.mrf.mxu0 }
 0x16a   : > { %v1328_v15 = vpop.f32.mrf.mxu2  ;;  %v1365_v2 = vpop.f32.mrf.mxu1  ;;  %1585 = vrot.lane.b32.xlu2 %v1352_v58, %s2464_s27 }
 0x16b   : > { %1587 = vrot.lane.b32.xlu0 %v1365_v2, %s2464_s27 }
 0x171   : > { %v1391_v37 = vpop.f32.mrf.mxu3  ;;  %v1354_v7 = vpop.f32.mrf.mxu0 }
 0x172   : > { %v1378_v36 = vpop.f32.mrf.mxu2  ;;  %v1367_v42 = vpop.f32.mrf.mxu1  ;;  %1591 = vrot.lane.b32.xlu2 %v1391_v37, %s2464_s27 }
 0x173   : > { %1589 = vrot.lane.b32.xlu1 %v1378_v36, %s2464_s27 }
 0x179   : > { %v1393_v21 = vpop.f32.mrf.mxu3  ;;  %v1404_v33 = vpop.f32.mrf.mxu0 }
 0x17a   : > { %v1380_v17 = vpop.f32.mrf.mxu2  ;;  %v1417_v35 = vpop.f32.mrf.mxu1  ;;  %1593 = vrot.lane.b32.xlu0 %v1404_v33, %s2464_s27 }
 0x17b   : > { %1595 = vrot.lane.b32.xlu1 %v1417_v35, %s2464_s27 }
 0x181   : > { %v1443_v26 = vpop.f32.mrf.mxu3  ;;  %v1406_v40 = vpop.f32.mrf.mxu0 }
 0x182   : > { %v1430_v14 = vpop.f32.mrf.mxu2  ;;  %v1419_v55 = vpop.f32.mrf.mxu1  ;;  %1599 = vrot.lane.b32.xlu0 %v1443_v26, %s2464_s27 }
 0x183   : > { %1597 = vrot.lane.b32.xlu2 %v1430_v14, %s2464_s27 }
 0x184   : > { %v1554_v4 = vpop.permute.xlu2 %1553 }
 0x189   : > { %v1445_v44 = vpop.f32.mrf.mxu3  ;;  %v1456_v51 = vpop.f32.mrf.mxu0 }
 0x18a   : > { %v1432_v5 = vpop.f32.mrf.mxu2  ;;  %1601 = vrot.lane.b32.xlu1 %v1456_v51, %s2464_s27  ;;  %v1469_v52 = vpop.f32.mrf.mxu1 }
 0x18b   : > { %1603 = vrot.lane.b32.xlu2 %v1469_v52, %s2464_s27 }
 0x18c   : > { %v1546_v63 = vpop.permute.xlu0 %1545  ;;  %v1556_v36 = vpop.permute.xlu2 %1555 }
 0x18d   : > { %v1616_v33 = vsel %vm1611_vm1, %v1554_v4, %v1556_v36 }
 0x18e   : > { %v1680_v55 = vadd.f32 %v1616_v33, %v2951_v27 }
 0x191   : > { %v1495_v47 = vpop.f32.mrf.mxu3  ;;  %v1458_v60 = vpop.f32.mrf.mxu0 }
 0x192   : > { %v1482_v46 = vpop.f32.mrf.mxu2  ;;  %1607 = vrot.lane.b32.xlu1 %v1495_v47, %s2464_s27  ;;  %v1471_v0 = vpop.f32.mrf.mxu1 }
 0x193   : > { %1605 = vrot.lane.b32.xlu0 %v1482_v46, %s2464_s27 }
 0x194   : > { %v1548_v22 = vpop.permute.xlu0 %1547  ;;  %v1562_v14 = vpop.permute.xlu2 %1561 }
 0x195   : > { %v1550_v1 = vpop.permute.xlu1 %1549  ;;  %v1612_v24 = vsel %vm1611_vm1, %v1546_v63, %v1548_v22 }
 0x196   : > { %v1613_v30 = vsel %vm1611_vm1, %v1548_v22, %v1550_v1  ;;  %v1676_v50 = vadd.f32 %v1612_v24, %v2922_v3 }
 0x197   : > { %v1677_v59 = vadd.f32 %v1613_v30, %v2929_v8 }
 0x199   : > { %v1708_v15 = vpack.c.bf16 %v1677_v59, %v1676_v50  ;;  %v1497_v58 = vpop.f32.mrf.mxu3  ;;  %v1508_v2 = vpop.f32.mrf.mxu0  ;;  %v1786_v46 = vmul.f32 %v1677_v59, %v1677_v59  ;;  %v1748_v0 = vadd.f32 %v1677_v59, %v1676_v50 }
 0x19a   : > { %v1484_v56 = vpop.f32.mrf.mxu2  ;;  %1609 = vrot.lane.b32.xlu2 %v1508_v2, %s2464_s27 }
 0x19b   : > { %1724 = vst [vmem:[%s3149_s5] sm:$0xff] %v1708_v15 }
 0x19d   : > { %v1552_v37 = vpop.permute.xlu1 %1551 }
 0x19e   : > { %v1614_v3 = vsel %vm1611_vm1, %v1550_v1, %v1552_v37  ;;  %v1615_v8 = vsel %vm1611_vm1, %v1552_v37, %v1554_v4  ;;  %v1785_v4 = vmul.f32 %v1676_v50, %v1676_v50  ;;  %v1789_v37 = vmul.f32 %v1680_v55, %v1680_v55 }
 0x19f   : > { %v1678_v7 = vadd.f32 %v1614_v3, %v2942_v12  ;;  %v1679_v42 = vadd.f32 %v1615_v8, %v2945_v16 }
 0x1a0   : > { %v1817_v27 = vadd.f32 %v1786_v46, %v1785_v4 }
 0x1a1   : > { %v1709_v17 = vpack.c.bf16 %v1679_v42, %v1678_v7  ;;  %v1510_v21 = vpop.f32.mrf.mxu0  ;;  %v1787_v47 = vmul.f32 %v1678_v7, %v1678_v7  ;;  %v1749_v22 = vadd.f32 %v1748_v0, %v1678_v7  ;;  %v1788_v30 = vmul.f32 %v1679_v42, %v1679_v42 }
 0x1a3   : > { %1725 = vst [vmem:[%s3149_s5 + $0x8] sm:$0xff] %v1709_v17  ;;  %v1818_v24 = vadd.f32 %v1817_v27, %v1787_v47  ;;  %v1750_v58 = vadd.f32 %v1749_v22, %v1679_v42 }
 0x1a5   : > { %v1558_v35 = vpop.permute.xlu0 %1557  ;;  %v1560_v26 = vpop.permute.xlu1 %1559  ;;  %v1819_v2 = vadd.f32 %v1818_v24, %v1788_v30  ;;  %v1751_v59 = vadd.f32 %v1750_v58, %v1680_v55 }
 0x1a6   : > { %v1617_v40 = vsel %vm1611_vm1, %v1556_v36, %v1558_v35  ;;  %v1619_v5 = vsel %vm1611_vm1, %v1560_v26, %v1562_v14  ;;  %v1618_v12 = vsel %vm1611_vm1, %v1558_v35, %v1560_v26 }
 0x1a7   : > { %v1681_v16 = vadd.f32 %v1617_v40, %v2953_v31  ;;  %v1683_v44 = vadd.f32 %v1619_v5, %v2969_v39  ;;  %v1682_v51 = vadd.f32 %v1618_v12, %v2966_v38  ;;  %v1568_v38 = vpop.permute.xlu2 %1567  ;;  %v1820_v3 = vadd.f32 %v1819_v2, %v1789_v37 }
 0x1a9   : > { %v1710_v52 = vpack.c.bf16 %v1681_v16, %v1680_v55  ;;  %v1711_v63 = vpack.c.bf16 %v1683_v44, %v1682_v51  ;;  %v1790_v50 = vmul.f32 %v1681_v16, %v1681_v16  ;;  %v1752_v17 = vadd.f32 %v1751_v59, %v1681_v16 }
 0x1aa   : > { %v1791_v5 = vmul.f32 %v1682_v51, %v1682_v51  ;;  %v1792_v4 = vmul.f32 %v1683_v44, %v1683_v44 }
 0x1ab   : > { %1726 = vst [vmem:[%s3149_s5 + $0x10] sm:$0xff] %v1710_v52  ;;  %v1821_v21 = vadd.f32 %v1820_v3, %v1790_v50  ;;  %v1753_v52 = vadd.f32 %v1752_v17, %v1682_v51 }
 0x1ac   : > { %1727 = vst [vmem:[%s3149_s5 + $0x18] sm:$0xff] %v1711_v63 }
 0x1ad   : > { %v1564_v60 = vpop.permute.xlu0 %1563  ;;  %v1822_v63 = vadd.f32 %v1821_v21, %v1791_v5 }
 0x1ae   : > { %v1620_v1 = vsel %vm1611_vm1, %v1562_v14, %v1564_v60 }
 0x1af   : > { %v1684_v15 = vadd.f32 %v1620_v1, %v2975_v53  ;;  %v1574_v33 = vpop.permute.xlu2 %1573  ;;  %v1823_v47 = vadd.f32 %v1822_v63, %v1792_v4 }
 0x1b1   : > { %v1793_v46 = vmul.f32 %v1684_v15, %v1684_v15 }
 0x1b3   : > { %v1824_v0 = vadd.f32 %v1823_v47, %v1793_v46 }
 0x1b5   : > { %v1566_v31 = vpop.permute.xlu1 %1565 }
 0x1b6   : > { %v1621_v39 = vsel %vm1611_vm1, %v1564_v60, %v1566_v31  ;;  %v1622_v8 = vsel %vm1611_vm1, %v1566_v31, %v1568_v38 }
 0x1b7   : > { %v1685_v56 = vadd.f32 %v1621_v39, %v2977_v57  ;;  %v1686_v57 = vadd.f32 %v1622_v8, %v2990_v61  ;;  %v1754_v61 = vadd.f32 %v1753_v52, %v1683_v44 }
 0x1b9   : > { %v1712_v36 = vpack.c.bf16 %v1685_v56, %v1684_v15  ;;  %v1755_v60 = vadd.f32 %v1754_v61, %v1684_v15  ;;  %v1795_v24 = vmul.f32 %v1686_v57, %v1686_v57 }
 0x1bb   : > { %1728 = vst [vmem:[%s3149_s5 + $0x20] sm:$0xff] %v1712_v36  ;;  %v1756_v1 = vadd.f32 %v1755_v60, %v1685_v56 }
 0x1bc   : > { %v1570_v7 = vpop.permute.xlu0 %1569 }
 0x1bd   : > { %v1623_v53 = vsel %vm1611_vm1, %v1568_v38, %v1570_v7  ;;  %v1572_v35 = vpop.permute.xlu1 %1571  ;;  %v1757_v30 = vadd.f32 %v1756_v1, %v1686_v57 }
 0x1be   : > { %v1687_v42 = vadd.f32 %v1623_v53, %v2993_v62  ;;  %v1624_v14 = vsel %vm1611_vm1, %v1570_v7, %v1572_v35  ;;  %v1625_v26 = vsel %vm1611_vm1, %v1572_v35, %v1574_v33  ;;  %v1794_v62 = vmul.f32 %v1685_v56, %v1685_v56 }
 0x1bf   : > { %v1688_v40 = vadd.f32 %v1624_v14, %v2999_v25  ;;  %v1689_v55 = vadd.f32 %v1625_v26, %v3001_v28  ;;  %v1580_v25 = vpop.permute.xlu2 %1579 }
 0x1c0   : > { %v1713_v12 = vpack.c.bf16 %v1687_v42, %v1686_v57  ;;  %v1825_v22 = vadd.f32 %v1824_v0, %v1794_v62  ;;  %v1796_v31 = vmul.f32 %v1687_v42, %v1687_v42  ;;  %v1758_v15 = vadd.f32 %v1757_v30, %v1687_v42 }
 0x1c1   : > { %v1714_v16 = vpack.c.bf16 %v1689_v55, %v1688_v40  ;;  %v1797_v56 = vmul.f32 %v1688_v40, %v1688_v40  ;;  %v1798_v57 = vmul.f32 %v1689_v55, %v1689_v55 }
 0x1c2   : > { %1729 = vst [vmem:[%s3149_s5 + $0x28] sm:$0xff] %v1713_v12  ;;  %v1826_v38 = vadd.f32 %v1825_v22, %v1795_v24  ;;  %v1759_v59 = vadd.f32 %v1758_v15, %v1688_v40 }
 0x1c3   : > { %1730 = vst [vmem:[%s3149_s5 + $0x30] sm:$0xff] %v1714_v16 }
 0x1c4   : > { %v1576_v27 = vpop.permute.xlu0 %1575  ;;  %v1827_v2 = vadd.f32 %v1826_v38, %v1796_v31  ;;  %v1760_v26 = vadd.f32 %v1759_v59, %v1689_v55 }
 0x1c5   : > { %v1626_v28 = vsel %vm1611_vm1, %v1574_v33, %v1576_v27 }
 0x1c6   : > { %v1690_v44 = vadd.f32 %v1626_v28, %v3014_v29  ;;  %v1828_v3 = vadd.f32 %v1827_v2, %v1797_v56 }
 0x1c7   : > { %v1586_v8 = vpop.permute.xlu2 %1585 }
 0x1c8   : > { %v1799_v42 = vmul.f32 %v1690_v44, %v1690_v44  ;;  %v1829_v5 = vadd.f32 %v1828_v3, %v1798_v57  ;;  %v1761_v16 = vadd.f32 %v1760_v26, %v1690_v44 }
 0x1cc   : > { %v1578_v51 = vpop.permute.xlu1 %1577 }
 0x1cd   : > { %v1627_v39 = vsel %vm1611_vm1, %v1576_v27, %v1578_v51  ;;  %v1628_v37 = vsel %vm1611_vm1, %v1578_v51, %v1580_v25 }
 0x1ce   : > { %v1691_v58 = vadd.f32 %v1627_v39, %v3017_v34  ;;  %v1692_v29 = vadd.f32 %v1628_v37, %v3023_v9  ;;  %v1830_v9 = vadd.f32 %v1829_v5, %v1799_v42 }
 0x1cf   : > { %v1592_v27 = vpop.permute.xlu2 %1591 }
 0x1d0   : > { %v1715_v36 = vpack.c.bf16 %v1691_v58, %v1690_v44  ;;  %v1800_v12 = vmul.f32 %v1691_v58, %v1691_v58  ;;  %v1801_v63 = vmul.f32 %v1692_v29, %v1692_v29 }
 0x1d2   : > { %1731 = vst [vmem:[%s3149_s5 + $0x38] sm:$0xff] %v1715_v36  ;;  %v1831_v52 = vadd.f32 %v1830_v9, %v1800_v12 }
 0x1d4   : > { %v1584_v17 = vpop.permute.xlu1 %1583 }
 0x1d5   : > { %v1582_v50 = vpop.permute.xlu0 %1581  ;;  %v1631_v33 = vsel %vm1611_vm1, %v1584_v17, %v1586_v8 }
 0x1d6   : > { %v1629_v7 = vsel %vm1611_vm1, %v1580_v25, %v1582_v50  ;;  %v1630_v21 = vsel %vm1611_vm1, %v1582_v50, %v1584_v17  ;;  %v1695_v35 = vadd.f32 %v1631_v33, %v3041_v54  ;;  %v2465_v17 = vmov 0.0  }
 0x1d7   : > { %v1693_v34 = vadd.f32 %v1629_v7, %v3025_v20  ;;  %v1694_v53 = vadd.f32 %v1630_v21, %v3038_v49  ;;  %v1762_v20 = vadd.f32 %v1761_v16, %v1691_v58  ;;  %v1832_v49 = vadd.f32 %v1831_v52, %v1801_v63  ;;  %1745 = vst.msk [vmem:[%s3212_s9] sm:$0xff] %vm1744_vm2, %v2465_v17 }
 0x1d8   : > { %v1804_v31 = vmul.f32 %v1695_v35, %v1695_v35  ;;  %1746 = vst.msk [vmem:[%s3230_s12] sm:$0xff] %vm1744_vm2, %v2465_v17 }
 0x1d9   : > { %v1716_v14 = vpack.c.bf16 %v1693_v34, %v1692_v29  ;;  %v1717_v40 = vpack.c.bf16 %v1695_v35, %v1694_v53  ;;  %v1802_v4 = vmul.f32 %v1693_v34, %v1693_v34  ;;  %v1763_v61 = vadd.f32 %v1762_v20, %v1692_v29 }
 0x1da   : > { %v1803_v62 = vmul.f32 %v1694_v53, %v1694_v53 }
 0x1db   : > { %1732 = vst [vmem:[%s3149_s5 + $0x40] sm:$0xff] %v1716_v14  ;;  %v1764_v54 = vadd.f32 %v1763_v61, %v1693_v34  ;;  %v1833_v55 = vadd.f32 %v1832_v49, %v1802_v4 }
 0x1dc   : > { %1733 = vst [vmem:[%s3149_s5 + $0x48] sm:$0xff] %v1717_v40 }
 0x1dd   : > { %v1588_v46 = vpop.permute.xlu0 %1587  ;;  %v1765_v25 = vadd.f32 %v1764_v54, %v1694_v53  ;;  %v1834_v28 = vadd.f32 %v1833_v55, %v1803_v62  ;;  %v1598_v15 = vpop.permute.xlu2 %1597 }
 0x1de   : > { %v1632_v47 = vsel %vm1611_vm1, %v1586_v8, %v1588_v46 }
 0x1df   : > { %v1696_v1 = vadd.f32 %v1632_v47, %v3047_v6  ;;  %v1766_v39 = vadd.f32 %v1765_v25, %v1695_v35  ;;  %v1835_v38 = vadd.f32 %v1834_v28, %v1804_v31 }
 0x1e1   : > { %v1805_v51 = vmul.f32 %v1696_v1, %v1696_v1  ;;  %v1767_v44 = vadd.f32 %v1766_v39, %v1696_v1 }
 0x1e3   : > { %v1836_v2 = vadd.f32 %v1835_v38, %v1805_v51 }
 0x1e5   : > { %v1590_v60 = vpop.permute.xlu1 %1589 }
 0x1e6   : > { %v1633_v0 = vsel %vm1611_vm1, %v1588_v46, %v1590_v60  ;;  %v1634_v30 = vsel %vm1611_vm1, %v1590_v60, %v1592_v27 }
 0x1e7   : > { %v1697_v22 = vadd.f32 %v1633_v0, %v3049_v13  ;;  %v1698_v6 = vadd.f32 %v1634_v30, %v3062_v48 }
 0x1e9   : > { %v1718_v24 = vpack.c.bf16 %v1697_v22, %v1696_v1  ;;  %v1806_v36 = vmul.f32 %v1697_v22, %v1697_v22  ;;  %v1768_v37 = vadd.f32 %v1767_v44, %v1697_v22  ;;  %v1807_v33 = vmul.f32 %v1698_v6, %v1698_v6 }
 0x1eb   : > { %1734 = vst [vmem:[%s3149_s5 + $0x50] sm:$0xff] %v1718_v24  ;;  %v1837_v29 = vadd.f32 %v1836_v2, %v1806_v36  ;;  %v1769_v21 = vadd.f32 %v1768_v37, %v1698_v6 }
 0x1ec   : > { %v1594_v58 = vpop.permute.xlu0 %1593 }
 0x1ed   : > { %v1635_v13 = vsel %vm1611_vm1, %v1592_v27, %v1594_v58  ;;  %v1596_v56 = vpop.permute.xlu1 %1595  ;;  %v1838_v35 = vadd.f32 %v1837_v29, %v1807_v33 }
 0x1ee   : > { %v1699_v50 = vadd.f32 %v1635_v13, %v3065_v32  ;;  %v1636_v59 = vsel %vm1611_vm1, %v1594_v58, %v1596_v56  ;;  %v1637_v48 = vsel %vm1611_vm1, %v1596_v56, %v1598_v15  ;;  %v1784_v56 = vld [vmem:[%s3230_s12] sm:$0xff] }
 0x1ef   : > { %v1700_v3 = vadd.f32 %v1636_v59, %v3071_v41  ;;  %v1701_v8 = vadd.f32 %v1637_v48, %v3073_v23  ;;  %v1604_v23 = vpop.permute.xlu2 %1603 }
 0x1f0   : > { %v1719_v7 = vpack.c.bf16 %v1699_v50, %v1698_v6  ;;  %v1808_v32 = vmul.f32 %v1699_v50, %v1699_v50  ;;  %v1770_v57 = vadd.f32 %v1769_v21, %v1699_v50 }
 0x1f1   : > { %v1720_v34 = vpack.c.bf16 %v1701_v8, %v1700_v3  ;;  %v1809_v26 = vmul.f32 %v1700_v3, %v1700_v3  ;;  %v1810_v12 = vmul.f32 %v1701_v8, %v1701_v8 }
 0x1f2   : > { %1735 = vst [vmem:[%s3149_s5 + $0x58] sm:$0xff] %v1719_v7  ;;  %v1839_v42 = vadd.f32 %v1838_v35, %v1808_v32  ;;  %v1771_v14 = vadd.f32 %v1770_v57, %v1700_v3 }
 0x1f3   : > { %1736 = vst [vmem:[%s3149_s5 + $0x60] sm:$0xff] %v1720_v34 }
 0x1f4   : > { %v1600_v53 = vpop.permute.xlu0 %1599  ;;  %v1840_v5 = vadd.f32 %v1839_v42, %v1809_v26  ;;  %v1772_v9 = vadd.f32 %v1771_v14, %v1701_v8 }
 0x1f5   : > { %v1638_v41 = vsel %vm1611_vm1, %v1598_v15, %v1600_v53 }
 0x1f6   : > { %v1702_v40 = vadd.f32 %v1638_v41, %v3085_v18  ;;  %v1841_v4 = vadd.f32 %v1840_v5, %v1810_v12 }
 0x1f7   : > { %v1610_v62 = vpop.permute.xlu2 %1609 }
 0x1f8   : > { %v1811_v20 = vmul.f32 %v1702_v40, %v1702_v40  ;;  %v1773_v46 = vadd.f32 %v1772_v9, %v1702_v40 }
 0x1fa   : > { %v1842_v47 = vadd.f32 %v1841_v4, %v1811_v20 }
 0x1fc   : > { %v1602_v16 = vpop.permute.xlu1 %1601 }
 0x1fd   : > { %v1639_v52 = vsel %vm1611_vm1, %v1600_v53, %v1602_v16  ;;  %v1640_v63 = vsel %vm1611_vm1, %v1602_v16, %v1604_v23 }
 0x1fe   : > { %v1703_v18 = vadd.f32 %v1639_v52, %v3087_v19  ;;  %v1704_v54 = vadd.f32 %v1640_v63, %v3091_v10 }
 0x200   : > { %v1721_v61 = vpack.c.bf16 %v1703_v18, %v1702_v40  ;;  %v1812_v49 = vmul.f32 %v1703_v18, %v1703_v18  ;;  %v1774_v55 = vadd.f32 %v1773_v46, %v1703_v18  ;;  %v1813_v27 = vmul.f32 %v1704_v54, %v1704_v54 }
 0x202   : > { %1737 = vst [vmem:[%s3149_s5 + $0x68] sm:$0xff] %v1721_v61  ;;  %v1843_v60 = vadd.f32 %v1842_v47, %v1812_v49  ;;  %v1775_v25 = vadd.f32 %v1774_v55, %v1704_v54 }
 0x204   : > { %v1608_v22 = vpop.permute.xlu1 %1607  ;;  %v1844_v38 = vadd.f32 %v1843_v60, %v1813_v27 }
 0x205   : > { %v1606_v0 = vpop.permute.xlu0 %1605  ;;  %v1643_v24 = vsel %vm1611_vm1, %v1608_v22, %v1610_v62 }
 0x206   : > { %v1641_v1 = vsel %vm1611_vm1, %v1604_v23, %v1606_v0  ;;  %v1642_v28 = vsel %vm1611_vm1, %v1606_v0, %v1608_v22  ;;  %v1707_v31 = vadd.f32 %v1643_v24, %v3105_v45  ;;  %v1747_v45 = vld [vmem:[%s3212_s9] sm:$0xff] }
 0x207   : > { %v1705_v19 = vadd.f32 %v1641_v1, %v3093_v11  ;;  %v1706_v10 = vadd.f32 %v1642_v28, %v3103_v43 }
 0x208   : > { %v1816_v6 = vmul.f32 %v1707_v31, %v1707_v31 }
 0x209   : > { %v1722_v51 = vpack.c.bf16 %v1705_v19, %v1704_v54  ;;  %v1814_v39 = vmul.f32 %v1705_v19, %v1705_v19  ;;  %v1776_v30 = vadd.f32 %v1775_v25, %v1705_v19  ;;  %v1723_v44 = vpack.c.bf16 %v1707_v31, %v1706_v10 }
 0x20a   : > { %v1815_v58 = vmul.f32 %v1706_v10, %v1706_v10 }
 0x20b   : > { %1738 = vst [vmem:[%s3149_s5 + $0x70] sm:$0xff] %v1722_v51  ;;  %v1777_v15 = vadd.f32 %v1776_v30, %v1706_v10  ;;  %v1845_v11 = vadd.f32 %v1844_v38, %v1814_v39 }
 0x20c   : > { %1739 = vst [vmem:[%s3149_s5 + $0x78] sm:$0xff] %v1723_v44 }
 0x20d   : > { %v1778_v2 = vadd.f32 %v1777_v15, %v1707_v31  ;;  %v1846_v36 = vadd.f32 %v1845_v11, %v1815_v58 }
 0x20f   : > { %1779 = vadd.xlane.f32.xlu0 %v1778_v2  ;;  %v1847_v43 = vadd.f32 %v1846_v36, %v1816_v6 }
 0x211   : > { %1848 = vadd.xlane.f32.xlu1 %v1847_v43 }
 0x282   : > { %v1780_v13 = vpop.xlane.xlu0 %1779 }
 0x283   : > { %v1781_v37 = vadd.f32 %v1780_v13, %v1747_v45 }
 0x284   : > { %v1849_v50 = vpop.xlane.xlu1 %1848 }
 0x285   : > { %1783 = vst.msk [vmem:[%s3212_s9] sm:$0xff] %vm1744_vm2, %v1781_v37  ;;  %v1850_v59 = vadd.f32 %v1849_v50, %v1784_v56 }
 0x287   : > { %1851 = vst.msk [vmem:[%s3230_s12] sm:$0xff] %vm1744_vm2, %v1850_v59 }
 0x288 PF: > { %s15_s17 = sadd.s32 1, %s2462_s17   ;;  %s3300_s15 = smov %s2458_s16 }
 0x289   : > { %p12_p5 = scmp.ge.s32.totalorder %s15_s17, 4   ;;  %s3301_s16 = smov %s3303_s18 }
 0x28b   :  { %14 = sbr.rel (!%p12_p5) target bundleno = 2 (0x2), region = 87 }

// kernel: forward.7
= control target key start
LH: loop header
LB: loop body
LE: loop exit
PB: predicated region body
PF: predicated region fallthrough
CT: control target
= control target key end

     0   :  { %s1398_s15 = smov 0   ;;  %s1400_s16 = smov 0   ;;  %s1769_s0 = inlined_call_operand.vmem [shape: bf16[2,1,64,1056], index: 0, kind: input, shape index: {}]   ;;  %s1770_s1 = inlined_call_operand.vmem [shape: bf16[2,16,64], index: 1, kind: input, shape index: {}]   ;;  %s1771_s2 = inlined_call_operand.vmem [shape: bf16[2,16,1024], index: 2, kind: output, shape index: {0}]   ;;  %s1772_s3 = inlined_call_operand.vmem [shape: f32[2,16,1], index: 3, kind: output, shape index: {1}]   ;;  %s1773_s4 = inlined_call_operand.vmem [shape: f32[2,16,1], index: 4, kind: output, shape index: {2}]  }
   0x1   :  { %s1402_s17 = smov 0  }
   0x2 LB: > { %s27_s18 = sadd.s32 1, %s1365_s16  ;;  %p1098_p0 = scmp.ge.s32.totalorder %s1369_s17, 1  ;;  %s1369_s17 = sphi %s1402_s17, %s15_s17   ;;  %s1365_s16 = sphi %s1400_s16, %s1775_s16   ;;  %s1361_s15 = sphi %s1398_s15, %s1774_s15  }
   0x3   : > { %p29_p1 = scmp.ge.s32.totalorder %s27_s18, 2  ;;  %p187_p2 = scmp.lt.s32.totalorder %s1369_s17, 3 }
   0x5   : > { %s1777_s18 = smov (%p29_p1, %s27_s18), 0  ;;  %p188_p3 = pnand %p1098_p0, %p187_p2 }
   0x6   : > { %p231_p4 = scmp.lt.s32.totalorder (!%p188_p3), %s1361_s15, 1  ;;  %s1371_s27 = smov (!%p188_p3), 96  }
   0x7   : > { %191 = sbr.rel (%p188_p3) target bundleno = 488 (0x1e8), region = 28 }
   0xc   : > { %s1779_s15 = smov (!%p231_p4, %s1361_s15), 1  ;;  %v1502_v49 = vld [vmem:[%s1770_s1] sm:$0xff]  ;;  %vm468_vm0 = vcmask 523264   ;;  %vm799_vm1 = vcmask 785408   ;;  %vm868_vm2 = vcmask 7168  }
   0xd   : > { %s1320_s19 = smul.u32 288, %s1779_s15  ;;  %s1279_s28 = sshll.u32 %s1779_s15, 6 }
   0xe   : > { %s1687_s5 = scalar_lea.vmem %s1771_s2, %s1279_s28  ;;  %s1280_s6 = sshll.u32 %s1779_s15, 4 }
   0xf   : > { %s1422_s22 = scalar_lea.vmem %s1769_s0, %s1320_s19  ;;  %s1707_s9 = scalar_lea.vmem %s1772_s3, %s1280_s6 }
  0x10   : > { %v1208_v0 = vld [vmem:[%s1422_s22 + $0xd8] sm:$0xf]  ;;  %v1313_v1 = vld [vmem:[%s1422_s22 + $0xf8] sm:$0xf0]  ;;  %v1210_v4 = vld [vmem:[%s1422_s22 + $0xfc] sm:$0xf0]  ;;  %s1723_s12 = scalar_lea.vmem %s1773_s4, %s1280_s6 }
  0x11   : > { %v1309_v2 = vld [vmem:[%s1422_s22 + $0xdc] sm:$0xf]  ;;  %v1427_v3 = vor.u32 %v1313_v1, %v1208_v0  ;;  %v1216_v5 = vld [vmem:[%s1422_s22 + $0xe0] sm:$0xf]  ;;  %v1314_v6 = vld [vmem:[%s1422_s22 + $0x100] sm:$0xf0] }
  0x12   : > { %v1432_v7 = vor.u32 %v1309_v2, %v1210_v4  ;;  %v1434_v8 = vor.u32 %v1314_v6, %v1216_v5  ;;  %v1310_v9 = vld [vmem:[%s1422_s22 + $0xe4] sm:$0xf]  ;;  %v1218_v10 = vld [vmem:[%s1422_s22 + $0x104] sm:$0xf0]  ;;  %v1176_v11 = vld [vmem:[%s1422_s22 + $0x90] sm:$0xf] }
  0x13   : > { %476 = vmatpush.bf16.msra.mxu0 %v1427_v3  ;;  %v1440_v12 = vor.u32 %v1310_v9, %v1218_v10  ;;  %v1304_v13 = vld [vmem:[%s1422_s22 + $0xb0] sm:$0xf0]  ;;  %v1178_v15 = vld [vmem:[%s1422_s22 + $0xb4] sm:$0xf0]  ;;  %v1305_v19 = vld [vmem:[%s1422_s22 + $0xb8] sm:$0xf0] }
  0x14   : > { %v1300_v14 = vld [vmem:[%s1422_s22 + $0x94] sm:$0xf]  ;;  %490 = vmatpush.bf16.msra.mxu1 %v1432_v7  ;;  %504 = vmatpush.bf16.msra.mxu2 %v1434_v8  ;;  %v1447_v16 = vor.u32 %v1304_v13, %v1176_v11  ;;  %v1184_v18 = vld [vmem:[%s1422_s22 + $0x98] sm:$0xf]  ;;  %v1301_v20 = vld [vmem:[%s1422_s22 + $0x9c] sm:$0xf] }
  0x15   : > { %v1449_v17 = vor.u32 %v1300_v14, %v1178_v15  ;;  %518 = vmatpush.bf16.msra.mxu3 %v1440_v12  ;;  %v1455_v21 = vor.u32 %v1305_v19, %v1184_v18  ;;  %v1186_v22 = vld [vmem:[%s1422_s22 + $0xbc] sm:$0xf0]  ;;  %v1144_v23 = vld [vmem:[%s1422_s22 + $0x48] sm:$0xf]  ;;  %v1295_v24 = vld [vmem:[%s1422_s22 + $0x68] sm:$0xf0] }
  0x16   : > { %v1460_v25 = vor.u32 %v1301_v20, %v1186_v22  ;;  %v1291_v26 = vld [vmem:[%s1422_s22 + $0x4c] sm:$0xf]  ;;  %v1146_v27 = vld [vmem:[%s1422_s22 + $0x6c] sm:$0xf0]  ;;  %v1466_v29 = vor.u32 %v1295_v24, %v1144_v23  ;;  %v1296_v30 = vld [vmem:[%s1422_s22 + $0x70] sm:$0xf0] }
  0x17   : > { %v1152_v28 = vld [vmem:[%s1422_s22 + $0x50] sm:$0xf]  ;;  %477 = vmatpush.bf16.msra.mxu0 %v1447_v16  ;;  %v1292_v31 = vld [vmem:[%s1422_s22 + $0x54] sm:$0xf]  ;;  %v1154_v32 = vld [vmem:[%s1422_s22 + $0x74] sm:$0xf0]  ;;  %v1473_v33 = vor.u32 %v1291_v26, %v1146_v27 }
  0x18   : > { %491 = vmatpush.bf16.msra.mxu1 %v1449_v17  ;;  %505 = vmatpush.bf16.msra.mxu2 %v1455_v21  ;;  %v1475_v34 = vor.u32 %v1296_v30, %v1152_v28  ;;  %v1112_v35 = vld [vmem:[%s1422_s22] sm:$0xf]  ;;  %v1286_v36 = vld [vmem:[%s1422_s22 + $0x20] sm:$0xf0]  ;;  %v1481_v38 = vor.u32 %v1292_v31, %v1154_v32  ;;  %v1114_v39 = vld [vmem:[%s1422_s22 + $0x24] sm:$0xf0] }
  0x19   : > { %v1282_v37 = vld [vmem:[%s1422_s22 + $0x4] sm:$0xf]  ;;  %519 = vmatpush.bf16.msra.mxu3 %v1460_v25  ;;  %v1120_v40 = vld [vmem:[%s1422_s22 + $0x8] sm:$0xf]  ;;  %v1287_v41 = vld [vmem:[%s1422_s22 + $0x28] sm:$0xf0]  ;;  %v1490_v45 = vor.u32 %v1286_v36, %v1112_v35 }
  0x1a   : > { %v1283_v42 = vld [vmem:[%s1422_s22 + $0xc] sm:$0xf]  ;;  %v1122_v43 = vld [vmem:[%s1422_s22 + $0x2c] sm:$0xf0]  ;;  %v1316_v46 = vld [vmem:[%s1422_s22 + $0x110] sm:$0xf0]  ;;  %v1495_v47 = vor.u32 %v1282_v37, %v1114_v39  ;;  %v1497_v48 = vor.u32 %v1287_v41, %v1120_v40 }
  0x1b   : > { %v1232_v44 = vld [vmem:[%s1422_s22 + $0xf0] sm:$0xf]  ;;  %478 = vmatpush.bf16.msra.mxu0 %v1466_v29  ;;  %v1311_v50 = vld [vmem:[%s1422_s22 + $0xec] sm:$0xf]  ;;  %v1507_v52 = vor.u32 %v1283_v42, %v1122_v43  ;;  %v1224_v54 = vld [vmem:[%s1422_s22 + $0xe8] sm:$0xf] }
  0x1c   : > { %492 = vmatpush.bf16.msra.mxu1 %v1473_v33  ;;  %506 = vmatpush.bf16.msra.mxu2 %v1475_v34  ;;  %v1226_v51 = vld [vmem:[%s1422_s22 + $0x10c] sm:$0xf0]  ;;  %v1509_v53 = vor.u32 %v1316_v46, %v1232_v44  ;;  %v1315_v55 = vld [vmem:[%s1422_s22 + $0x108] sm:$0xf0]  ;;  %v1312_v56 = vld [vmem:[%s1422_s22 + $0xf4] sm:$0xf] }
  0x1d   : > { %520 = vmatpush.bf16.msra.mxu3 %v1481_v38  ;;  %v1514_v57 = vor.u32 %v1311_v50, %v1226_v51  ;;  %v1234_v58 = vld [vmem:[%s1422_s22 + $0x114] sm:$0xf0]  ;;  %v1200_v59 = vld [vmem:[%s1422_s22 + $0xa8] sm:$0xf]  ;;  %v1307_v60 = vld [vmem:[%s1422_s22 + $0xc8] sm:$0xf0]  ;;  %v1524_v63 = vor.u32 %v1315_v55, %v1224_v54 }
  0x1e   : > { %v1302_v61 = vld [vmem:[%s1422_s22 + $0xa4] sm:$0xf]  ;;  %v1194_v62 = vld [vmem:[%s1422_s22 + $0xc4] sm:$0xf0]  ;;  %v1528_v0 = vor.u32 %v1312_v56, %v1234_v58  ;;  %v1530_v1 = vor.u32 %v1307_v60, %v1200_v59  ;;  %v1192_v2 = vld [vmem:[%s1422_s22 + $0xa0] sm:$0xf] }
  0x1f   : > { %479 = vmatpush.bf16.msra.mxu0 %v1490_v45  ;;  %v1306_v4 = vld [vmem:[%s1422_s22 + $0xc0] sm:$0xf0]  ;;  %v1303_v5 = vld [vmem:[%s1422_s22 + $0xac] sm:$0xf]  ;;  %v1538_v6 = vor.u32 %v1302_v61, %v1194_v62  ;;  %v1202_v9 = vld [vmem:[%s1422_s22 + $0xcc] sm:$0xf0] }
  0x20   : > { %493 = vmatpush.bf16.msra.mxu1 %v1495_v47  ;;  %507 = vmatpush.bf16.msra.mxu2 %v1497_v48  ;;  %v1168_v10 = vld [vmem:[%s1422_s22 + $0x60] sm:$0xf]  ;;  %v1298_v11 = vld [vmem:[%s1422_s22 + $0x80] sm:$0xf0]  ;;  %v1293_v13 = vld [vmem:[%s1422_s22 + $0x5c] sm:$0xf]  ;;  %v1193_v15 = vor.u32 %v1306_v4, %v1192_v2  ;;  %v1554_v18 = vor.u32 %v1303_v5, %v1202_v9 }
  0x21   : > { %521 = vmatpush.bf16.msra.mxu3 %v1507_v52  ;;  %v1162_v14 = vld [vmem:[%s1422_s22 + $0x7c] sm:$0xf0]  ;;  %v1556_v19 = vor.u32 %v1298_v11, %v1168_v10  ;;  %v1160_v20 = vld [vmem:[%s1422_s22 + $0x58] sm:$0xf]  ;;  %v1297_v22 = vld [vmem:[%s1422_s22 + $0x78] sm:$0xf0] }
  0x22   : > { %1238 = vmatmul.msk.bf16.vlgmr.msra.gmra.mxu0 %vm468_vm0, %v1502_v49  ;;  %v1294_v23 = vld [vmem:[%s1422_s22 + $0x64] sm:$0xf]  ;;  %v1562_v24 = vor.u32 %v1293_v13, %v1162_v14  ;;  %v1170_v26 = vld [vmem:[%s1422_s22 + $0x84] sm:$0xf0]  ;;  %v1136_v27 = vld [vmem:[%s1422_s22 + $0x18] sm:$0xf]  ;;  %v1161_v32 = vor.u32 %v1297_v22, %v1160_v20 }
  0x23   : > { %1239 = vmatmul.msk.bf16.vlgmr.msra.gmra.mxu1 %vm468_vm0, %v1502_v49  ;;  %1240 = vmatmul.msk.bf16.vlgmr.msra.gmra.mxu2 %vm468_vm0, %v1502_v49  ;;  %v1289_v28 = vld [vmem:[%s1422_s22 + $0x38] sm:$0xf0]  ;;  %v1284_v30 = vld [vmem:[%s1422_s22 + $0x14] sm:$0xf]  ;;  %v1130_v31 = vld [vmem:[%s1422_s22 + $0x34] sm:$0xf0]  ;;  %v1173_v35 = vor.u32 %v1294_v23, %v1170_v26 }
  0x24   : > { %560 = vmatpush.bf16.msrb.mxu2 %v1509_v53  ;;  %546 = vmatpush.bf16.msrb.mxu1 %v1514_v57  ;;  %v1137_v36 = vor.u32 %v1289_v28, %v1136_v27  ;;  %v1128_v37 = vld [vmem:[%s1422_s22 + $0x10] sm:$0xf]  ;;  %v1288_v39 = vld [vmem:[%s1422_s22 + $0x30] sm:$0xf0]  ;;  %v1133_v40 = vor.u32 %v1284_v30, %v1130_v31  ;;  %v1285_v41 = vld [vmem:[%s1422_s22 + $0x1c] sm:$0xf] }
  0x25   : > { %1241 = vmatmul.msk.bf16.vlgmr.msra.gmra.mxu3 %vm468_vm0, %v1502_v49  ;;  %532 = vmatpush.bf16.msrb.mxu0 %v1524_v63  ;;  %v1138_v42 = vld [vmem:[%s1422_s22 + $0x3c] sm:$0xf0]  ;;  %v1129_v43 = vor.u32 %v1288_v39, %v1128_v37 }
  0x26   : > { %574 = vmatpush.bf16.msrb.mxu3 %v1528_v0  ;;  %v1141_v44 = vor.u32 %v1285_v41, %v1138_v42 }
  0x28   : > { %561 = vmatpush.bf16.msrb.mxu2 %v1530_v1  ;;  %547 = vmatpush.bf16.msrb.mxu1 %v1538_v6 }
  0x29   : > { %533 = vmatpush.bf16.msrb.mxu0 %v1193_v15 }
  0x2a   : > { %575 = vmatpush.bf16.msrb.mxu3 %v1554_v18 }
  0x2c   : > { %562 = vmatpush.bf16.msrb.mxu2 %v1556_v19  ;;  %548 = vmatpush.bf16.msrb.mxu1 %v1562_v24 }
  0x2d   : > { %534 = vmatpush.bf16.msrb.mxu0 %v1161_v32 }
  0x2e   : > { %576 = vmatpush.bf16.msrb.mxu3 %v1173_v35 }
  0x30   : > { %563 = vmatpush.bf16.msrb.mxu2 %v1137_v36  ;;  %549 = vmatpush.bf16.msrb.mxu1 %v1133_v40 }
  0x31   : > { %535 = vmatpush.bf16.msrb.mxu0 %v1129_v43 }
  0x32   : > { %577 = vmatpush.bf16.msrb.mxu3 %v1141_v44 }
  0x33   : > { %1243 = vmatmul.msk.bf16.vlgmr.msrb.gmra.mxu1 %vm468_vm0, %v1502_v49  ;;  %1244 = vmatmul.msk.bf16.vlgmr.msrb.gmra.mxu2 %vm468_vm0, %v1502_v49 }
  0x34   : > { %651 = vmatpush.bf16.msra.mxu2 %v1434_v8  ;;  %637 = vmatpush.bf16.msra.mxu1 %v1432_v7  ;;  %v1266_v7 = vld [vmem:[%s1422_s22 + $0xf8] sm:$0xf]  ;;  %v1317_v8 = vld [vmem:[%s1422_s22 + $0x118] sm:$0xf0] }
  0x35   : > { %623 = vmatpush.bf16.msra.mxu0 %v1427_v3  ;;  %1245 = vmatmul.msk.bf16.vlgmr.msrb.gmra.mxu3 %vm468_vm0, %v1502_v49  ;;  %v1319_v3 = vld [vmem:[%s1770_s1 + $0x8] sm:$0xff] }
  0x36   : > { %665 = vmatpush.bf16.msra.mxu3 %v1440_v12  ;;  %1242 = vmatmul.msk.bf16.vlgmr.msrb.gmra.mxu0 %vm468_vm0, %v1502_v49  ;;  %v1267_v12 = vor.u32 %v1317_v8, %v1266_v7 }
  0x38   : > { %652 = vmatpush.bf16.msra.mxu2 %v1455_v21  ;;  %638 = vmatpush.bf16.msra.mxu1 %v1449_v17  ;;  %v1308_v17 = vld [vmem:[%s1422_s22 + $0xd0] sm:$0xf0] }
  0x39   : > { %624 = vmatpush.bf16.msra.mxu0 %v1447_v16  ;;  %v1262_v16 = vld [vmem:[%s1422_s22 + $0xb0] sm:$0xf] }
  0x3a   : > { %666 = vmatpush.bf16.msra.mxu3 %v1460_v25  ;;  %v1263_v21 = vor.u32 %v1308_v17, %v1262_v16  ;;  %v1258_v25 = vld [vmem:[%s1422_s22 + $0x68] sm:$0xf] }
  0x3c   : > { %653 = vmatpush.bf16.msra.mxu2 %v1475_v34  ;;  %639 = vmatpush.bf16.msra.mxu1 %v1473_v33  ;;  %v1254_v34 = vld [vmem:[%s1422_s22 + $0x20] sm:$0xf] }
  0x3d   : > { %625 = vmatpush.bf16.msra.mxu0 %v1466_v29  ;;  %v1299_v29 = vld [vmem:[%s1422_s22 + $0x88] sm:$0xf0] }
  0x3e   : > { %667 = vmatpush.bf16.msra.mxu3 %v1481_v38  ;;  %v1259_v33 = vor.u32 %v1299_v29, %v1258_v25  ;;  %v1290_v38 = vld [vmem:[%s1422_s22 + $0x40] sm:$0xf0] }
  0x40   : > { %654 = vmatpush.bf16.msra.mxu2 %v1497_v48  ;;  %640 = vmatpush.bf16.msra.mxu1 %v1495_v47 }
  0x41   : > { %626 = vmatpush.bf16.msra.mxu0 %v1490_v45  ;;  %v1255_v45 = vor.u32 %v1290_v38, %v1254_v34 }
  0x42   : > { %668 = vmatpush.bf16.msra.mxu3 %v1507_v52 }
  0x43   : > { %1269 = vmatmul.msk.bf16.vlgmr.msra.gmra.mxu1 %vm468_vm0, %v1319_v3  ;;  %1270 = vmatmul.msk.bf16.vlgmr.msra.gmra.mxu2 %vm468_vm0, %v1319_v3 }
  0x44   : > { %707 = vmatpush.bf16.msrb.mxu2 %v1509_v53  ;;  %693 = vmatpush.bf16.msrb.mxu1 %v1514_v57 }
  0x45   : > { %679 = vmatpush.bf16.msrb.mxu0 %v1524_v63  ;;  %1271 = vmatmul.msk.bf16.vlgmr.msra.gmra.mxu3 %vm468_vm0, %v1319_v3 }
  0x46   : > { %721 = vmatpush.bf16.msrb.mxu3 %v1528_v0  ;;  %1268 = vmatmul.msk.bf16.vlgmr.msra.gmra.mxu0 %vm468_vm0, %v1319_v3 }
  0x48   : > { %708 = vmatpush.bf16.msrb.mxu2 %v1530_v1  ;;  %694 = vmatpush.bf16.msrb.mxu1 %v1538_v6 }
  0x49   : > { %680 = vmatpush.bf16.msrb.mxu0 %v1193_v15 }
  0x4a   : > { %722 = vmatpush.bf16.msrb.mxu3 %v1554_v18 }
  0x4c   : > { %709 = vmatpush.bf16.msrb.mxu2 %v1556_v19  ;;  %695 = vmatpush.bf16.msrb.mxu1 %v1562_v24 }
  0x4d   : > { %681 = vmatpush.bf16.msrb.mxu0 %v1161_v32 }
  0x4e   : > { %723 = vmatpush.bf16.msrb.mxu3 %v1173_v35 }
  0x50   : > { %710 = vmatpush.bf16.msrb.mxu2 %v1137_v36  ;;  %696 = vmatpush.bf16.msrb.mxu1 %v1133_v40 }
  0x51   : > { %682 = vmatpush.bf16.msrb.mxu0 %v1129_v43 }
  0x52   : > { %724 = vmatpush.bf16.msrb.mxu3 %v1141_v44 }
  0x53   : > { %1273 = vmatmul.msk.bf16.vlgmr.msrb.gmra.mxu1 %vm468_vm0, %v1319_v3  ;;  %1274 = vmatmul.msk.bf16.vlgmr.msrb.gmra.mxu2 %vm468_vm0, %v1319_v3 }
  0x55   : > { %735 = vmatpush.bf16.msra.mxu0 %v1267_v12  ;;  %1275 = vmatmul.msk.bf16.vlgmr.msrb.gmra.mxu3 %vm468_vm0, %v1319_v3 }
  0x56   : > { %1272 = vmatmul.msk.bf16.vlgmr.msrb.gmra.mxu0 %vm468_vm0, %v1319_v3 }
  0x59   : > { %736 = vmatpush.bf16.msra.mxu0 %v1263_v21 }
  0x5d   : > { %737 = vmatpush.bf16.msra.mxu0 %v1259_v33 }
  0x61   : > { %738 = vmatpush.bf16.msra.mxu0 %v1255_v45 }
  0x66   : > { %1276 = vmatmul.msk.bf16.vlgmr.msra.gmra.mxu0 %vm468_vm0, %v1319_v3 }
  0x9f   : > { %v1629_v46 = vpop.f32.mrf.mxu0 }
  0xa0   : > { %v1631_v47 = vpop.f32.mrf.mxu1 }
  0xa6   : > { %v1633_v48 = vpop.f32.mrf.mxu2 }
  0xa7   : > { %v1637_v50 = vpop.f32.mrf.mxu0 }
  0xa8   : > { %v1635_v49 = vpop.f32.mrf.mxu3  ;;  %v1639_v51 = vpop.f32.mrf.mxu1 }
  0xae   : > { %v1641_v52 = vpop.f32.mrf.mxu2 }
  0xb0   : > { %v1643_v53 = vpop.f32.mrf.mxu3  ;;  %v1647_v55 = vpop.f32.mrf.mxu1 }
  0xb3   : > { %v1645_v54 = vpop.f32.mrf.mxu0 }
  0xb6   : > { %v1649_v56 = vpop.f32.mrf.mxu2 }
  0xb8   : > { %v1651_v57 = vpop.f32.mrf.mxu3  ;;  %v1655_v59 = vpop.f32.mrf.mxu1 }
  0xbb   : > { %v1653_v58 = vpop.f32.mrf.mxu0 }
  0xbe   : > { %v1657_v60 = vpop.f32.mrf.mxu2 }
  0xc0   : > { %v1659_v61 = vpop.f32.mrf.mxu3  ;;  %v642_v63 = vpop.f32.mrf.mxu1 }
  0xc3   : > { %v628_v62 = vpop.f32.mrf.mxu0 }
  0xc4   : > { %763 = vrot.lane.b32.xlu0 %v628_v62, %s1371_s27 }
  0xc6   : > { %v656_v0 = vpop.f32.mrf.mxu2 }
  0xc7   : > { %767 = vrot.lane.b32.xlu1 %v656_v0, %s1371_s27 }
  0xc8   : > { %v644_v1 = vpop.f32.mrf.mxu1  ;;  %v670_v2 = vpop.f32.mrf.mxu3 }
  0xc9   : > { %783 = vrot.lane.b32.xlu2 %v644_v1, %s1371_s27 }
  0xcb   : > { %v630_v4 = vpop.f32.mrf.mxu0 }
  0xcc   : > { %765 = vrot.lane.b32.xlu0 %v642_v63, %s1371_s27  ;;  %v1372_v63 = vmov 0.0  }
  0xcd   : > { %870 = vst.msk [vmem:[%s1707_s9 + $0x8] sm:$0xff] %vm868_vm2, %v1372_v63 }
  0xce   : > { %v658_v5 = vpop.f32.mrf.mxu2  ;;  %869 = vst.msk [vmem:[%s1707_s9] sm:$0xff] %vm868_vm2, %v1372_v63 }
  0xcf   : > { %781 = vrot.lane.b32.xlu1 %v630_v4, %s1371_s27  ;;  %871 = vst.msk [vmem:[%s1723_s12] sm:$0xff] %vm868_vm2, %v1372_v63 }
  0xd0   : > { %v672_v9 = vpop.f32.mrf.mxu3  ;;  %v698_v14 = vpop.f32.mrf.mxu1  ;;  %872 = vst.msk [vmem:[%s1723_s12 + $0x8] sm:$0xff] %vm868_vm2, %v1372_v63 }
  0xd1   : > { %785 = vrot.lane.b32.xlu2 %v658_v5, %s1371_s27 }
  0xd3   : > { %v684_v6 = vpop.f32.mrf.mxu0 }
  0xd4   : > { %769 = vrot.lane.b32.xlu0 %v670_v2, %s1371_s27 }
  0xd6   : > { %v712_v10 = vpop.f32.mrf.mxu2 }
  0xd7   : > { %787 = vrot.lane.b32.xlu1 %v672_v9, %s1371_s27 }
  0xd8   : > { %v726_v13 = vpop.f32.mrf.mxu3  ;;  %v700_v20 = vpop.f32.mrf.mxu1 }
  0xd9   : > { %771 = vrot.lane.b32.xlu2 %v684_v6, %s1371_s27 }
  0xdb   : > { %v686_v11 = vpop.f32.mrf.mxu0 }
  0xdc   : > { %775 = vrot.lane.b32.xlu0 %v712_v10, %s1371_s27 }
  0xde   : > { %v714_v19 = vpop.f32.mrf.mxu2 }
  0xdf   : > { %773 = vrot.lane.b32.xlu1 %v698_v14, %s1371_s27 }
  0xe0   : > { %v728_v18 = vpop.f32.mrf.mxu3 }
  0xe1   : > { %777 = vrot.lane.b32.xlu2 %v726_v13, %s1371_s27 }
  0xe3   : > { %v740_v15 = vpop.f32.mrf.mxu0 }
  0xe4   : > { %789 = vrot.lane.b32.xlu0 %v686_v11, %s1371_s27 }
  0xe7   : > { %793 = vrot.lane.b32.xlu1 %v714_v19, %s1371_s27 }
  0xe9   : > { %791 = vrot.lane.b32.xlu2 %v700_v20, %s1371_s27 }
  0xeb   : > { %v742_v22 = vpop.f32.mrf.mxu0 }
  0xec   : > { %795 = vrot.lane.b32.xlu0 %v728_v18, %s1371_s27 }
  0xef   : > { %779 = vrot.lane.b32.xlu1 %v740_v15, %s1371_s27 }
  0xf1   : > { %797 = vrot.lane.b32.xlu2 %v742_v22, %s1371_s27 }
 0x123   : > { %v784_v23 = vpop.permute.xlu2 %783 }
 0x12b   : > { %v786_v24 = vpop.permute.xlu2 %785 }
 0x12c   : > { %v809_v39 = vsel %vm799_vm1, %v784_v23, %v786_v24 }
 0x12d   : > { %v841_v43 = vadd.f32 %v809_v39, %v1639_v51 }
 0x12f   : > { %v909_v14 = vmul.f32 %v841_v43, %v841_v43 }
 0x133   : > { %v772_v32 = vpop.permute.xlu2 %771 }
 0x136   : > { %v764_v26 = vpop.permute.xlu0 %763 }
 0x139   : > { %v768_v27 = vpop.permute.xlu1 %767 }
 0x13b   : > { %v1698_v17 = vpop.permute.xlu2 %777 }
 0x13e   : > { %v766_v28 = vpop.permute.xlu0 %765 }
 0x13f   : > { %v800_v30 = vsel %vm799_vm1, %v764_v26, %v766_v28  ;;  %v801_v31 = vsel %vm799_vm1, %v766_v28, %v768_v27 }
 0x140   : > { %v832_v35 = vadd.f32 %v800_v30, %v1629_v46  ;;  %v833_v36 = vadd.f32 %v801_v31, %v1631_v47 }
 0x141   : > { %v782_v40 = vpop.permute.xlu1 %781 }
 0x142   : > { %v848_v37 = vpack.c.bf16 %v833_v36, %v832_v35  ;;  %v808_v41 = vsel %vm799_vm1, %v782_v40, %v784_v23  ;;  %v900_v34 = vmul.f32 %v832_v35, %v832_v35  ;;  %v901_v38 = vmul.f32 %v833_v36, %v833_v36 }
 0x143   : > { %v840_v44 = vadd.f32 %v808_v41, %v1637_v50  ;;  %v792_v45 = vpop.permute.xlu2 %791 }
 0x144   : > { %856 = vst [vmem:[%s1687_s5] sm:$0xff] %v848_v37  ;;  %v916_v4 = vadd.f32 %v901_v38, %v900_v34 }
 0x145   : > { %v852_v16 = vpack.c.bf16 %v841_v43, %v840_v44  ;;  %v884_v0 = vadd.f32 %v841_v43, %v840_v44 }
 0x146   : > { %v770_v42 = vpop.permute.xlu0 %769 }
 0x147   : > { %v802_v3 = vsel %vm799_vm1, %v768_v27, %v770_v42  ;;  %v803_v7 = vsel %vm799_vm1, %v770_v42, %v772_v32  ;;  %860 = vst [vmem:[%s1687_s5 + $0x20] sm:$0xff] %v852_v16 }
 0x148   : > { %v834_v8 = vadd.f32 %v802_v3, %v1633_v48  ;;  %v835_v12 = vadd.f32 %v803_v7, %v1635_v49  ;;  %v875_v48 = vadd.f32 %v833_v36, %v832_v35 }
 0x149   : > { %v788_v25 = vpop.permute.xlu1 %787 }
 0x14a   : > { %v849_v21 = vpack.c.bf16 %v835_v12, %v834_v8  ;;  %v810_v33 = vsel %vm799_vm1, %v786_v24, %v788_v25  ;;  %v902_v49 = vmul.f32 %v834_v8, %v834_v8  ;;  %v876_v5 = vadd.f32 %v875_v48, %v834_v8 }
 0x14b   : > { %v842_v46 = vadd.f32 %v810_v33, %v1641_v52  ;;  %v903_v18 = vmul.f32 %v835_v12, %v835_v12  ;;  %v798_v27 = vpop.permute.xlu2 %797 }
 0x14c   : > { %857 = vst [vmem:[%s1687_s5 + $0x8] sm:$0xff] %v849_v21  ;;  %v917_v10 = vadd.f32 %v916_v4, %v902_v49  ;;  %v877_v15 = vadd.f32 %v876_v5, %v835_v12  ;;  %v873_v4 = vld [vmem:[%s1707_s9] sm:$0xff] }
 0x14d   : > { %v885_v9 = vadd.f32 %v884_v0, %v842_v46  ;;  %v910_v26 = vmul.f32 %v842_v46, %v842_v46 }
 0x14e   : > { %v776_v29 = vpop.permute.xlu0 %775  ;;  %v918_v24 = vadd.f32 %v917_v10, %v903_v18  ;;  %v899_v10 = vld [vmem:[%s1723_s12 + $0x8] sm:$0xff] }
 0x151   : > { %v774_v47 = vpop.permute.xlu1 %773 }
 0x152   : > { %v804_v50 = vsel %vm799_vm1, %v772_v32, %v774_v47  ;;  %v805_v51 = vsel %vm799_vm1, %v774_v47, %v776_v29 }
 0x153   : > { %v836_v1 = vadd.f32 %v804_v50, %v1645_v54  ;;  %v837_v2 = vadd.f32 %v805_v51, %v1647_v55  ;;  %v908_v54 = vmul.f32 %v840_v44, %v840_v44 }
 0x155   : > { %v850_v55 = vpack.c.bf16 %v837_v2, %v836_v1  ;;  %v925_v19 = vadd.f32 %v909_v14, %v908_v54  ;;  %v904_v20 = vmul.f32 %v836_v1, %v836_v1  ;;  %v878_v28 = vadd.f32 %v877_v15, %v836_v1  ;;  %v874_v1 = vld [vmem:[%s1707_s9 + $0x8] sm:$0xff] }
 0x156   : > { %v790_v62 = vpop.permute.xlu0 %789  ;;  %v905_v8 = vmul.f32 %v837_v2, %v837_v2 }
 0x157   : > { %v811_v52 = vsel %vm799_vm1, %v788_v25, %v790_v62  ;;  %v812_v11 = vsel %vm799_vm1, %v790_v62, %v792_v45  ;;  %858 = vst [vmem:[%s1687_s5 + $0x10] sm:$0xff] %v850_v55  ;;  %v919_v44 = vadd.f32 %v918_v24, %v904_v20  ;;  %v926_v3 = vadd.f32 %v925_v19, %v910_v26 }
 0x158   : > { %v843_v6 = vadd.f32 %v811_v52, %v1643_v53  ;;  %v844_v22 = vadd.f32 %v812_v11, %v1653_v58  ;;  %v806_v58 = vsel %vm799_vm1, %v776_v29, %v1698_v17  ;;  %v879_v16 = vadd.f32 %v878_v28, %v837_v2 }
 0x159   : > { %v794_v23 = vpop.permute.xlu1 %793  ;;  %v920_v33 = vadd.f32 %v919_v44, %v905_v8 }
 0x15a   : > { %v853_v13 = vpack.c.bf16 %v843_v6, %v842_v46  ;;  %v886_v53 = vadd.f32 %v885_v9, %v843_v6  ;;  %v813_v30 = vsel %vm799_vm1, %v792_v45, %v794_v23  ;;  %v911_v39 = vmul.f32 %v843_v6, %v843_v6  ;;  %v898_v6 = vld [vmem:[%s1723_s12] sm:$0xff] }
 0x15b   : > { %v845_v35 = vadd.f32 %v813_v30, %v1655_v59  ;;  %v838_v59 = vadd.f32 %v806_v58, %v1649_v56 }
 0x15c   : > { %861 = vst [vmem:[%s1687_s5 + $0x28] sm:$0xff] %v853_v13  ;;  %v887_v32 = vadd.f32 %v886_v53, %v844_v22  ;;  %v927_v21 = vadd.f32 %v926_v3, %v911_v39 }
 0x15d   : > { %v854_v42 = vpack.c.bf16 %v845_v35, %v844_v22  ;;  %v913_v34 = vmul.f32 %v845_v35, %v845_v35  ;;  %v880_v45 = vadd.f32 %v879_v16, %v838_v59  ;;  %v906_v56 = vmul.f32 %v838_v59, %v838_v59 }
 0x15e   : > { %v796_v31 = vpop.permute.xlu0 %795  ;;  %v888_v43 = vadd.f32 %v887_v32, %v845_v35 }
 0x15f   : > { %v814_v36 = vsel %vm799_vm1, %v794_v23, %v796_v31  ;;  %v815_v37 = vsel %vm799_vm1, %v796_v31, %v798_v27  ;;  %862 = vst [vmem:[%s1687_s5 + $0x30] sm:$0xff] %v854_v42  ;;  %v921_v50 = vadd.f32 %v920_v33, %v906_v56 }
 0x160   : > { %v846_v40 = vadd.f32 %v814_v36, %v1657_v60  ;;  %v847_v41 = vadd.f32 %v815_v37, %v1659_v61  ;;  %v912_v60 = vmul.f32 %v844_v22, %v844_v22 }
 0x161   : > { %v780_v25 = vpop.permute.xlu1 %779 }
 0x162   : > { %v855_v7 = vpack.c.bf16 %v847_v41, %v846_v40  ;;  %v889_v12 = vadd.f32 %v888_v43, %v846_v40  ;;  %v807_v61 = vsel %vm799_vm1, %v1698_v17, %v780_v25  ;;  %v928_v46 = vadd.f32 %v927_v21, %v912_v60 }
 0x163   : > { %v839_v38 = vadd.f32 %v807_v61, %v1651_v57  ;;  %v914_v62 = vmul.f32 %v846_v40, %v846_v40  ;;  %v915_v63 = vmul.f32 %v847_v41, %v847_v41 }
 0x164   : > { %863 = vst [vmem:[%s1687_s5 + $0x38] sm:$0xff] %v855_v7  ;;  %v890_v29 = vadd.f32 %v889_v12, %v847_v41  ;;  %v929_v17 = vadd.f32 %v928_v46, %v913_v34 }
 0x165   : > { %v851_v47 = vpack.c.bf16 %v839_v38, %v838_v59  ;;  %v881_v48 = vadd.f32 %v880_v45, %v839_v38  ;;  %v907_v49 = vmul.f32 %v839_v38, %v839_v38 }
 0x166   : > { %891 = vadd.xlane.f32.xlu1 %v890_v29  ;;  %v930_v57 = vadd.f32 %v929_v17, %v914_v62 }
 0x167   : > { %859 = vst [vmem:[%s1687_s5 + $0x18] sm:$0xff] %v851_v47  ;;  %882 = vadd.xlane.f32.xlu0 %v881_v48  ;;  %v922_v51 = vadd.f32 %v921_v50, %v907_v49 }
 0x168   : > { %v931_v0 = vadd.f32 %v930_v57, %v915_v63 }
 0x169   : > { %923 = vadd.xlane.f32.xlu2 %v922_v51 }
 0x171   : > { %932 = vadd.xlane.f32.xlu2 %v931_v0 }
 0x1d9   : > { %v892_v2 = vpop.xlane.xlu1 %891 }
 0x1da   : > { %v894_v52 = vadd.f32 %v892_v2, %v874_v1  ;;  %v883_v5 = vpop.xlane.xlu0 %882 }
 0x1db   : > { %v893_v54 = vadd.f32 %v883_v5, %v873_v4 }
 0x1dc   : > { %897 = vst.msk [vmem:[%s1707_s9 + $0x8] sm:$0xff] %vm868_vm2, %v894_v52  ;;  %v924_v9 = vpop.xlane.xlu2 %923 }
 0x1dd   : > { %896 = vst.msk [vmem:[%s1707_s9] sm:$0xff] %vm868_vm2, %v893_v54  ;;  %v934_v55 = vadd.f32 %v924_v9, %v898_v6 }
 0x1df   : > { %936 = vst.msk [vmem:[%s1723_s12] sm:$0xff] %vm868_vm2, %v934_v55 }
 0x1e4   : > { %v933_v11 = vpop.xlane.xlu2 %932 }
 0x1e5   : > { %v935_v13 = vadd.f32 %v933_v11, %v899_v10 }
 0x1e7   : > { %937 = vst.msk [vmem:[%s1723_s12 + $0x8] sm:$0xff] %vm868_vm2, %v935_v13 }
 0x1e8 PF: > { %s15_s17 = sadd.s32 1, %s1369_s17   ;;  %s1774_s15 = smov %s1365_s16 }
 0x1e9   : > { %p12_p5 = scmp.ge.s32.totalorder %s15_s17, 4   ;;  %s1775_s16 = smov %s1777_s18 }
 0x1eb   :  { %14 = sbr.rel (!%p12_p5) target bundleno = 2 (0x2), region = 87 }

// kernel: forward.8
= control target key start
LH: loop header
LB: loop body
LE: loop exit
PB: predicated region body
PF: predicated region fallthrough
CT: control target
= control target key end

     0   :  { %s1090_s15 = smov 0   ;;  %s1092_s16 = smov 0   ;;  %s1265_s0 = inlined_call_operand.vmem [shape: bf16[2,1,128,272], index: 0, kind: input, shape index: {}]   ;;  %s1266_s1 = inlined_call_operand.vmem [shape: bf16[2,32,128], index: 1, kind: input, shape index: {}]   ;;  %s1267_s2 = inlined_call_operand.vmem [shape: bf16[2,32,256], index: 2, kind: output, shape index: {0}]   ;;  %s1268_s3 = inlined_call_operand.vmem [shape: f32[2,32,1], index: 3, kind: output, shape index: {1}]   ;;  %s1269_s4 = inlined_call_operand.vmem [shape: f32[2,32,1], index: 4, kind: output, shape index: {2}]  }
   0x1   :  { %s1094_s17 = smov 0  }
   0x2 LB: > { %s27_s18 = sadd.s32 1, %s1057_s16  ;;  %p847_p0 = scmp.ge.s32.totalorder %s1061_s17, 1  ;;  %s1061_s17 = sphi %s1094_s17, %s15_s17   ;;  %s1057_s16 = sphi %s1092_s16, %s1271_s16   ;;  %s1053_s15 = sphi %s1090_s15, %s1270_s15  }
   0x3   : > { %p29_p1 = scmp.ge.s32.totalorder %s27_s18, 2  ;;  %p187_p2 = scmp.lt.s32.totalorder %s1061_s17, 3 }
   0x5   : > { %s1273_s18 = smov (%p29_p1, %s27_s18), 0  ;;  %p188_p3 = pnand %p847_p0, %p187_p2 }
   0x6   : > { %p231_p4 = scmp.lt.s32.totalorder (!%p188_p3), %s1053_s15, 1  ;;  %s1063_s5 = smov (!%p188_p3), 112  }
   0x7   : > { %191 = sbr.rel (%p188_p3) target bundleno = 464 (0x1d0), region = 28 }
   0xc   : > { %s1275_s15 = smov (!%p231_p4, %s1053_s15), 1  ;;  %v1000_v50 = vld [vmem:[%s1266_s1] sm:$0xff]  ;;  %v1002_v52 = vld [vmem:[%s1266_s1 + $0x10] sm:$0xff]  ;;  %vm584_vm0 = vcmask 916480   ;;  %vm621_vm1 = vcmask 7168  }
   0xd   : > { %s1012_s19 = smul.u32 192, %s1275_s15  ;;  %s973_s6 = sshll.u32 %s1275_s15, 5 }
   0xe   : > { %s1190_s9 = scalar_lea.vmem %s1267_s2, %s973_s6  ;;  %s1195_s12 = scalar_lea.vmem %s1268_s3, %s973_s6 }
   0xf   : > { %s1114_s22 = scalar_lea.vmem %s1265_s0, %s1012_s19  ;;  %s1209_s15 = scalar_lea.vmem %s1269_s4, %s973_s6 }
  0x10   : > { %v921_v0 = vld [vmem:[%s1114_s22 + $0xa8] sm:$0xf]  ;;  %v998_v1 = vld [vmem:[%s1114_s22 + $0xb0] sm:$0xf0]  ;;  %v997_v2 = vld [vmem:[%s1114_s22 + $0xac] sm:$0xf] }
  0x11   : > { %v922_v3 = vor.u32 %v998_v1, %v921_v0  ;;  %v923_v4 = vld [vmem:[%s1114_s22 + $0xb4] sm:$0xf0]  ;;  %v913_v5 = vld [vmem:[%s1114_s22 + $0x90] sm:$0xf]  ;;  %v995_v6 = vld [vmem:[%s1114_s22 + $0x98] sm:$0xf0] }
  0x12   : > { %v926_v7 = vor.u32 %v997_v2, %v923_v4  ;;  %v994_v8 = vld [vmem:[%s1114_s22 + $0x94] sm:$0xf]  ;;  %v915_v9 = vld [vmem:[%s1114_s22 + $0x9c] sm:$0xf0]  ;;  %v914_v10 = vor.u32 %v995_v6, %v913_v5  ;;  %v905_v12 = vld [vmem:[%s1114_s22 + $0x78] sm:$0xf] }
  0x13   : > { %388 = vmatpush.bf16.msra.mxu0 %v922_v3  ;;  %491 = vmatpush.bf16.msra.mxu2 %v922_v3  ;;  %v918_v11 = vor.u32 %v994_v8, %v915_v9  ;;  %v992_v13 = vld [vmem:[%s1114_s22 + $0x80] sm:$0xf0]  ;;  %v991_v14 = vld [vmem:[%s1114_s22 + $0x7c] sm:$0xf]  ;;  %v907_v15 = vld [vmem:[%s1114_s22 + $0x84] sm:$0xf0] }
  0x14   : > { %407 = vmatpush.bf16.msra.mxu1 %v926_v7  ;;  %510 = vmatpush.bf16.msra.mxu3 %v926_v7  ;;  %v906_v16 = vor.u32 %v992_v13, %v905_v12  ;;  %v910_v17 = vor.u32 %v991_v14, %v907_v15  ;;  %v897_v18 = vld [vmem:[%s1114_s22 + $0x60] sm:$0xf]  ;;  %v989_v19 = vld [vmem:[%s1114_s22 + $0x68] sm:$0xf0]  ;;  %v988_v20 = vld [vmem:[%s1114_s22 + $0x64] sm:$0xf] }
  0x15   : > { %v899_v21 = vld [vmem:[%s1114_s22 + $0x6c] sm:$0xf0]  ;;  %v898_v22 = vor.u32 %v989_v19, %v897_v18  ;;  %v889_v24 = vld [vmem:[%s1114_s22 + $0x48] sm:$0xf]  ;;  %v986_v25 = vld [vmem:[%s1114_s22 + $0x50] sm:$0xf0] }
  0x16   : > { %v902_v23 = vor.u32 %v988_v20, %v899_v21  ;;  %v985_v26 = vld [vmem:[%s1114_s22 + $0x4c] sm:$0xf]  ;;  %v891_v27 = vld [vmem:[%s1114_s22 + $0x54] sm:$0xf0]  ;;  %v890_v28 = vor.u32 %v986_v25, %v889_v24  ;;  %v881_v30 = vld [vmem:[%s1114_s22 + $0x30] sm:$0xf] }
  0x17   : > { %389 = vmatpush.bf16.msra.mxu0 %v914_v10  ;;  %492 = vmatpush.bf16.msra.mxu2 %v914_v10  ;;  %v894_v29 = vor.u32 %v985_v26, %v891_v27  ;;  %v983_v31 = vld [vmem:[%s1114_s22 + $0x38] sm:$0xf0]  ;;  %v982_v32 = vld [vmem:[%s1114_s22 + $0x34] sm:$0xf]  ;;  %v883_v33 = vld [vmem:[%s1114_s22 + $0x3c] sm:$0xf0] }
  0x18   : > { %408 = vmatpush.bf16.msra.mxu1 %v918_v11  ;;  %511 = vmatpush.bf16.msra.mxu3 %v918_v11  ;;  %v882_v34 = vor.u32 %v983_v31, %v881_v30  ;;  %v886_v35 = vor.u32 %v982_v32, %v883_v33  ;;  %v873_v36 = vld [vmem:[%s1114_s22 + $0x18] sm:$0xf]  ;;  %v980_v37 = vld [vmem:[%s1114_s22 + $0x20] sm:$0xf0]  ;;  %v979_v38 = vld [vmem:[%s1114_s22 + $0x1c] sm:$0xf] }
  0x19   : > { %v875_v39 = vld [vmem:[%s1114_s22 + $0x24] sm:$0xf0]  ;;  %v874_v40 = vor.u32 %v980_v37, %v873_v36  ;;  %v865_v42 = vld [vmem:[%s1114_s22] sm:$0xf]  ;;  %v977_v43 = vld [vmem:[%s1114_s22 + $0x8] sm:$0xf0] }
  0x1a   : > { %v878_v41 = vor.u32 %v979_v38, %v875_v39  ;;  %v976_v44 = vld [vmem:[%s1114_s22 + $0x4] sm:$0xf]  ;;  %v867_v45 = vld [vmem:[%s1114_s22 + $0xc] sm:$0xf0]  ;;  %v999_v47 = vld [vmem:[%s1114_s22 + $0xb8] sm:$0xf0]  ;;  %v866_v48 = vor.u32 %v977_v43, %v865_v42 }
  0x1b   : > { %390 = vmatpush.bf16.msra.mxu0 %v906_v16  ;;  %493 = vmatpush.bf16.msra.mxu2 %v906_v16  ;;  %v969_v46 = vld [vmem:[%s1114_s22 + $0xb0] sm:$0xf]  ;;  %v870_v49 = vor.u32 %v976_v44, %v867_v45  ;;  %v965_v53 = vld [vmem:[%s1114_s22 + $0x98] sm:$0xf]  ;;  %v996_v54 = vld [vmem:[%s1114_s22 + $0xa0] sm:$0xf0] }
  0x1c   : > { %409 = vmatpush.bf16.msra.mxu1 %v910_v17  ;;  %512 = vmatpush.bf16.msra.mxu3 %v910_v17  ;;  %v970_v51 = vor.u32 %v999_v47, %v969_v46  ;;  %v966_v55 = vor.u32 %v996_v54, %v965_v53  ;;  %v961_v56 = vld [vmem:[%s1114_s22 + $0x80] sm:$0xf]  ;;  %v993_v57 = vld [vmem:[%s1114_s22 + $0x88] sm:$0xf0]  ;;  %v957_v59 = vld [vmem:[%s1114_s22 + $0x68] sm:$0xf] }
  0x1d   : > { %v962_v58 = vor.u32 %v993_v57, %v961_v56  ;;  %v990_v60 = vld [vmem:[%s1114_s22 + $0x70] sm:$0xf0]  ;;  %v953_v62 = vld [vmem:[%s1114_s22 + $0x50] sm:$0xf]  ;;  %v987_v63 = vld [vmem:[%s1114_s22 + $0x58] sm:$0xf0] }
  0x1e   : > { %v958_v61 = vor.u32 %v990_v60, %v957_v59  ;;  %v1001_v0 = vld [vmem:[%s1266_s1 + $0x8] sm:$0xff]  ;;  %v954_v1 = vor.u32 %v987_v63, %v953_v62  ;;  %v1003_v2 = vld [vmem:[%s1266_s1 + $0x18] sm:$0xff]  ;;  %v984_v4 = vld [vmem:[%s1114_s22 + $0x40] sm:$0xf0] }
  0x1f   : > { %391 = vmatpush.bf16.msra.mxu0 %v898_v22  ;;  %494 = vmatpush.bf16.msra.mxu2 %v898_v22  ;;  %v949_v3 = vld [vmem:[%s1114_s22 + $0x38] sm:$0xf]  ;;  %v945_v6 = vld [vmem:[%s1114_s22 + $0x20] sm:$0xf]  ;;  %v981_v7 = vld [vmem:[%s1114_s22 + $0x28] sm:$0xf0] }
  0x20   : > { %410 = vmatpush.bf16.msra.mxu1 %v902_v23  ;;  %513 = vmatpush.bf16.msra.mxu3 %v902_v23  ;;  %v950_v5 = vor.u32 %v984_v4, %v949_v3  ;;  %v946_v8 = vor.u32 %v981_v7, %v945_v6  ;;  %v941_v9 = vld [vmem:[%s1114_s22 + $0x8] sm:$0xf]  ;;  %v978_v10 = vld [vmem:[%s1114_s22 + $0x10] sm:$0xf0] }
  0x21   : > { %v942_v11 = vor.u32 %v978_v10, %v941_v9 }
  0x23   : > { %392 = vmatpush.bf16.msra.mxu0 %v890_v28  ;;  %495 = vmatpush.bf16.msra.mxu2 %v890_v28 }
  0x24   : > { %411 = vmatpush.bf16.msra.mxu1 %v894_v29  ;;  %514 = vmatpush.bf16.msra.mxu3 %v894_v29 }
  0x27   : > { %393 = vmatpush.bf16.msra.mxu0 %v882_v34  ;;  %496 = vmatpush.bf16.msra.mxu2 %v882_v34 }
  0x28   : > { %412 = vmatpush.bf16.msra.mxu1 %v886_v35  ;;  %515 = vmatpush.bf16.msra.mxu3 %v886_v35 }
  0x2b   : > { %394 = vmatpush.bf16.msra.mxu0 %v874_v40  ;;  %497 = vmatpush.bf16.msra.mxu2 %v874_v40 }
  0x2c   : > { %413 = vmatpush.bf16.msra.mxu1 %v878_v41  ;;  %516 = vmatpush.bf16.msra.mxu3 %v878_v41 }
  0x2f   : > { %395 = vmatpush.bf16.msra.mxu0 %v866_v48  ;;  %498 = vmatpush.bf16.msra.mxu2 %v866_v48  ;;  %v1064_v48 = vmov 0.0  }
  0x30   : > { %414 = vmatpush.bf16.msra.mxu1 %v870_v49  ;;  %517 = vmatpush.bf16.msra.mxu3 %v870_v49  ;;  %623 = vst.msk [vmem:[%s1195_s12 + $0x8] sm:$0xff] %vm621_vm1, %v1064_v48 }
  0x31   : > { %622 = vst.msk [vmem:[%s1195_s12] sm:$0xff] %vm621_vm1, %v1064_v48 }
  0x32   : > { %396 = vmatmul.bf16.vlgmr.msra.gmra.mxu0 %v1000_v50  ;;  %499 = vmatmul.bf16.vlgmr.msra.gmra.mxu2 %v1002_v52  ;;  %624 = vst.msk [vmem:[%s1195_s12 + $0x10] sm:$0xff] %vm621_vm1, %v1064_v48 }
  0x33   : > { %529 = vmatpush.bf16.msrb.mxu0 %v970_v51  ;;  %415 = vmatmul.bf16.vlgmr.msra.gmra.mxu1 %v1000_v50  ;;  %625 = vst.msk [vmem:[%s1195_s12 + $0x18] sm:$0xff] %vm621_vm1, %v1064_v48 }
  0x34   : > { %1004 = vmatpush.bf16.msrb.mxu1 %v970_v51  ;;  %518 = vmatmul.bf16.vlgmr.msra.gmra.mxu3 %v1002_v52  ;;  %626 = vst.msk [vmem:[%s1209_s15] sm:$0xff] %vm621_vm1, %v1064_v48 }
  0x35   : > { %627 = vst.msk [vmem:[%s1209_s15 + $0x8] sm:$0xff] %vm621_vm1, %v1064_v48 }
  0x36   : > { %628 = vst.msk [vmem:[%s1209_s15 + $0x10] sm:$0xff] %vm621_vm1, %v1064_v48 }
  0x37   : > { %530 = vmatpush.bf16.msrb.mxu0 %v966_v55  ;;  %629 = vst.msk [vmem:[%s1209_s15 + $0x18] sm:$0xff] %vm621_vm1, %v1064_v48 }
  0x38   : > { %1005 = vmatpush.bf16.msrb.mxu1 %v966_v55 }
  0x3b   : > { %531 = vmatpush.bf16.msrb.mxu0 %v962_v58 }
  0x3c   : > { %1006 = vmatpush.bf16.msrb.mxu1 %v962_v58 }
  0x3f   : > { %532 = vmatpush.bf16.msrb.mxu0 %v958_v61 }
  0x40   : > { %1007 = vmatpush.bf16.msrb.mxu1 %v958_v61 }
  0x42   : > { %401 = vmatmul.bf16.gmra.mxu0 %v1001_v0  ;;  %504 = vmatmul.bf16.gmra.mxu2 %v1003_v2 }
  0x43   : > { %533 = vmatpush.bf16.msrb.mxu0 %v954_v1  ;;  %420 = vmatmul.bf16.gmra.mxu1 %v1001_v0 }
  0x44   : > { %1008 = vmatpush.bf16.msrb.mxu1 %v954_v1  ;;  %523 = vmatmul.bf16.gmra.mxu3 %v1003_v2 }
  0x47   : > { %534 = vmatpush.bf16.msrb.mxu0 %v950_v5 }
  0x48   : > { %1009 = vmatpush.bf16.msrb.mxu1 %v950_v5 }
  0x4b   : > { %535 = vmatpush.bf16.msrb.mxu0 %v946_v8 }
  0x4c   : > { %1010 = vmatpush.bf16.msrb.mxu1 %v946_v8 }
  0x4f   : > { %536 = vmatpush.bf16.msrb.mxu0 %v942_v11 }
  0x50   : > { %1011 = vmatpush.bf16.msrb.mxu1 %v942_v11 }
  0x52   : > { %537 = vmatmul.bf16.vlgmr.msrb.gmra.mxu0 %v1002_v52 }
  0x53   : > { %542 = vmatmul.bf16.vlgmr.msrb.gmra.mxu1 %v1003_v2 }
  0xaf   : > { %v1176_v12 = vpop.f32.mrf.mxu0 }
  0xb0   : > { %v1178_v13 = vpop.f32.mrf.mxu1 }
  0xb5   : > { %v500_v14 = vpop.f32.mrf.mxu2 }
  0xb6   : > { %560 = vrot.lane.b32.xlu0 %v500_v14, %s1063_s5 }
  0xb7   : > { %v519_v15 = vpop.f32.mrf.mxu3  ;;  %v399_v16 = vpop.f32.mrf.mxu0 }
  0xb8   : > { %v418_v17 = vpop.f32.mrf.mxu1 }
  0xbd   : > { %v502_v18 = vpop.f32.mrf.mxu2 }
  0xbe   : > { %566 = vrot.lane.b32.xlu1 %v502_v18, %s1063_s5  ;;  %562 = vrot.lane.b32.xlu0 %v519_v15, %s1063_s5 }
  0xbf   : > { %v521_v19 = vpop.f32.mrf.mxu3  ;;  %v402_v20 = vpop.f32.mrf.mxu0 }
  0xc0   : > { %568 = vrot.lane.b32.xlu2 %v521_v19, %s1063_s5  ;;  %v421_v21 = vpop.f32.mrf.mxu1 }
  0xc5   : > { %v505_v22 = vpop.f32.mrf.mxu2 }
  0xc6   : > { %572 = vrot.lane.b32.xlu0 %v505_v22, %s1063_s5  ;;  %v656_v22 = vld [vmem:[%s1209_s15 + $0x8] sm:$0xff] }
  0xc7   : > { %v524_v23 = vpop.f32.mrf.mxu3  ;;  %v1180_v24 = vpop.f32.mrf.mxu0 }
  0xc8   : > { %574 = vrot.lane.b32.xlu1 %v524_v23, %s1063_s5  ;;  %v1182_v25 = vpop.f32.mrf.mxu1 }
  0xcd   : > { %v507_v26 = vpop.f32.mrf.mxu2 }
  0xce   : > { %578 = vrot.lane.b32.xlu0 %v507_v26, %s1063_s5  ;;  %v630_v26 = vld [vmem:[%s1195_s12] sm:$0xff] }
  0xcf   : > { %v538_v27 = vpop.f32.mrf.mxu0  ;;  %v526_v29 = vpop.f32.mrf.mxu3 }
  0xd0   : > { %v543_v28 = vpop.f32.mrf.mxu1  ;;  %564 = vrot.lane.b32.xlu1 %v538_v27, %s1063_s5 }
  0xd1   : > { %576 = vrot.lane.b32.xlu2 %v543_v28, %s1063_s5 }
  0xd7   : > { %v540_v30 = vpop.f32.mrf.mxu0 }
  0xd8   : > { %580 = vrot.lane.b32.xlu1 %v526_v29, %s1063_s5  ;;  %v545_v31 = vpop.f32.mrf.mxu1  ;;  %v655_v29 = vld [vmem:[%s1209_s15] sm:$0xff] }
  0xd9   : > { %570 = vrot.lane.b32.xlu2 %v540_v30, %s1063_s5  ;;  %v633_v30 = vld [vmem:[%s1195_s12 + $0x18] sm:$0xff] }
  0xe1   : > { %582 = vrot.lane.b32.xlu2 %v545_v31, %s1063_s5 }
 0x11a   : > { %v569_v32 = vpop.permute.xlu2 %568 }
 0x128   : > { %v561_v33 = vpop.permute.xlu0 %560 }
 0x12b   : > { %v577_v34 = vpop.permute.xlu2 %576 }
 0x130   : > { %v567_v35 = vpop.permute.xlu1 %566  ;;  %v563_v36 = vpop.permute.xlu0 %562 }
 0x131   : > { %v587_v37 = vsel %vm584_vm0, %v567_v35, %v569_v32  ;;  %v585_v56 = vsel %vm584_vm0, %v561_v33, %v563_v36  ;;  %v658_v35 = vld [vmem:[%s1209_s15 + $0x18] sm:$0xff] }
 0x132   : > { %v603_v40 = vadd.f32 %v587_v37, %v399_v16  ;;  %v601_v59 = vadd.f32 %v585_v56, %v1176_v12 }
 0x133   : > { %v571_v38 = vpop.permute.xlu2 %570 }
 0x134   : > { %v588_v39 = vsel %vm584_vm0, %v569_v32, %v571_v38  ;;  %v661_v54 = vmul.f32 %v603_v40, %v603_v40  ;;  %v659_v7 = vmul.f32 %v601_v59, %v601_v59 }
 0x135   : > { %v604_v41 = vadd.f32 %v588_v39, %v418_v17  ;;  %v631_v17 = vld [vmem:[%s1195_s12 + $0x8] sm:$0xff] }
 0x137   : > { %v610_v42 = vpack.c.bf16 %v604_v41, %v603_v40  ;;  %v637_v43 = vadd.f32 %v604_v41, %v603_v40  ;;  %v662_v51 = vmul.f32 %v604_v41, %v604_v41 }
 0x138   : > { %v573_v44 = vpop.permute.xlu0 %572 }
 0x139   : > { %614 = vst [vmem:[%s1190_s9 + $0x8] sm:$0xff] %v610_v42  ;;  %638 = vadd.xlane.f32.xlu1 %v637_v43  ;;  %v670_v55 = vadd.f32 %v662_v51, %v661_v54 }
 0x13a   : > { %v575_v45 = vpop.permute.xlu1 %574 }
 0x13b   : > { %v589_v46 = vsel %vm584_vm0, %v573_v44, %v575_v45  ;;  %v590_v47 = vsel %vm584_vm0, %v575_v45, %v577_v34  ;;  %v583_v63 = vpop.permute.xlu2 %582 }
 0x13c   : > { %v605_v49 = vadd.f32 %v589_v46, %v402_v20  ;;  %v606_v50 = vadd.f32 %v590_v47, %v421_v21  ;;  %v632_v20 = vld [vmem:[%s1195_s12 + $0x10] sm:$0xff] }
 0x13e   : > { %v611_v52 = vpack.c.bf16 %v606_v50, %v605_v49  ;;  %v640_v53 = vadd.f32 %v606_v50, %v605_v49  ;;  %v664_v14 = vmul.f32 %v606_v50, %v606_v50 }
 0x140   : > { %615 = vst [vmem:[%s1190_s9 + $0x10] sm:$0xff] %v611_v52  ;;  %641 = vadd.xlane.f32.xlu2 %v640_v53  ;;  %v579_v0 = vpop.permute.xlu0 %578 }
 0x141   : > { %671 = vadd.xlane.f32.xlu1 %v670_v55 }
 0x142   : > { %v565_v57 = vpop.permute.xlu1 %564 }
 0x143   : > { %v586_v58 = vsel %vm584_vm0, %v563_v36, %v565_v57  ;;  %v657_v36 = vld [vmem:[%s1209_s15 + $0x10] sm:$0xff] }
 0x144   : > { %v602_v60 = vadd.f32 %v586_v58, %v1178_v13  ;;  %v663_v13 = vmul.f32 %v605_v49, %v605_v49 }
 0x146   : > { %v609_v61 = vpack.c.bf16 %v602_v60, %v601_v59  ;;  %v634_v62 = vadd.f32 %v602_v60, %v601_v59  ;;  %v660_v2 = vmul.f32 %v602_v60, %v602_v60  ;;  %v673_v16 = vadd.f32 %v664_v14, %v663_v13 }
 0x148   : > { %613 = vst [vmem:[%s1190_s9] sm:$0xff] %v609_v61  ;;  %635 = vadd.xlane.f32.xlu0 %v634_v62  ;;  %v667_v9 = vadd.f32 %v660_v2, %v659_v7 }
 0x14a   : > { %v581_v1 = vpop.permute.xlu1 %580 }
 0x14b   : > { %v591_v3 = vsel %vm584_vm0, %v579_v0, %v581_v1  ;;  %v592_v4 = vsel %vm584_vm0, %v581_v1, %v583_v63 }
 0x14c   : > { %v607_v5 = vadd.f32 %v591_v3, %v1180_v24  ;;  %v608_v6 = vadd.f32 %v592_v4, %v1182_v25 }
 0x14e   : > { %v612_v8 = vpack.c.bf16 %v608_v6, %v607_v5  ;;  %v643_v10 = vadd.f32 %v608_v6, %v607_v5  ;;  %v665_v11 = vmul.f32 %v607_v5, %v607_v5  ;;  %v666_v12 = vmul.f32 %v608_v6, %v608_v6 }
 0x150   : > { %616 = vst [vmem:[%s1190_s9 + $0x18] sm:$0xff] %v612_v8  ;;  %668 = vadd.xlane.f32.xlu0 %v667_v9  ;;  %644 = vadd.xlane.f32.xlu2 %v643_v10  ;;  %v676_v15 = vadd.f32 %v666_v12, %v665_v11 }
 0x158   : > { %677 = vadd.xlane.f32.xlu0 %v676_v15  ;;  %674 = vadd.xlane.f32.xlu2 %v673_v16 }
 0x1ac   : > { %v639_v18 = vpop.xlane.xlu1 %638 }
 0x1ad   : > { %v647_v19 = vadd.f32 %v639_v18, %v631_v17 }
 0x1af   : > { %652 = vst.msk [vmem:[%s1195_s12 + $0x8] sm:$0xff] %vm621_vm1, %v647_v19 }
 0x1b3   : > { %v642_v21 = vpop.xlane.xlu2 %641 }
 0x1b4   : > { %v648_v23 = vadd.f32 %v642_v21, %v632_v20  ;;  %v672_v24 = vpop.xlane.xlu1 %671 }
 0x1b5   : > { %v680_v25 = vadd.f32 %v672_v24, %v656_v22 }
 0x1b6   : > { %653 = vst.msk [vmem:[%s1195_s12 + $0x10] sm:$0xff] %vm621_vm1, %v648_v23 }
 0x1b7   : > { %684 = vst.msk [vmem:[%s1209_s15 + $0x8] sm:$0xff] %vm621_vm1, %v680_v25 }
 0x1bb   : > { %v636_v27 = vpop.xlane.xlu0 %635 }
 0x1bc   : > { %v646_v28 = vadd.f32 %v636_v27, %v630_v26 }
 0x1be   : > { %651 = vst.msk [vmem:[%s1195_s12] sm:$0xff] %vm621_vm1, %v646_v28 }
 0x1c3   : > { %v669_v31 = vpop.xlane.xlu0 %668  ;;  %v645_v32 = vpop.xlane.xlu2 %644 }
 0x1c4   : > { %v679_v33 = vadd.f32 %v669_v31, %v655_v29  ;;  %v649_v34 = vadd.f32 %v645_v32, %v633_v30 }
 0x1c6   : > { %683 = vst.msk [vmem:[%s1209_s15] sm:$0xff] %vm621_vm1, %v679_v33 }
 0x1c7   : > { %654 = vst.msk [vmem:[%s1195_s12 + $0x18] sm:$0xff] %vm621_vm1, %v649_v34 }
 0x1cb   : > { %v678_v37 = vpop.xlane.xlu0 %677  ;;  %v675_v38 = vpop.xlane.xlu2 %674 }
 0x1cc   : > { %v682_v39 = vadd.f32 %v678_v37, %v658_v35  ;;  %v681_v40 = vadd.f32 %v675_v38, %v657_v36 }
 0x1ce   : > { %686 = vst.msk [vmem:[%s1209_s15 + $0x18] sm:$0xff] %vm621_vm1, %v682_v39 }
 0x1cf   : > { %685 = vst.msk [vmem:[%s1209_s15 + $0x10] sm:$0xff] %vm621_vm1, %v681_v40 }
 0x1d0 PF: > { %s15_s17 = sadd.s32 1, %s1061_s17   ;;  %s1270_s15 = smov %s1057_s16 }
 0x1d1   : > { %p12_p5 = scmp.ge.s32.totalorder %s15_s17, 4   ;;  %s1271_s16 = smov %s1273_s18 }
 0x1d3   :  { %14 = sbr.rel (!%p12_p5) target bundleno = 2 (0x2), region = 87 }

// kernel: forward.9
= control target key start
LH: loop header
LB: loop body
LE: loop exit
PB: predicated region body
PF: predicated region fallthrough
CT: control target
= control target key end

     0   :  { %s978_s15 = smov 0   ;;  %s980_s16 = smov 0   ;;  %s1150_s0 = inlined_call_operand.vmem [shape: bf16[2,1,256,72], index: 0, kind: input, shape index: {}]   ;;  %s1151_s1 = inlined_call_operand.vmem [shape: bf16[2,32,256], index: 1, kind: input, shape index: {}]   ;;  %s1152_s2 = inlined_call_operand.vmem [shape: bf16[2,32,64], index: 2, kind: output, shape index: {0}]   ;;  %s1153_s3 = inlined_call_operand.vmem [shape: f32[2,32,1], index: 3, kind: output, shape index: {1}]   ;;  %s1154_s4 = inlined_call_operand.vmem [shape: f32[2,32,1], index: 4, kind: output, shape index: {2}]  }
   0x1   :  { %s982_s17 = smov 0  }
   0x2 LB: > { %s27_s18 = sadd.s32 1, %s945_s16  ;;  %p762_p0 = scmp.ge.s32.totalorder %s949_s17, 1  ;;  %s949_s17 = sphi %s982_s17, %s15_s17   ;;  %s945_s16 = sphi %s980_s16, %s1156_s16   ;;  %s941_s15 = sphi %s978_s15, %s1155_s15  }
   0x3   : > { %p29_p1 = scmp.ge.s32.totalorder %s27_s18, 2  ;;  %p187_p2 = scmp.lt.s32.totalorder %s949_s17, 3 }
   0x5   : > { %s1158_s18 = smov (%p29_p1, %s27_s18), 0  ;;  %p188_p3 = pnand %p762_p0, %p187_p2 }
   0x6   : > { %p230_p4 = scmp.lt.s32.totalorder (!%p188_p3), %s941_s15, 1  ;;  %s951_s7 = smov (!%p188_p3), 120  }
   0x7   : > { %191 = sbr.rel (%p188_p3) target bundleno = 459 (0x1cb), region = 28 }
   0xc   : > { %s1160_s15 = smov (!%p230_p4, %s941_s15), 1  ;;  %v857_v14 = vld [vmem:[%s1151_s1 + $0x20] sm:$0xf]  ;;  %v898_v15 = vld [vmem:[%s1151_s1 + $0x24] sm:$0xf0]  ;;  %vm556_vm0 = vcmask 523264  }
   0xd   : > { %s873_s19 = sshll.u32 %s1160_s15, 7  ;;  %v897_v16 = vld [vmem:[%s1151_s1 + $0x24] sm:$0xf]  ;;  %v859_v17 = vld [vmem:[%s1151_s1 + $0x28] sm:$0xf0]  ;;  %v858_v24 = vor.u32 %v898_v15, %v857_v14  ;;  %s874_s8 = sshll.u32 %s1160_s15, 4 }
   0xe   : > { %s1002_s22 = scalar_lea.vmem %s1150_s0, %s873_s19  ;;  %v773_v20 = vld [vmem:[%s1151_s1] sm:$0xf]  ;;  %v894_v21 = vld [vmem:[%s1151_s1 + $0x4] sm:$0xf0]  ;;  %v893_v22 = vld [vmem:[%s1151_s1 + $0x4] sm:$0xf]  ;;  %v862_v25 = vor.u32 %v897_v16, %v859_v17  ;;  %s1072_s11 = scalar_lea.vmem %s1152_s2, %s874_s8 }
   0xf   : > { %v884_v0 = vld [vmem:[%s1002_s22 + $0x38] sm:$0xff]  ;;  %v883_v2 = vld [vmem:[%s1002_s22 + $0x30] sm:$0xff]  ;;  %v882_v4 = vld [vmem:[%s1002_s22 + $0x28] sm:$0xff]  ;;  %v774_v26 = vor.u32 %v894_v21, %v773_v20  ;;  %vm534_vm1 = vcmask 519168   ;;  %s875_s12 = sshll.u32 %s1160_s15, 5  ;;  %vm543_vm2 = vcmask 7168  }
  0x10   : > { %v892_v1 = vld [vmem:[%s1002_s22 + $0x78] sm:$0xff]  ;;  %472 = vmatpush.bf16.msra.mxu2 %v884_v0  ;;  %v891_v3 = vld [vmem:[%s1002_s22 + $0x70] sm:$0xff]  ;;  %409 = vmatpush.bf16.msra.mxu0 %v884_v0  ;;  %v890_v5 = vld [vmem:[%s1002_s22 + $0x68] sm:$0xff]  ;;  %s1082_s19 = scalar_lea.vmem %s1153_s3, %s875_s12  ;;  %s1093_s21 = scalar_lea.vmem %s1154_s4, %s875_s12 }
  0x11   : > { %491 = vmatpush.bf16.msra.mxu3 %v892_v1  ;;  %428 = vmatpush.bf16.msra.mxu1 %v892_v1  ;;  %v881_v6 = vld [vmem:[%s1002_s22 + $0x20] sm:$0xff]  ;;  %v880_v8 = vld [vmem:[%s1002_s22 + $0x18] sm:$0xff]  ;;  %v879_v10 = vld [vmem:[%s1002_s22 + $0x10] sm:$0xff] }
  0x12   : > { %v889_v7 = vld [vmem:[%s1002_s22 + $0x60] sm:$0xff]  ;;  %v888_v9 = vld [vmem:[%s1002_s22 + $0x58] sm:$0xff]  ;;  %v887_v11 = vld [vmem:[%s1002_s22 + $0x50] sm:$0xff] }
  0x13   : > { %v878_v12 = vld [vmem:[%s1002_s22 + $0x8] sm:$0xff]  ;;  %v877_v18 = vld [vmem:[%s1002_s22] sm:$0xff]  ;;  %v865_v28 = vld [vmem:[%s1151_s1 + $0x30] sm:$0xf] }
  0x14   : > { %473 = vmatpush.bf16.msra.mxu2 %v883_v2  ;;  %410 = vmatpush.bf16.msra.mxu0 %v883_v2  ;;  %v886_v13 = vld [vmem:[%s1002_s22 + $0x48] sm:$0xff]  ;;  %v885_v19 = vld [vmem:[%s1002_s22 + $0x40] sm:$0xff]  ;;  %v900_v29 = vld [vmem:[%s1151_s1 + $0x34] sm:$0xf0] }
  0x15   : > { %492 = vmatpush.bf16.msra.mxu3 %v891_v3  ;;  %429 = vmatpush.bf16.msra.mxu1 %v891_v3  ;;  %v775_v23 = vld [vmem:[%s1151_s1 + $0x8] sm:$0xf0]  ;;  %v899_v30 = vld [vmem:[%s1151_s1 + $0x34] sm:$0xf]  ;;  %v867_v31 = vld [vmem:[%s1151_s1 + $0x38] sm:$0xf0]  ;;  %v866_v32 = vor.u32 %v900_v29, %v865_v28 }
  0x16   : > { %v778_v27 = vor.u32 %v893_v22, %v775_v23  ;;  %v870_v33 = vor.u32 %v899_v30, %v867_v31  ;;  %v781_v34 = vld [vmem:[%s1151_s1 + $0x10] sm:$0xf]  ;;  %v896_v35 = vld [vmem:[%s1151_s1 + $0x14] sm:$0xf0]  ;;  %v895_v36 = vld [vmem:[%s1151_s1 + $0x14] sm:$0xf] }
  0x17   : > { %v782_v37 = vor.u32 %v896_v35, %v781_v34  ;;  %v783_v38 = vld [vmem:[%s1151_s1 + $0x18] sm:$0xf0] }
  0x18   : > { %474 = vmatpush.bf16.msra.mxu2 %v882_v4  ;;  %411 = vmatpush.bf16.msra.mxu0 %v882_v4  ;;  %v786_v39 = vor.u32 %v895_v36, %v783_v38 }
  0x19   : > { %493 = vmatpush.bf16.msra.mxu3 %v890_v5  ;;  %430 = vmatpush.bf16.msra.mxu1 %v890_v5  ;;  %v952_v5 = vmov 0.0  }
  0x1a   : > { %544 = vst.msk [vmem:[%s1082_s19] sm:$0xff] %vm543_vm2, %v952_v5 }
  0x1b   : > { %545 = vst.msk [vmem:[%s1082_s19 + $0x8] sm:$0xff] %vm543_vm2, %v952_v5 }
  0x1c   : > { %475 = vmatpush.bf16.msra.mxu2 %v881_v6  ;;  %412 = vmatpush.bf16.msra.mxu0 %v881_v6  ;;  %546 = vst.msk [vmem:[%s1082_s19 + $0x10] sm:$0xff] %vm543_vm2, %v952_v5 }
  0x1d   : > { %494 = vmatpush.bf16.msra.mxu3 %v889_v7  ;;  %431 = vmatpush.bf16.msra.mxu1 %v889_v7  ;;  %547 = vst.msk [vmem:[%s1082_s19 + $0x18] sm:$0xff] %vm543_vm2, %v952_v5 }
  0x1e   : > { %548 = vst.msk [vmem:[%s1093_s21] sm:$0xff] %vm543_vm2, %v952_v5 }
  0x1f   : > { %549 = vst.msk [vmem:[%s1093_s21 + $0x8] sm:$0xff] %vm543_vm2, %v952_v5 }
  0x20   : > { %476 = vmatpush.bf16.msra.mxu2 %v880_v8  ;;  %413 = vmatpush.bf16.msra.mxu0 %v880_v8  ;;  %550 = vst.msk [vmem:[%s1093_s21 + $0x10] sm:$0xff] %vm543_vm2, %v952_v5 }
  0x21   : > { %495 = vmatpush.bf16.msra.mxu3 %v888_v9  ;;  %432 = vmatpush.bf16.msra.mxu1 %v888_v9  ;;  %551 = vst.msk [vmem:[%s1093_s21 + $0x18] sm:$0xff] %vm543_vm2, %v952_v5 }
  0x22   : > { %v553_v28 = vld [vmem:[%s1082_s19 + $0x8] sm:$0xff] }
  0x24   : > { %477 = vmatpush.bf16.msra.mxu2 %v879_v10  ;;  %414 = vmatpush.bf16.msra.mxu0 %v879_v10  ;;  %v555_v38 = vld [vmem:[%s1082_s19 + $0x18] sm:$0xff] }
  0x25   : > { %496 = vmatpush.bf16.msra.mxu3 %v887_v11  ;;  %433 = vmatpush.bf16.msra.mxu1 %v887_v11  ;;  %v578_v31 = vld [vmem:[%s1093_s21] sm:$0xff] }
  0x28   : > { %478 = vmatpush.bf16.msra.mxu2 %v878_v12  ;;  %415 = vmatpush.bf16.msra.mxu0 %v878_v12 }
  0x29   : > { %497 = vmatpush.bf16.msra.mxu3 %v886_v13  ;;  %434 = vmatpush.bf16.msra.mxu1 %v886_v13 }
  0x2c   : > { %479 = vmatpush.bf16.msra.mxu2 %v877_v18  ;;  %416 = vmatpush.bf16.msra.mxu0 %v877_v18 }
  0x2d   : > { %498 = vmatpush.bf16.msra.mxu3 %v885_v19  ;;  %435 = vmatpush.bf16.msra.mxu1 %v885_v19 }
  0x2f   : > { %480 = vmatmul.bf16.vlgmr.msra.gmra.mxu2 %v858_v24  ;;  %417 = vmatmul.bf16.vlgmr.msra.gmra.mxu0 %v774_v26 }
  0x30   : > { %499 = vmatmul.bf16.vlgmr.msra.gmra.mxu3 %v862_v25  ;;  %436 = vmatmul.bf16.vlgmr.msra.gmra.mxu1 %v778_v27  ;;  %v552_v25 = vld [vmem:[%s1082_s19] sm:$0xff] }
  0x3f   : > { %485 = vmatmul.bf16.gmra.mxu2 %v866_v32  ;;  %422 = vmatmul.bf16.gmra.mxu0 %v782_v37  ;;  %v554_v32 = vld [vmem:[%s1082_s19 + $0x10] sm:$0xff]  ;;  %v579_v37 = vld [vmem:[%s1093_s21 + $0x8] sm:$0xff] }
  0x40   : > { %504 = vmatmul.bf16.gmra.mxu3 %v870_v33  ;;  %441 = vmatmul.bf16.gmra.mxu1 %v786_v39 }
  0xac   : > { %v418_v52 = vpop.f32.mrf.mxu0 }
  0xad   : > { %v437_v53 = vpop.f32.mrf.mxu1 }
  0xae   : > { %v438_v54 = vadd.f32 %v437_v53, %v418_v52 }
  0xb2   : > { %v481_v40 = vpop.f32.mrf.mxu2 }
  0xb3   : > { %v500_v41 = vpop.f32.mrf.mxu3 }
  0xb4   : > { %v501_v42 = vadd.f32 %v500_v41, %v481_v40  ;;  %v420_v55 = vpop.f32.mrf.mxu0 }
  0xb5   : > { %v439_v56 = vpop.f32.mrf.mxu1 }
  0xb6   : > { %514 = vrot.lane.b32.xlu0 %v501_v42, %s951_s7  ;;  %v440_v61 = vadd.f32 %v439_v56, %v420_v55 }
  0xba   : > { %v483_v43 = vpop.f32.mrf.mxu2 }
  0xbb   : > { %v502_v44 = vpop.f32.mrf.mxu3 }
  0xbc   : > { %v503_v45 = vadd.f32 %v502_v44, %v483_v43  ;;  %v423_v62 = vpop.f32.mrf.mxu0  ;;  %v580_v43 = vld [vmem:[%s1093_s21 + $0x10] sm:$0xff] }
  0xbd   : > { %v442_v0 = vpop.f32.mrf.mxu1 }
  0xbe   : > { %516 = vrot.lane.b32.xlu0 %v503_v45, %s951_s7  ;;  %v443_v4 = vadd.f32 %v442_v0, %v423_v62 }
  0xc2   : > { %v486_v46 = vpop.f32.mrf.mxu2 }
  0xc3   : > { %v505_v47 = vpop.f32.mrf.mxu3 }
  0xc4   : > { %v506_v48 = vadd.f32 %v505_v47, %v486_v46  ;;  %v425_v10 = vpop.f32.mrf.mxu0  ;;  %v581_v46 = vld [vmem:[%s1093_s21 + $0x18] sm:$0xff] }
  0xc5   : > { %v444_v9 = vpop.f32.mrf.mxu1 }
  0xc6   : > { %518 = vrot.lane.b32.xlu1 %v506_v48, %s951_s7  ;;  %v445_v14 = vadd.f32 %v444_v9, %v425_v10 }
  0xca   : > { %v488_v49 = vpop.f32.mrf.mxu2 }
  0xcb   : > { %v507_v50 = vpop.f32.mrf.mxu3 }
  0xcc   : > { %v508_v51 = vadd.f32 %v507_v50, %v488_v49 }
  0xce   : > { %520 = vrot.lane.b32.xlu1 %v508_v51, %s951_s7 }
 0x128   : > { %v515_v57 = vpop.permute.xlu0 %514 }
 0x129   : > { %v526_v58 = vadd.f32 %v515_v57, %v438_v54 }
 0x12b   : > { %v530_v59 = vpack.c.bf16 %v526_v58, %v526_v58  ;;  %v557_v60 = vsel %vm556_vm0, %v526_v58, 0.0  ;;  %v582_v6 = vmul.f32 %v526_v58, %v526_v58 }
 0x12c   : > { %558 = vadd.xlane.f32.xlu2 %v557_v60 }
 0x12d   : > { %535 = vst.msk [vmem:[%s1072_s11] sm:$0xf] %vm534_vm1, %v530_v59  ;;  %v586_v11 = vsel %vm556_vm0, %v582_v6, 0.0 }
 0x130   : > { %v517_v63 = vpop.permute.xlu0 %516 }
 0x131   : > { %v527_v1 = vadd.f32 %v517_v63, %v440_v61 }
 0x133   : > { %v531_v2 = vpack.c.bf16 %v527_v1, %v527_v1  ;;  %v560_v3 = vsel %vm556_vm0, %v527_v1, 0.0  ;;  %v583_v15 = vmul.f32 %v527_v1, %v527_v1 }
 0x134   : > { %561 = vadd.xlane.f32.xlu2 %v560_v3 }
 0x135   : > { %536 = vst.msk [vmem:[%s1072_s11 + $0x4] sm:$0xf] %vm534_vm1, %v531_v2  ;;  %v589_v18 = vsel %vm556_vm0, %v583_v15, 0.0 }
 0x138   : > { %v519_v7 = vpop.permute.xlu1 %518 }
 0x139   : > { %v528_v8 = vadd.f32 %v519_v7, %v443_v4 }
 0x13b   : > { %v532_v12 = vpack.c.bf16 %v528_v8, %v528_v8  ;;  %v563_v13 = vsel %vm556_vm0, %v528_v8, 0.0  ;;  %v584_v21 = vmul.f32 %v528_v8, %v528_v8 }
 0x13c   : > { %587 = vadd.xlane.f32.xlu2 %v586_v11  ;;  %564 = vadd.xlane.f32.xlu0 %v563_v13 }
 0x13d   : > { %537 = vst.msk [vmem:[%s1072_s11 + $0x8] sm:$0xf] %vm534_vm1, %v532_v12  ;;  %v592_v22 = vsel %vm556_vm0, %v584_v21, 0.0 }
 0x140   : > { %v521_v16 = vpop.permute.xlu1 %520 }
 0x141   : > { %v529_v17 = vadd.f32 %v521_v16, %v445_v14 }
 0x143   : > { %v533_v19 = vpack.c.bf16 %v529_v17, %v529_v17  ;;  %v566_v20 = vsel %vm556_vm0, %v529_v17, 0.0  ;;  %v585_v23 = vmul.f32 %v529_v17, %v529_v17 }
 0x144   : > { %590 = vadd.xlane.f32.xlu2 %v589_v18  ;;  %567 = vadd.xlane.f32.xlu1 %v566_v20 }
 0x145   : > { %538 = vst.msk [vmem:[%s1072_s11 + $0xc] sm:$0xf] %vm534_vm1, %v533_v19  ;;  %v595_v24 = vsel %vm556_vm0, %v585_v23, 0.0 }
 0x14c   : > { %593 = vadd.xlane.f32.xlu2 %v592_v22 }
 0x154   : > { %596 = vadd.xlane.f32.xlu2 %v595_v24 }
 0x19f   : > { %v559_v26 = vpop.xlane.xlu2 %558 }
 0x1a0   : > { %v569_v27 = vadd.f32 %v559_v26, %v552_v25 }
 0x1a2   : > { %574 = vst.msk [vmem:[%s1082_s19] sm:$0xff] %vm543_vm2, %v569_v27 }
 0x1a7   : > { %v562_v29 = vpop.xlane.xlu2 %561 }
 0x1a8   : > { %v570_v30 = vadd.f32 %v562_v29, %v553_v28 }
 0x1aa   : > { %575 = vst.msk [vmem:[%s1082_s19 + $0x8] sm:$0xff] %vm543_vm2, %v570_v30 }
 0x1af   : > { %v588_v33 = vpop.xlane.xlu2 %587  ;;  %v565_v34 = vpop.xlane.xlu0 %564 }
 0x1b0   : > { %v598_v35 = vadd.f32 %v588_v33, %v578_v31  ;;  %v571_v36 = vadd.f32 %v565_v34, %v554_v32 }
 0x1b2   : > { %602 = vst.msk [vmem:[%s1093_s21] sm:$0xff] %vm543_vm2, %v598_v35 }
 0x1b3   : > { %576 = vst.msk [vmem:[%s1082_s19 + $0x10] sm:$0xff] %vm543_vm2, %v571_v36 }
 0x1b7   : > { %v591_v39 = vpop.xlane.xlu2 %590  ;;  %v568_v40 = vpop.xlane.xlu1 %567 }
 0x1b8   : > { %v599_v41 = vadd.f32 %v591_v39, %v579_v37  ;;  %v572_v42 = vadd.f32 %v568_v40, %v555_v38 }
 0x1ba   : > { %603 = vst.msk [vmem:[%s1093_s21 + $0x8] sm:$0xff] %vm543_vm2, %v599_v41 }
 0x1bb   : > { %577 = vst.msk [vmem:[%s1082_s19 + $0x18] sm:$0xff] %vm543_vm2, %v572_v42 }
 0x1bf   : > { %v594_v44 = vpop.xlane.xlu2 %593 }
 0x1c0   : > { %v600_v45 = vadd.f32 %v594_v44, %v580_v43 }
 0x1c2   : > { %604 = vst.msk [vmem:[%s1093_s21 + $0x10] sm:$0xff] %vm543_vm2, %v600_v45 }
 0x1c7   : > { %v597_v47 = vpop.xlane.xlu2 %596 }
 0x1c8   : > { %v601_v48 = vadd.f32 %v597_v47, %v581_v46 }
 0x1ca   : > { %605 = vst.msk [vmem:[%s1093_s21 + $0x18] sm:$0xff] %vm543_vm2, %v601_v48 }
 0x1cb PF: > { %s15_s17 = sadd.s32 1, %s949_s17   ;;  %s1155_s15 = smov %s945_s16 }
 0x1cc   : > { %p12_p5 = scmp.ge.s32.totalorder %s15_s17, 4   ;;  %s1156_s16 = smov %s1158_s18 }
 0x1ce   :  { %14 = sbr.rel (!%p12_p5) target bundleno = 2 (0x2), region = 87 }

</bundles_post_ra>
